<compile_context>
chip_gen: v5e
topology: v5e:2x2
jax: 0.10.0
libtpu: 0.0.40
codegen_flags: <defaults>
</compile_context>

<pallas_src>
import jax
import jax.numpy as jnp
from jax.experimental import pallas as pl
from jax.experimental.pallas import tpu as pltpu


# ----------------------- fused Conv2d(5x5, pad=2) + bias + MaxPool2d(2) -----------------------
def _conv_pool_kernel(xs_ref, w_ref, b_ref, o_ref):
    # xs_ref: (K, 4*BP) bf16   column-permuted im2col; col = q*BP + b*P + p, q in {0..3}
    #                          is the position inside the 2x2 pool window, p the pooled pixel.
    # w_ref : (Cout, K) bf16   flattened 5x5 weights (K = 25*Cin).
    # b_ref : (Cout, 1) f32
    # o_ref : (Cout, BP) f32   pooled output slab (lane-dense).
    BP = o_ref.shape[1]
    # One big MXU matmul, f32 accumulation.
    y = jnp.dot(w_ref[...], xs_ref[...], preferred_element_type=jnp.float32)  # (Cout, 4*BP)
    # 2x2 max-pool == elementwise max over the 4 contiguous q-blocks; bias after the max
    # (max(a+b, c+b) == max(a,c)+b since bias is constant per channel).
    m0 = jnp.maximum(y[:, 0 * BP:1 * BP], y[:, 1 * BP:2 * BP])
    m1 = jnp.maximum(y[:, 2 * BP:3 * BP], y[:, 3 * BP:4 * BP])
    o_ref[...] = jnp.maximum(m0, m1) + b_ref[...]


def _pick_batch_tile(B, P, max_cols):
    """Largest batch tile Bt dividing B with 128-aligned, VMEM-bounded columns."""
    if 4 * B * P <= max_cols:
        return B                      # whole batch in one block (full dims always legal)
    best = B
    for bt in range(1, B):
        if B % bt == 0 and (bt * P) % 128 == 0 and 4 * bt * P <= max_cols:
            best = bt
    return best


def _im2col_pooled_cm(x, bt):
    """x: (C, B, H, W) -> (25*C, (B//bt)*4*bt*(H//2)*(W//2)).

    Row index = (di*5+dj)*C + c.  Column index = t*(4*bt*P) + q*(bt*P) + b_local*P + p,
    with q = (h%2)*2 + (w%2), p = (h//2)*(W//2) + (w//2).  Built once per layer in XLA.
    """
    C, B, H, W = x.shape
    Ho, Wo = H // 2, W // 2
    T = B // bt
    xp = jnp.pad(x, ((0, 0), (0, 0), (2, 2), (2, 2)))
    shifts = [xp[:, :, di:di + H, dj:dj + W] for di in range(5) for dj in range(5)]
    xs = jnp.stack(shifts, axis=0)                      # (25, C, B, H, W)
    xs = xs.reshape(25, C, T, bt, Ho, 2, Wo, 2)
    xs = jnp.transpose(xs, (0, 1, 2, 5, 7, 3, 4, 6))    # (25, C, T, h2, w2, bt, Ho, Wo)
    return xs.reshape(25 * C, T * 4 * bt * Ho * Wo)


def conv5x5_pool_cm(x, w, b, *, max_cols=4096):
    """Fused Conv2d(Cin->Cout, 5, padding=2) + bias + MaxPool2d(2), channel-major.

    x: (Cin, B, H, W) f32; w: (Cout, Cin, 5, 5); b: (Cout,) -> (Cout, B, H//2, W//2) f32.
    """
    Cin, B, H, W = x.shape
    Cout = w.shape[0]
    assert H % 2 == 0 and W % 2 == 0, "MaxPool2d(2) requires even spatial dims"
    Ho, Wo = H // 2, W // 2
    P = Ho * Wo
    K = 25 * Cin

    bt = _pick_batch_tile(B, P, max_cols)
    T = B // bt

    xs = _im2col_pooled_cm(x, bt).astype(jnp.bfloat16)                          # (K, T*4*bt*P)
    wk = jnp.transpose(w, (0, 2, 3, 1)).reshape(Cout, K).astype(jnp.bfloat16)   # (Cout, K)
    b2 = b.reshape(Cout, 1).astype(jnp.float32)

    out = pl.pallas_call(
        _conv_pool_kernel,
        out_shape=jax.ShapeDtypeStruct((Cout, B * P), jnp.float32),
        grid=(T,),
        in_specs=[
            pl.BlockSpec((K, 4 * bt * P), lambda t: (0, t)),
            pl.BlockSpec((Cout, K), lambda t: (0, 0)),
            pl.BlockSpec((Cout, 1), lambda t: (0, 0)),
        ],
        out_specs=pl.BlockSpec((Cout, bt * P), lambda t: (0, t)),
        compiler_params=pltpu.CompilerParams(dimension_semantics=("parallel",)),
    )(xs, wk, b2)
    return out.reshape(Cout, B, Ho, Wo)


# -------------------------- fused Linear(1024,64) + Linear(64,10) head --------------------------
def _head_kernel(x_ref, w1_ref, b1_ref, w2_ref, b2_ref, o_ref):
    # x_ref: (B, 1024) bf16; w1_ref: (64, 1024) bf16 (torch layout); b1_ref: (1, 64) f32
    # w2_ref: (10, 64) bf16; b2_ref: (1, 10) f32; o_ref: (B, 10) f32
    nt = (((1,), (1,)), ((), ()))   # contract dim-1 of both operands: x @ w.T (torch Linear)
    h = jax.lax.dot_general(x_ref[...], w1_ref[...], nt,
                            preferred_element_type=jnp.float32) + b1_ref[...]
    o_ref[...] = jax.lax.dot_general(h.astype(jnp.bfloat16), w2_ref[...], nt,
                                     preferred_element_type=jnp.float32) + b2_ref[...]


def mlp_head(feat, w1, b1, w2, b2):
    """feat: (B, 1024) f32 -> Linear(1024,64) -> Linear(64,10) -> (B, 10) f32."""
    B = feat.shape[0]
    N = w2.shape[0]
    return pl.pallas_call(
        _head_kernel,
        out_shape=jax.ShapeDtypeStruct((B, N), jnp.float32),
    )(feat.astype(jnp.bfloat16),
      w1.astype(jnp.bfloat16), b1.reshape(1, -1).astype(jnp.float32),
      w2.astype(jnp.bfloat16), b2.reshape(1, -1).astype(jnp.float32))


# --------------------------------------- model forward ---------------------------------------
def squrntial_forward(x, p):
    xc = jnp.transpose(x, (1, 0, 2, 3))           # (3, B, 32, 32) channel-major
    h = conv5x5_pool_cm(xc, p["w1"], p["b1"])     # (32, B, 16, 16)
    h = conv5x5_pool_cm(h, p["w2"], p["b2"])      # (32, B, 8, 8)
    h = conv5x5_pool_cm(h, p["w3"], p["b3"])      # (64, B, 4, 4)
    B = x.shape[0]
    feat = jnp.transpose(h, (1, 0, 2, 3)).reshape(B, -1)   # torch Flatten order (C, H, W)
    return mlp_head(feat, p["wl1"], p["bl1"], p["wl2"], p["bl2"])  # (B, 10)


def init_params(key):
    ks = jax.random.split(key, 10)

    def norm(k, shape, fan_in):
        return jax.random.normal(k, shape, jnp.float32) / jnp.sqrt(float(fan_in))

    return {
        "w1": norm(ks[0], (32, 3, 5, 5), 3 * 25),   "b1": norm(ks[1], (32,), 3 * 25),
        "w2": norm(ks[2], (32, 32, 5, 5), 32 * 25), "b2": norm(ks[3], (32,), 32 * 25),
        "w3": norm(ks[4], (64, 32, 5, 5), 32 * 25), "b3": norm(ks[5], (64,), 32 * 25),
        "wl1": norm(ks[6], (64, 1024), 1024),       "bl1": norm(ks[7], (64,), 1024),
        "wl2": norm(ks[8], (10, 64), 64),           "bl2": norm(ks[9], (10,), 64),
    }


def reference_forward(x, p):
    """XLA reference with the SAME mixed-precision policy as the kernels
    (bf16 matmul operands, f32 accumulation, f32 bias/pool)."""
    bf = jnp.bfloat16

    def conv(x, w, b):
        y = jax.lax.conv_general_dilated(
            x.astype(bf), w.astype(bf), window_strides=(1, 1),
            padding=((2, 2), (2, 2)),
            dimension_numbers=("NCHW", "OIHW", "NCHW"),
            preferred_element_type=jnp.float32)
        return y + b[None, :, None, None]

    def pool(x):
        return jax.lax.reduce_window(x, -jnp.inf, jax.lax.max,
                                     (1, 1, 2, 2), (1, 1, 2, 2), "VALID")

    h = pool(conv(x, p["w1"], p["b1"]))
    h = pool(conv(h, p["w2"], p["b2"]))
    h = pool(conv(h, p["w3"], p["b3"]))
    h = h.reshape(h.shape[0], -1)
    h = jnp.dot(h.astype(bf), p["wl1"].T.astype(bf),
                preferred_element_type=jnp.float32) + p["bl1"]
    return jnp.dot(h.astype(bf), p["wl2"].T.astype(bf),
                   preferred_element_type=jnp.float32) + p["bl2"]


if __name__ == "__main__":
    key = jax.random.PRNGKey(0)
    pkey, xkey = jax.random.split(key)
    params = init_params(pkey)
    # Linear(1024, 64) after three 2x pools of a 64-channel map implies 32x32 input.
    x = jax.random.normal(xkey, (2, 3, 32, 32), jnp.float32)

    out = jax.jit(squrntial_forward)(x, params)
    out = jax.block_until_ready(out)
    assert out.shape == (2, 10), out.shape

    ref = reference_forward(x, params)
    err = float(jnp.max(jnp.abs(out - ref)))
    assert jnp.allclose(out, ref, rtol=5e-3, atol=5e-3), err
    print("KERNEL_OK")
</pallas_src>

<mosaic_0001>
module attributes {stable_mosaic.version = 11 : i64} {
  func.func @_conv_pool_kernel(%arg0: i32, %arg1: memref<75x2048xbf16, #tpu.memory_space<vmem>>, %arg2: memref<32x75xbf16, #tpu.memory_space<vmem>>, %arg3: memref<32x1xf32, #tpu.memory_space<vmem>>, %arg4: memref<32x512xf32, #tpu.memory_space<vmem>>) attributes {dimension_semantics = [#tpu.dimension_semantics<parallel>], iteration_bounds = array<i64: 1>, scalar_prefetch = 0 : i64, scratch_operands = 0 : i64, tpu.core_type = #tpu.core_type<tc>, window_params = [{transform_indices = @transform_0, window_bounds = array<i64: 75, 2048>}, {pipeline_mode = #tpu.pipeline_mode<synchronous>, transform_indices = @transform_1, window_bounds = array<i64: 32, 75>}, {pipeline_mode = #tpu.pipeline_mode<synchronous>, transform_indices = @transform_2, window_bounds = array<i64: 32, 1>}, {transform_indices = @transform_3, window_bounds = array<i64: 32, 512>}]} {
    %c0 = arith.constant 0 : index
    %c0_0 = arith.constant 0 : index
    %0 = vector.load %arg2[%c0, %c0_0] : memref<32x75xbf16, #tpu.memory_space<vmem>>, vector<32x75xbf16>
    %c0_1 = arith.constant 0 : index
    %c0_2 = arith.constant 0 : index
    %1 = vector.load %arg1[%c0_1, %c0_2] : memref<75x2048xbf16, #tpu.memory_space<vmem>>, vector<75x2048xbf16>
    %cst = arith.constant dense<0.000000e+00> : vector<32x2048xf32>
    %2 = tpu.matmul %0, %1, %cst {dimension_numbers = #tpu.dot_dimension_numbers<[1], [0], [0], [1], [0, 0, 1, 1], [], []>} : vector<32x75xbf16>, vector<75x2048xbf16>, vector<32x2048xf32> -> vector<32x2048xf32>
    %3 = vector.extract_strided_slice %2 {offsets = [0, 0], sizes = [32, 512], strides = [1, 1]} : vector<32x2048xf32> to vector<32x512xf32>
    %4 = vector.extract_strided_slice %2 {offsets = [0, 512], sizes = [32, 512], strides = [1, 1]} : vector<32x2048xf32> to vector<32x512xf32>
    %5 = arith.maximumf %3, %4 : vector<32x512xf32>
    %6 = vector.extract_strided_slice %2 {offsets = [0, 1024], sizes = [32, 512], strides = [1, 1]} : vector<32x2048xf32> to vector<32x512xf32>
    %7 = vector.extract_strided_slice %2 {offsets = [0, 1536], sizes = [32, 512], strides = [1, 1]} : vector<32x2048xf32> to vector<32x512xf32>
    %8 = arith.maximumf %6, %7 : vector<32x512xf32>
    %9 = arith.maximumf %5, %8 : vector<32x512xf32>
    %c0_3 = arith.constant 0 : index
    %c0_4 = arith.constant 0 : index
    %10 = vector.load %arg3[%c0_3, %c0_4] : memref<32x1xf32, #tpu.memory_space<vmem>>, vector<32x1xf32>
    %11 = vector.broadcast %10 : vector<32x1xf32> to vector<32x512xf32>
    %12 = arith.addf %9, %11 : vector<32x512xf32>
    %c0_5 = arith.constant 0 : index
    %c0_6 = arith.constant 0 : index
    %13 = vector.load %arg4[%c0_5, %c0_6] : memref<32x512xf32, #tpu.memory_space<vmem>>, vector<32x512xf32>
    tpu.vector_store %arg4[%c0_5, %c0_6], %12 {strides = array<i32>} : memref<32x512xf32, #tpu.memory_space<vmem>>, vector<32x512xf32>,
    return
  }
  func.func @transform_0(%arg0: i32) -> (i32, i32) {
    %c0_i32 = arith.constant 0 : i32
    %c0_i32_0 = arith.constant 0 : i32
    return %c0_i32, %arg0 : i32, i32
  }
  func.func @transform_1(%arg0: i32) -> (i32, i32) {
    %c0_i32 = arith.constant 0 : i32
    %c0_i32_0 = arith.constant 0 : i32
    %c0_i32_1 = arith.constant 0 : i32
    return %c0_i32, %c0_i32_0 : i32, i32
  }
  func.func @transform_2(%arg0: i32) -> (i32, i32) {
    %c0_i32 = arith.constant 0 : i32
    %c0_i32_0 = arith.constant 0 : i32
    %c0_i32_1 = arith.constant 0 : i32
    return %c0_i32, %c0_i32_0 : i32, i32
  }
  func.func @transform_3(%arg0: i32) -> (i32, i32) {
    %c0_i32 = arith.constant 0 : i32
    %c0_i32_0 = arith.constant 0 : i32
    return %c0_i32, %arg0 : i32, i32
  }
}

module attributes {stable_mosaic.version = 11 : i64} {
  func.func @_conv_pool_kernel(%arg0: i32, %arg1: memref<800x512xbf16, #tpu.memory_space<vmem>>, %arg2: memref<32x800xbf16, #tpu.memory_space<vmem>>, %arg3: memref<32x1xf32, #tpu.memory_space<vmem>>, %arg4: memref<32x128xf32, #tpu.memory_space<vmem>>) attributes {dimension_semantics = [#tpu.dimension_semantics<parallel>], iteration_bounds = array<i64: 1>, scalar_prefetch = 0 : i64, scratch_operands = 0 : i64, tpu.core_type = #tpu.core_type<tc>, window_params = [{transform_indices = @transform_0, window_bounds = array<i64: 800, 512>}, {pipeline_mode = #tpu.pipeline_mode<synchronous>, transform_indices = @transform_1, window_bounds = array<i64: 32, 800>}, {pipeline_mode = #tpu.pipeline_mode<synchronous>, transform_indices = @transform_2, window_bounds = array<i64: 32, 1>}, {transform_indices = @transform_3, window_bounds = array<i64: 32, 128>}]} {
    %c0 = arith.constant 0 : index
    %c0_0 = arith.constant 0 : index
    %0 = vector.load %arg2[%c0, %c0_0] : memref<32x800xbf16, #tpu.memory_space<vmem>>, vector<32x800xbf16>
    %c0_1 = arith.constant 0 : index
    %c0_2 = arith.constant 0 : index
    %1 = vector.load %arg1[%c0_1, %c0_2] : memref<800x512xbf16, #tpu.memory_space<vmem>>, vector<800x512xbf16>
    %cst = arith.constant dense<0.000000e+00> : vector<32x512xf32>
    %2 = tpu.matmul %0, %1, %cst {dimension_numbers = #tpu.dot_dimension_numbers<[1], [0], [0], [1], [0, 0, 1, 1], [], []>} : vector<32x800xbf16>, vector<800x512xbf16>, vector<32x512xf32> -> vector<32x512xf32>
    %3 = vector.extract_strided_slice %2 {offsets = [0, 0], sizes = [32, 128], strides = [1, 1]} : vector<32x512xf32> to vector<32x128xf32>
    %4 = vector.extract_strided_slice %2 {offsets = [0, 128], sizes = [32, 128], strides = [1, 1]} : vector<32x512xf32> to vector<32x128xf32>
    %5 = arith.maximumf %3, %4 : vector<32x128xf32>
    %6 = vector.extract_strided_slice %2 {offsets = [0, 256], sizes = [32, 128], strides = [1, 1]} : vector<32x512xf32> to vector<32x128xf32>
    %7 = vector.extract_strided_slice %2 {offsets = [0, 384], sizes = [32, 128], strides = [1, 1]} : vector<32x512xf32> to vector<32x128xf32>
    %8 = arith.maximumf %6, %7 : vector<32x128xf32>
    %9 = arith.maximumf %5, %8 : vector<32x128xf32>
    %c0_3 = arith.constant 0 : index
    %c0_4 = arith.constant 0 : index
    %10 = vector.load %arg3[%c0_3, %c0_4] : memref<32x1xf32, #tpu.memory_space<vmem>>, vector<32x1xf32>
    %11 = vector.broadcast %10 : vector<32x1xf32> to vector<32x128xf32>
    %12 = arith.addf %9, %11 : vector<32x128xf32>
    %c0_5 = arith.constant 0 : index
    %c0_6 = arith.constant 0 : index
    %13 = vector.load %arg4[%c0_5, %c0_6] : memref<32x128xf32, #tpu.memory_space<vmem>>, vector<32x128xf32>
    tpu.vector_store %arg4[%c0_5, %c0_6], %12 {strides = array<i32>} : memref<32x128xf32, #tpu.memory_space<vmem>>, vector<32x128xf32>,
    return
  }
  func.func @transform_0(%arg0: i32) -> (i32, i32) {
    %c0_i32 = arith.constant 0 : i32
    %c0_i32_0 = arith.constant 0 : i32
    return %c0_i32, %arg0 : i32, i32
  }
  func.func @transform_1(%arg0: i32) -> (i32, i32) {
    %c0_i32 = arith.constant 0 : i32
    %c0_i32_0 = arith.constant 0 : i32
    %c0_i32_1 = arith.constant 0 : i32
    return %c0_i32, %c0_i32_0 : i32, i32
  }
  func.func @transform_2(%arg0: i32) -> (i32, i32) {
    %c0_i32 = arith.constant 0 : i32
    %c0_i32_0 = arith.constant 0 : i32
    %c0_i32_1 = arith.constant 0 : i32
    return %c0_i32, %c0_i32_0 : i32, i32
  }
  func.func @transform_3(%arg0: i32) -> (i32, i32) {
    %c0_i32 = arith.constant 0 : i32
    %c0_i32_0 = arith.constant 0 : i32
    return %c0_i32, %arg0 : i32, i32
  }
}

module attributes {stable_mosaic.version = 11 : i64} {
  func.func @_conv_pool_kernel(%arg0: i32, %arg1: memref<800x128xbf16, #tpu.memory_space<vmem>>, %arg2: memref<64x800xbf16, #tpu.memory_space<vmem>>, %arg3: memref<64x1xf32, #tpu.memory_space<vmem>>, %arg4: memref<64x32xf32, #tpu.memory_space<vmem>>) attributes {dimension_semantics = [#tpu.dimension_semantics<parallel>], iteration_bounds = array<i64: 1>, scalar_prefetch = 0 : i64, scratch_operands = 0 : i64, tpu.core_type = #tpu.core_type<tc>, window_params = [{transform_indices = @transform_0, window_bounds = array<i64: 800, 128>}, {pipeline_mode = #tpu.pipeline_mode<synchronous>, transform_indices = @transform_1, window_bounds = array<i64: 64, 800>}, {pipeline_mode = #tpu.pipeline_mode<synchronous>, transform_indices = @transform_2, window_bounds = array<i64: 64, 1>}, {transform_indices = @transform_3, window_bounds = array<i64: 64, 32>}]} {
    %c0 = arith.constant 0 : index
    %c0_0 = arith.constant 0 : index
    %0 = vector.load %arg2[%c0, %c0_0] : memref<64x800xbf16, #tpu.memory_space<vmem>>, vector<64x800xbf16>
    %c0_1 = arith.constant 0 : index
    %c0_2 = arith.constant 0 : index
    %1 = vector.load %arg1[%c0_1, %c0_2] : memref<800x128xbf16, #tpu.memory_space<vmem>>, vector<800x128xbf16>
    %cst = arith.constant dense<0.000000e+00> : vector<64x128xf32>
    %2 = tpu.matmul %0, %1, %cst {dimension_numbers = #tpu.dot_dimension_numbers<[1], [0], [0], [1], [0, 0, 1, 1], [], []>} : vector<64x800xbf16>, vector<800x128xbf16>, vector<64x128xf32> -> vector<64x128xf32>
    %3 = vector.extract_strided_slice %2 {offsets = [0, 0], sizes = [64, 32], strides = [1, 1]} : vector<64x128xf32> to vector<64x32xf32>
    %4 = vector.extract_strided_slice %2 {offsets = [0, 32], sizes = [64, 32], strides = [1, 1]} : vector<64x128xf32> to vector<64x32xf32>
    %5 = arith.maximumf %3, %4 : vector<64x32xf32>
    %6 = vector.extract_strided_slice %2 {offsets = [0, 64], sizes = [64, 32], strides = [1, 1]} : vector<64x128xf32> to vector<64x32xf32>
    %7 = vector.extract_strided_slice %2 {offsets = [0, 96], sizes = [64, 32], strides = [1, 1]} : vector<64x128xf32> to vector<64x32xf32>
    %8 = arith.maximumf %6, %7 : vector<64x32xf32>
    %9 = arith.maximumf %5, %8 : vector<64x32xf32>
    %c0_3 = arith.constant 0 : index
    %c0_4 = arith.constant 0 : index
    %10 = vector.load %arg3[%c0_3, %c0_4] : memref<64x1xf32, #tpu.memory_space<vmem>>, vector<64x1xf32>
    %11 = vector.broadcast %10 : vector<64x1xf32> to vector<64x32xf32>
    %12 = arith.addf %9, %11 : vector<64x32xf32>
    %c0_5 = arith.constant 0 : index
    %c0_6 = arith.constant 0 : index
    %13 = vector.load %arg4[%c0_5, %c0_6] : memref<64x32xf32, #tpu.memory_space<vmem>>, vector<64x32xf32>
    tpu.vector_store %arg4[%c0_5, %c0_6], %12 {strides = array<i32>} : memref<64x32xf32, #tpu.memory_space<vmem>>, vector<64x32xf32>,
    return
  }
  func.func @transform_0(%arg0: i32) -> (i32, i32) {
    %c0_i32 = arith.constant 0 : i32
    %c0_i32_0 = arith.constant 0 : i32
    return %c0_i32, %arg0 : i32, i32
  }
  func.func @transform_1(%arg0: i32) -> (i32, i32) {
    %c0_i32 = arith.constant 0 : i32
    %c0_i32_0 = arith.constant 0 : i32
    %c0_i32_1 = arith.constant 0 : i32
    return %c0_i32, %c0_i32_0 : i32, i32
  }
  func.func @transform_2(%arg0: i32) -> (i32, i32) {
    %c0_i32 = arith.constant 0 : i32
    %c0_i32_0 = arith.constant 0 : i32
    %c0_i32_1 = arith.constant 0 : i32
    return %c0_i32, %c0_i32_0 : i32, i32
  }
  func.func @transform_3(%arg0: i32) -> (i32, i32) {
    %c0_i32 = arith.constant 0 : i32
    %c0_i32_0 = arith.constant 0 : i32
    return %c0_i32, %arg0 : i32, i32
  }
}

module attributes {stable_mosaic.version = 11 : i64} {
  func.func @_head_kernel(%arg0: memref<2x1024xbf16, #tpu.memory_space<vmem>>, %arg1: memref<64x1024xbf16, #tpu.memory_space<vmem>>, %arg2: memref<1x64xf32, #tpu.memory_space<vmem>>, %arg3: memref<10x64xbf16, #tpu.memory_space<vmem>>, %arg4: memref<1x10xf32, #tpu.memory_space<vmem>>, %arg5: memref<2x10xf32, #tpu.memory_space<vmem>>) attributes {dimension_semantics = [], scalar_prefetch = 0 : i64, scratch_operands = 0 : i64, tpu.core_type = #tpu.core_type<tc>} {
    %c0 = arith.constant 0 : index
    %c0_0 = arith.constant 0 : index
    %0 = vector.load %arg0[%c0, %c0_0] : memref<2x1024xbf16, #tpu.memory_space<vmem>>, vector<2x1024xbf16>
    %c0_1 = arith.constant 0 : index
    %c0_2 = arith.constant 0 : index
    %1 = vector.load %arg1[%c0_1, %c0_2] : memref<64x1024xbf16, #tpu.memory_space<vmem>>, vector<64x1024xbf16>
    %cst = arith.constant dense<0.000000e+00> : vector<2x64xf32>
    %2 = tpu.matmul %0, %1, %cst {dimension_numbers = #tpu.dot_dimension_numbers<[1], [1], [0], [0], [0, 0, 1, 0], [], []>} : vector<2x1024xbf16>, vector<64x1024xbf16>, vector<2x64xf32> -> vector<2x64xf32>
    %c0_3 = arith.constant 0 : index
    %c0_4 = arith.constant 0 : index
    %3 = vector.load %arg2[%c0_3, %c0_4] : memref<1x64xf32, #tpu.memory_space<vmem>>, vector<1x64xf32>
    %4 = vector.broadcast %3 : vector<1x64xf32> to vector<2x64xf32>
    %5 = arith.addf %2, %4 : vector<2x64xf32>
    %6 = arith.truncf %5 : vector<2x64xf32> to vector<2x64xbf16>
    %c0_5 = arith.constant 0 : index
    %c0_6 = arith.constant 0 : index
    %7 = vector.load %arg3[%c0_5, %c0_6] : memref<10x64xbf16, #tpu.memory_space<vmem>>, vector<10x64xbf16>
    %cst_7 = arith.constant dense<0.000000e+00> : vector<2x10xf32>
    %8 = tpu.matmul %6, %7, %cst_7 {dimension_numbers = #tpu.dot_dimension_numbers<[1], [1], [0], [0], [0, 0, 1, 0], [], []>} : vector<2x64xbf16>, vector<10x64xbf16>, vector<2x10xf32> -> vector<2x10xf32>
    %c0_8 = arith.constant 0 : index
    %c0_9 = arith.constant 0 : index
    %9 = vector.load %arg4[%c0_8, %c0_9] : memref<1x10xf32, #tpu.memory_space<vmem>>, vector<1x10xf32>
    %10 = vector.broadcast %9 : vector<1x10xf32> to vector<2x10xf32>
    %11 = arith.addf %8, %10 : vector<2x10xf32>
    %c0_10 = arith.constant 0 : index
    %c0_11 = arith.constant 0 : index
    %12 = vector.load %arg5[%c0_10, %c0_11] : memref<2x10xf32, #tpu.memory_space<vmem>>, vector<2x10xf32>
    tpu.vector_store %arg5[%c0_10, %c0_11], %11 {strides = array<i32>} : memref<2x10xf32, #tpu.memory_space<vmem>>, vector<2x10xf32>,
    return
  }
}

</mosaic_0001>

<bundles_post_ra>
// kernel: squrntial_forward.4
= control target key start
LH: loop header
LB: loop body
LE: loop exit
PB: predicated region body
PF: predicated region fallthrough
CT: control target
= control target key end

     0   :  { %vm500_vm0 = vcmask 1044480   ;;  %vm501_vm1 = vcmask 1045504   ;;  %v1410_v2 = vmov 65535   ;;  %vm493_vm2 = vcmask 613376   ;;  %s2205_s0 = inlined_call_operand.vmem [shape: bf16[75,2048], index: 0, kind: input, shape index: {}]   ;;  %s2206_s1 = inlined_call_operand.vmem [shape: bf16[32,75], index: 1, kind: input, shape index: {}]   ;;  %s2207_s2 = inlined_call_operand.vmem [shape: f32[32,1], index: 2, kind: input, shape index: {}]   ;;  %s2208_s3 = inlined_call_operand.vmem [shape: f32[32,512], index: 3, kind: output, shape index: {}]  }
   0x1   :  { %v1230_v0 = vld [vmem:[%s2205_s0 + $0x200] sm:$0xf]  ;;  %v502_v3 = vsel %vm500_vm0, 4294967295, %v1410_v2  ;;  %v1390_v6 = vld [vmem:[%s2205_s0 + $0x204] sm:$0xf] }
   0x2   :  { %v1398_v1 = vld [vmem:[%s2205_s0 + $0x23c] sm:$0x30]  ;;  %v1438_v5 = vsel %vm501_vm1, %v502_v3, 0  ;;  %v1232_v7 = vld [vmem:[%s2205_s0 + $0x240] sm:$0x30] }
   0x3   :  { %v1231_v4 = vor.u32 %v1398_v1, %v1230_v0  ;;  %v1235_v8 = vor.u32 %v1390_v6, %v1232_v7  ;;  %v1238_v9 = vld [vmem:[%s2205_s0 + $0x208] sm:$0xf]  ;;  %v1391_v11 = vld [vmem:[%s2205_s0 + $0x20c] sm:$0xf]  ;;  %v1166_v15 = vld [vmem:[%s2205_s0 + $0x180] sm:$0xf] }
   0x4   :  { %v1399_v10 = vld [vmem:[%s2205_s0 + $0x244] sm:$0x30]  ;;  %v1240_v14 = vld [vmem:[%s2205_s0 + $0x248] sm:$0x30]  ;;  %v1382_v16 = vld [vmem:[%s2205_s0 + $0x1bc] sm:$0xf0] }
   0x5   :  { %v505_v12 = vand.u32 %v1231_v4, %v1438_v5  ;;  %v1239_v13 = vor.u32 %v1399_v10, %v1238_v9  ;;  %v508_v17 = vand.u32 %v1235_v8, %v1438_v5  ;;  %v1243_v18 = vor.u32 %v1391_v11, %v1240_v14  ;;  %v1374_v19 = vld [vmem:[%s2205_s0 + $0x184] sm:$0xf]  ;;  %v1174_v21 = vld [vmem:[%s2205_s0 + $0x188] sm:$0xf]  ;;  %v1375_v25 = vld [vmem:[%s2205_s0 + $0x18c] sm:$0xf] }
   0x6   :  { %v1168_v20 = vld [vmem:[%s2205_s0 + $0x1c0] sm:$0xf0]  ;;  %v1167_v23 = vor.u32 %v1382_v16, %v1166_v15  ;;  %v1383_v24 = vld [vmem:[%s2205_s0 + $0x1c4] sm:$0xf0]  ;;  %v1176_v26 = vld [vmem:[%s2205_s0 + $0x1c8] sm:$0xf0] }
   0x7   :  { %555 = vmatpush.bf16.msra.mxu0 %v505_v12  ;;  %v511_v22 = vand.u32 %v1239_v13, %v1438_v5  ;;  %574 = vmatpush.bf16.msra.mxu1 %v508_v17  ;;  %v514_v27 = vand.u32 %v1243_v18, %v1438_v5  ;;  %v1171_v28 = vor.u32 %v1374_v19, %v1168_v20  ;;  %v1102_v29 = vld [vmem:[%s2205_s0 + $0x100] sm:$0xf]  ;;  %v1358_v32 = vld [vmem:[%s2205_s0 + $0x104] sm:$0xf]  ;;  %v1110_v35 = vld [vmem:[%s2205_s0 + $0x108] sm:$0xf] }
   0x8   :  { %v1366_v30 = vld [vmem:[%s2205_s0 + $0x13c] sm:$0xf0]  ;;  %v1175_v31 = vor.u32 %v1383_v24, %v1174_v21  ;;  %v1104_v33 = vld [vmem:[%s2205_s0 + $0x140] sm:$0xf0]  ;;  %v1179_v34 = vor.u32 %v1375_v25, %v1176_v26  ;;  %v1367_v36 = vld [vmem:[%s2205_s0 + $0x144] sm:$0xf0] }
   0x9   :  { %593 = vmatpush.bf16.msra.mxu2 %v511_v22  ;;  %612 = vmatpush.bf16.msra.mxu3 %v514_v27  ;;  %v1103_v37 = vor.u32 %v1366_v30, %v1102_v29  ;;  %v1359_v38 = vld [vmem:[%s2205_s0 + $0x10c] sm:$0xf]  ;;  %v1107_v40 = vor.u32 %v1358_v32, %v1104_v33  ;;  %v1038_v41 = vld [vmem:[%s2205_s0 + $0x80] sm:$0xf]  ;;  %v1342_v43 = vld [vmem:[%s2205_s0 + $0x84] sm:$0xf]  ;;  %v1111_v44 = vor.u32 %v1367_v36, %v1110_v35 }
   0xa   :  { %v1112_v39 = vld [vmem:[%s2205_s0 + $0x148] sm:$0xf0]  ;;  %v1350_v42 = vld [vmem:[%s2205_s0 + $0xbc] sm:$0xf0]  ;;  %v1040_v45 = vld [vmem:[%s2205_s0 + $0xc0] sm:$0xf0] }
   0xb   :  { %556 = vmatpush.bf16.msra.mxu0 %v1167_v23  ;;  %575 = vmatpush.bf16.msra.mxu1 %v1171_v28  ;;  %v1046_v46 = vld [vmem:[%s2205_s0 + $0x88] sm:$0xf]  ;;  %v1115_v48 = vor.u32 %v1359_v38, %v1112_v39  ;;  %v1343_v49 = vld [vmem:[%s2205_s0 + $0x8c] sm:$0xf]  ;;  %v974_v51 = vld [vmem:[%s2205_s0] sm:$0xf]  ;;  %v1039_v52 = vor.u32 %v1350_v42, %v1038_v41  ;;  %v1043_v56 = vor.u32 %v1342_v43, %v1040_v45 }
   0xc   :  { %v1351_v47 = vld [vmem:[%s2205_s0 + $0xc4] sm:$0xf0]  ;;  %v1048_v50 = vld [vmem:[%s2205_s0 + $0xc8] sm:$0xf0]  ;;  %v1334_v53 = vld [vmem:[%s2205_s0 + $0x3c] sm:$0xf0] }
   0xd   :  { %594 = vmatpush.bf16.msra.mxu2 %v1175_v31  ;;  %613 = vmatpush.bf16.msra.mxu3 %v1179_v34  ;;  %v1326_v54 = vld [vmem:[%s2205_s0 + $0x4] sm:$0xf]  ;;  %v982_v57 = vld [vmem:[%s2205_s0 + $0x8] sm:$0xf]  ;;  %v1254_v58 = vld [vmem:[%s2205_s0 + $0x218] sm:$0xf]  ;;  %v1047_v61 = vor.u32 %v1351_v47, %v1046_v46  ;;  %v1051_v1 = vor.u32 %v1343_v49, %v1048_v50  ;;  %v975_v7 = vor.u32 %v1334_v53, %v974_v51 }
   0xe   :  { %v976_v55 = vld [vmem:[%s2205_s0 + $0x40] sm:$0xf0]  ;;  %v1401_v59 = vld [vmem:[%s2205_s0 + $0x254] sm:$0x30]  ;;  %v1393_v60 = vld [vmem:[%s2205_s0 + $0x21c] sm:$0xf] }
   0xf   :  { %557 = vmatpush.bf16.msra.mxu0 %v1103_v37  ;;  %576 = vmatpush.bf16.msra.mxu1 %v1107_v40  ;;  %v1256_v62 = vld [vmem:[%s2205_s0 + $0x258] sm:$0x30]  ;;  %v1246_v63 = vld [vmem:[%s2205_s0 + $0x210] sm:$0xf]  ;;  %v1335_v2 = vld [vmem:[%s2205_s0 + $0x44] sm:$0xf0]  ;;  %v1255_v10 = vor.u32 %v1401_v59, %v1254_v58  ;;  %v979_v12 = vor.u32 %v1326_v54, %v976_v55 }
  0x10   :  { %v1400_v0 = vld [vmem:[%s2205_s0 + $0x24c] sm:$0x30]  ;;  %v1392_v4 = vld [vmem:[%s2205_s0 + $0x214] sm:$0xf]  ;;  %v1327_v8 = vld [vmem:[%s2205_s0 + $0xc] sm:$0xf]  ;;  %v1259_v13 = vor.u32 %v1393_v60, %v1256_v62  ;;  %v983_v15 = vor.u32 %v1335_v2, %v982_v57 }
  0x11   :  { %595 = vmatpush.bf16.msra.mxu2 %v1111_v44  ;;  %614 = vmatpush.bf16.msra.mxu3 %v1115_v48  ;;  %v1247_v3 = vor.u32 %v1400_v0, %v1246_v63  ;;  %v1248_v6 = vld [vmem:[%s2205_s0 + $0x250] sm:$0x30]  ;;  %v984_v9 = vld [vmem:[%s2205_s0 + $0x48] sm:$0xf0]  ;;  %v1587_v18 = vld [vmem:[%s2206_s1] sm:$0xff]  ;;  %v523_v21 = vand.u32 %v1255_v10, %v1438_v5 }
  0x12   :  { %v1251_v11 = vor.u32 %v1392_v4, %v1248_v6  ;;  %v987_v17 = vor.u32 %v1327_v8, %v984_v9  ;;  %v1182_v19 = vld [vmem:[%s2205_s0 + $0x190] sm:$0xf]  ;;  %v1376_v22 = vld [vmem:[%s2205_s0 + $0x194] sm:$0xf]  ;;  %v526_v24 = vand.u32 %v1259_v13, %v1438_v5  ;;  %v1190_v25 = vld [vmem:[%s2205_s0 + $0x198] sm:$0xf] }
  0x13   :  { %558 = vmatpush.bf16.msra.mxu0 %v1039_v52  ;;  %577 = vmatpush.bf16.msra.mxu1 %v1043_v56  ;;  %v517_v14 = vand.u32 %v1247_v3, %v1438_v5  ;;  %v1384_v20 = vld [vmem:[%s2205_s0 + $0x1cc] sm:$0xf0]  ;;  %v1184_v23 = vld [vmem:[%s2205_s0 + $0x1d0] sm:$0xf0]  ;;  %v1385_v26 = vld [vmem:[%s2205_s0 + $0x1d4] sm:$0xf0] }
  0x14   :  { %v520_v16 = vand.u32 %v1251_v11, %v1438_v5  ;;  %v1377_v27 = vld [vmem:[%s2205_s0 + $0x19c] sm:$0xf]  ;;  %v1183_v29 = vor.u32 %v1384_v20, %v1182_v19  ;;  %v1187_v30 = vor.u32 %v1376_v22, %v1184_v23  ;;  %v1118_v31 = vld [vmem:[%s2205_s0 + $0x110] sm:$0xf]  ;;  %v1191_v33 = vor.u32 %v1385_v26, %v1190_v25  ;;  %v1360_v34 = vld [vmem:[%s2205_s0 + $0x114] sm:$0xf] }
  0x15   :  { %596 = vmatpush.bf16.msra.mxu2 %v1047_v61  ;;  %615 = vmatpush.bf16.msra.mxu3 %v1051_v1  ;;  %v1192_v28 = vld [vmem:[%s2205_s0 + $0x1d8] sm:$0xf0]  ;;  %v1368_v32 = vld [vmem:[%s2205_s0 + $0x14c] sm:$0xf0]  ;;  %v1120_v35 = vld [vmem:[%s2205_s0 + $0x150] sm:$0xf0] }
  0x16   :  { %v1195_v36 = vor.u32 %v1377_v27, %v1192_v28  ;;  %v1126_v37 = vld [vmem:[%s2205_s0 + $0x118] sm:$0xf]  ;;  %v1361_v39 = vld [vmem:[%s2205_s0 + $0x11c] sm:$0xf]  ;;  %v1119_v41 = vor.u32 %v1368_v32, %v1118_v31  ;;  %v1123_v42 = vor.u32 %v1360_v34, %v1120_v35  ;;  %v1054_v44 = vld [vmem:[%s2205_s0 + $0x90] sm:$0xf] }
  0x17   :  { %559 = vmatpush.bf16.msra.mxu0 %v975_v7  ;;  %578 = vmatpush.bf16.msra.mxu1 %v979_v12  ;;  %v1369_v38 = vld [vmem:[%s2205_s0 + $0x154] sm:$0xf0]  ;;  %v1128_v40 = vld [vmem:[%s2205_s0 + $0x158] sm:$0xf0]  ;;  %v1352_v45 = vld [vmem:[%s2205_s0 + $0xcc] sm:$0xf0] }
  0x18   :  { %v1062_v43 = vld [vmem:[%s2205_s0 + $0x98] sm:$0xf]  ;;  %v1127_v46 = vor.u32 %v1369_v38, %v1126_v37  ;;  %v1344_v48 = vld [vmem:[%s2205_s0 + $0x94] sm:$0xf]  ;;  %v1131_v50 = vor.u32 %v1361_v39, %v1128_v40  ;;  %v1345_v51 = vld [vmem:[%s2205_s0 + $0x9c] sm:$0xf]  ;;  %v1055_v54 = vor.u32 %v1352_v45, %v1054_v44 }
  0x19   :  { %597 = vmatpush.bf16.msra.mxu2 %v983_v15  ;;  %616 = vmatpush.bf16.msra.mxu3 %v987_v17  ;;  %v1353_v47 = vld [vmem:[%s2205_s0 + $0xd4] sm:$0xf0]  ;;  %v1056_v49 = vld [vmem:[%s2205_s0 + $0xd0] sm:$0xf0]  ;;  %v1064_v52 = vld [vmem:[%s2205_s0 + $0xd8] sm:$0xf0] }
  0x1a   :  { %1292 = vmatmul.msk.bf16.vlgmr.msra.gmra.mxu0 %vm493_vm2, %v1587_v18  ;;  %1294 = vmatmul.msk.bf16.vlgmr.msra.gmra.mxu1 %vm493_vm2, %v1587_v18  ;;  %v990_v53 = vld [vmem:[%s2205_s0 + $0x10] sm:$0xf]  ;;  %v1328_v56 = vld [vmem:[%s2205_s0 + $0x14] sm:$0xf]  ;;  %v1059_v58 = vor.u32 %v1344_v48, %v1056_v49  ;;  %v998_v59 = vld [vmem:[%s2205_s0 + $0x18] sm:$0xf]  ;;  %v1063_v63 = vor.u32 %v1353_v47, %v1062_v43  ;;  %v1067_v3 = vor.u32 %v1345_v51, %v1064_v52 }
  0x1b   :  { %631 = vmatpush.bf16.msrb.mxu0 %v517_v14  ;;  %650 = vmatpush.bf16.msrb.mxu1 %v520_v16  ;;  %v1336_v55 = vld [vmem:[%s2205_s0 + $0x4c] sm:$0xf0]  ;;  %v992_v57 = vld [vmem:[%s2205_s0 + $0x50] sm:$0xf0]  ;;  %v1270_v60 = vld [vmem:[%s2205_s0 + $0x228] sm:$0xf] }
  0x1c   :  { %1296 = vmatmul.msk.bf16.vlgmr.msra.gmra.mxu2 %vm493_vm2, %v1587_v18  ;;  %1298 = vmatmul.msk.bf16.vlgmr.msra.gmra.mxu3 %vm493_vm2, %v1587_v18  ;;  %v1403_v61 = vld [vmem:[%s2205_s0 + $0x264] sm:$0x30]  ;;  %v1395_v62 = vld [vmem:[%s2205_s0 + $0x22c] sm:$0xf]  ;;  %v1262_v1 = vld [vmem:[%s2205_s0 + $0x220] sm:$0xf]  ;;  %v991_v10 = vor.u32 %v1336_v55, %v990_v53  ;;  %v995_v13 = vor.u32 %v1328_v56, %v992_v57 }
  0x1d   :  { %669 = vmatpush.bf16.msrb.mxu2 %v523_v21  ;;  %688 = vmatpush.bf16.msrb.mxu3 %v526_v24  ;;  %v1272_v0 = vld [vmem:[%s2205_s0 + $0x268] sm:$0x30]  ;;  %v1402_v2 = vld [vmem:[%s2205_s0 + $0x25c] sm:$0x30]  ;;  %v1337_v4 = vld [vmem:[%s2205_s0 + $0x54] sm:$0xf0]  ;;  %v1271_v11 = vor.u32 %v1403_v61, %v1270_v60 }
  0x1e   :  { %v1394_v6 = vld [vmem:[%s2205_s0 + $0x224] sm:$0xf]  ;;  %v1329_v8 = vld [vmem:[%s2205_s0 + $0x1c] sm:$0xf]  ;;  %v1722_v12 = vld [vmem:[%s2206_s1 + $0x8] sm:$0xff]  ;;  %v1275_v14 = vor.u32 %v1395_v62, %v1272_v0  ;;  %v1263_v15 = vor.u32 %v1402_v2, %v1262_v1  ;;  %v999_v16 = vor.u32 %v1337_v4, %v998_v59 }
  0x1f   :  { %632 = vmatpush.bf16.msrb.mxu0 %v1183_v29  ;;  %651 = vmatpush.bf16.msrb.mxu1 %v1187_v30  ;;  %v1264_v7 = vld [vmem:[%s2205_s0 + $0x260] sm:$0x30]  ;;  %v1000_v9 = vld [vmem:[%s2205_s0 + $0x58] sm:$0xf0]  ;;  %v535_v20 = vand.u32 %v1271_v11, %v1438_v5  ;;  %v1206_v23 = vld [vmem:[%s2205_s0 + $0x1a8] sm:$0xf] }
  0x20   :  { %v1267_v17 = vor.u32 %v1394_v6, %v1264_v7  ;;  %v1003_v19 = vor.u32 %v1329_v8, %v1000_v9  ;;  %v538_v21 = vand.u32 %v1275_v14, %v1438_v5  ;;  %v529_v22 = vand.u32 %v1263_v15, %v1438_v5  ;;  %v1387_v24 = vld [vmem:[%s2205_s0 + $0x1e4] sm:$0xf0]  ;;  %v1379_v25 = vld [vmem:[%s2205_s0 + $0x1ac] sm:$0xf]  ;;  %v1198_v28 = vld [vmem:[%s2205_s0 + $0x1a0] sm:$0xf] }
  0x21   :  { %670 = vmatpush.bf16.msrb.mxu2 %v1191_v33  ;;  %689 = vmatpush.bf16.msrb.mxu3 %v1195_v36  ;;  %v1208_v27 = vld [vmem:[%s2205_s0 + $0x1e8] sm:$0xf0]  ;;  %v1386_v29 = vld [vmem:[%s2205_s0 + $0x1dc] sm:$0xf0]  ;;  %v1378_v30 = vld [vmem:[%s2205_s0 + $0x1a4] sm:$0xf]  ;;  %v1207_v32 = vor.u32 %v1387_v24, %v1206_v23 }
  0x22   :  { %v532_v26 = vand.u32 %v1267_v17, %v1438_v5  ;;  %v1200_v31 = vld [vmem:[%s2205_s0 + $0x1e0] sm:$0xf0]  ;;  %v1211_v33 = vor.u32 %v1379_v25, %v1208_v27  ;;  %v1199_v34 = vor.u32 %v1386_v29, %v1198_v28  ;;  %v1142_v35 = vld [vmem:[%s2205_s0 + $0x128] sm:$0xf]  ;;  %v1363_v37 = vld [vmem:[%s2205_s0 + $0x12c] sm:$0xf] }
  0x23   :  { %633 = vmatpush.bf16.msrb.mxu0 %v1119_v41  ;;  %652 = vmatpush.bf16.msrb.mxu1 %v1123_v42  ;;  %v1371_v36 = vld [vmem:[%s2205_s0 + $0x164] sm:$0xf0]  ;;  %v1203_v38 = vor.u32 %v1378_v30, %v1200_v31  ;;  %v1144_v39 = vld [vmem:[%s2205_s0 + $0x168] sm:$0xf0]  ;;  %v1134_v40 = vld [vmem:[%s2205_s0 + $0x120] sm:$0xf] }
  0x24   :  { %v1370_v41 = vld [vmem:[%s2205_s0 + $0x15c] sm:$0xf0]  ;;  %v1362_v42 = vld [vmem:[%s2205_s0 + $0x124] sm:$0xf]  ;;  %v1143_v44 = vor.u32 %v1371_v36, %v1142_v35  ;;  %v1147_v45 = vor.u32 %v1363_v37, %v1144_v39  ;;  %v1078_v47 = vld [vmem:[%s2205_s0 + $0xa8] sm:$0xf] }
  0x25   :  { %671 = vmatpush.bf16.msrb.mxu2 %v1127_v46  ;;  %690 = vmatpush.bf16.msrb.mxu3 %v1131_v50  ;;  %v1136_v43 = vld [vmem:[%s2205_s0 + $0x160] sm:$0xf0]  ;;  %v1135_v46 = vor.u32 %v1370_v41, %v1134_v40  ;;  %v1355_v48 = vld [vmem:[%s2205_s0 + $0xe4] sm:$0xf0]  ;;  %v1347_v50 = vld [vmem:[%s2205_s0 + $0xac] sm:$0xf] }
  0x26   :  { %v1139_v49 = vor.u32 %v1362_v42, %v1136_v43  ;;  %v1080_v51 = vld [vmem:[%s2205_s0 + $0xe8] sm:$0xf0]  ;;  %v1070_v52 = vld [vmem:[%s2205_s0 + $0xa0] sm:$0xf]  ;;  %v1346_v55 = vld [vmem:[%s2205_s0 + $0xa4] sm:$0xf] }
  0x27   :  { %634 = vmatpush.bf16.msrb.mxu0 %v1055_v54  ;;  %653 = vmatpush.bf16.msrb.mxu1 %v1059_v58  ;;  %v1354_v53 = vld [vmem:[%s2205_s0 + $0xdc] sm:$0xf0]  ;;  %v1079_v54 = vor.u32 %v1355_v48, %v1078_v47  ;;  %v1072_v56 = vld [vmem:[%s2205_s0 + $0xe0] sm:$0xf0]  ;;  %v1083_v57 = vor.u32 %v1347_v50, %v1080_v51  ;;  %v1014_v58 = vld [vmem:[%s2205_s0 + $0x28] sm:$0xf] }
  0x28   :  { %v1339_v59 = vld [vmem:[%s2205_s0 + $0x64] sm:$0xf0]  ;;  %v1071_v60 = vor.u32 %v1354_v53, %v1070_v52  ;;  %v1331_v61 = vld [vmem:[%s2205_s0 + $0x2c] sm:$0xf]  ;;  %v1006_v0 = vld [vmem:[%s2205_s0 + $0x20] sm:$0xf] }
  0x29   :  { %672 = vmatpush.bf16.msrb.mxu2 %v1063_v63  ;;  %691 = vmatpush.bf16.msrb.mxu3 %v1067_v3  ;;  %v1016_v62 = vld [vmem:[%s2205_s0 + $0x68] sm:$0xf0]  ;;  %v1075_v63 = vor.u32 %v1346_v55, %v1072_v56  ;;  %v1338_v1 = vld [vmem:[%s2205_s0 + $0x5c] sm:$0xf0]  ;;  %v1015_v2 = vor.u32 %v1339_v59, %v1014_v58  ;;  %v1330_v3 = vld [vmem:[%s2205_s0 + $0x24] sm:$0xf] }
  0x2a   :  { %1293 = vmatmul.msk.bf16.gmra.mxu0 %vm493_vm2, %v1722_v12  ;;  %1295 = vmatmul.msk.bf16.gmra.mxu1 %vm493_vm2, %v1722_v12  ;;  %v1008_v4 = vld [vmem:[%s2205_s0 + $0x60] sm:$0xf0]  ;;  %v1019_v6 = vor.u32 %v1331_v61, %v1016_v62  ;;  %v1007_v7 = vor.u32 %v1338_v1, %v1006_v0  ;;  %v1286_v9 = vld [vmem:[%s2205_s0 + $0x238] sm:$0xf]  ;;  %v1397_v11 = vld [vmem:[%s2205_s0 + $0x23c] sm:$0xf] }
  0x2b   :  { %635 = vmatpush.bf16.msrb.mxu0 %v991_v10  ;;  %654 = vmatpush.bf16.msrb.mxu1 %v995_v13  ;;  %v1011_v8 = vor.u32 %v1330_v3, %v1008_v4  ;;  %v1405_v10 = vld [vmem:[%s2205_s0 + $0x274] sm:$0x30]  ;;  %v1288_v14 = vld [vmem:[%s2205_s0 + $0x278] sm:$0x30]  ;;  %v1278_v15 = vld [vmem:[%s2205_s0 + $0x230] sm:$0xf] }
  0x2c   :  { %1297 = vmatmul.msk.bf16.gmra.mxu2 %vm493_vm2, %v1722_v12  ;;  %1299 = vmatmul.msk.bf16.gmra.mxu3 %vm493_vm2, %v1722_v12  ;;  %v1287_v13 = vor.u32 %v1405_v10, %v1286_v9  ;;  %v1291_v17 = vor.u32 %v1397_v11, %v1288_v14  ;;  %v1389_v25 = vld [vmem:[%s2205_s0 + $0x1f4] sm:$0xf0]  ;;  %v1224_v27 = vld [vmem:[%s2205_s0 + $0x1f8] sm:$0xf0]  ;;  %v1214_v30 = vld [vmem:[%s2205_s0 + $0x1b0] sm:$0xf] }
  0x2d   :  { %673 = vmatpush.bf16.msrb.mxu2 %v999_v16  ;;  %692 = vmatpush.bf16.msrb.mxu3 %v1003_v19  ;;  %v1404_v16 = vld [vmem:[%s2205_s0 + $0x26c] sm:$0x30]  ;;  %v1216_v35 = vld [vmem:[%s2205_s0 + $0x1f0] sm:$0xf0]  ;;  %v1373_v39 = vld [vmem:[%s2205_s0 + $0x174] sm:$0xf0] }
  0x2e   :  { %v1279_v19 = vor.u32 %v1404_v16, %v1278_v15  ;;  %v547_v23 = vand.u32 %v1287_v13, %v1438_v5  ;;  %v550_v28 = vand.u32 %v1291_v17, %v1438_v5  ;;  %v1388_v31 = vld [vmem:[%s2205_s0 + $0x1ec] sm:$0xf0]  ;;  %v1160_v41 = vld [vmem:[%s2205_s0 + $0x178] sm:$0xf0]  ;;  %v1152_v48 = vld [vmem:[%s2205_s0 + $0x170] sm:$0xf0] }
  0x2f   :  { %707 = vmatpush.bf16.msra.mxu0 %v529_v22  ;;  %726 = vmatpush.bf16.msra.mxu1 %v532_v26  ;;  %v1222_v22 = vld [vmem:[%s2205_s0 + $0x1b8] sm:$0xf]  ;;  %v1381_v26 = vld [vmem:[%s2205_s0 + $0x1bc] sm:$0xf]  ;;  %v1215_v37 = vor.u32 %v1388_v31, %v1214_v30  ;;  %v1086_v55 = vld [vmem:[%s2205_s0 + $0xb0] sm:$0xf] }
  0x30   :  { %v541_v29 = vand.u32 %v1279_v19, %v1438_v5  ;;  %v1227_v36 = vor.u32 %v1381_v26, %v1224_v27  ;;  %v1357_v50 = vld [vmem:[%s2205_s0 + $0xf4] sm:$0xf0]  ;;  %v1349_v53 = vld [vmem:[%s2205_s0 + $0xbc] sm:$0xf]  ;;  %v1348_v58 = vld [vmem:[%s2205_s0 + $0xb4] sm:$0xf] }
  0x31   :  { %745 = vmatpush.bf16.msra.mxu2 %v535_v20  ;;  %764 = vmatpush.bf16.msra.mxu3 %v538_v21  ;;  %v1396_v20 = vld [vmem:[%s2205_s0 + $0x234] sm:$0xf]  ;;  %v1030_v62 = vld [vmem:[%s2205_s0 + $0x38] sm:$0xf]  ;;  %v1333_v0 = vld [vmem:[%s2205_s0 + $0x3c] sm:$0xf] }
  0x32   :  { %v1280_v21 = vld [vmem:[%s2205_s0 + $0x270] sm:$0x30]  ;;  %v1022_v3 = vld [vmem:[%s2205_s0 + $0x30] sm:$0xf]  ;;  %v904_v11 = vld [vmem:[%s2207_s2] sm:$0xff]  ;;  %v1411_v13 = vmov 0  }
  0x33   :  { %708 = vmatpush.bf16.msra.mxu0 %v1199_v34  ;;  %727 = vmatpush.bf16.msra.mxu1 %v1203_v38  ;;  %v1283_v24 = vor.u32 %v1396_v20, %v1280_v21  ;;  %v1223_v34 = vor.u32 %v1389_v25, %v1222_v22  ;;  %v1158_v38 = vld [vmem:[%s2205_s0 + $0x138] sm:$0xf]  ;;  %v1088_v59 = vld [vmem:[%s2205_s0 + $0xf0] sm:$0xf0]  ;;  %v1340_v4 = vld [vmem:[%s2205_s0 + $0x6c] sm:$0xf0] }
  0x34   :  { %v1159_v42 = vor.u32 %v1373_v39, %v1158_v38  ;;  %v1091_v61 = vor.u32 %v1348_v58, %v1088_v59  ;;  %v1023_v9 = vor.u32 %v1340_v4, %v1022_v3  ;;  %1408 = vset.pattern.permute.xlu0 %v1411_v13  ;;  %1409 = vset.pattern.permute.xlu1 %v1411_v13  ;;  %v905_v14 = vld [vmem:[%s2207_s2 + $0x8] sm:$0xff]  ;;  %v906_v15 = vld [vmem:[%s2207_s2 + $0x10] sm:$0xff]  ;;  %v907_v16 = vld [vmem:[%s2207_s2 + $0x18] sm:$0xff] }
  0x35   :  { %746 = vmatpush.bf16.msra.mxu2 %v1207_v32  ;;  %765 = vmatpush.bf16.msra.mxu3 %v1211_v33  ;;  %v1380_v32 = vld [vmem:[%s2205_s0 + $0x1b4] sm:$0xf]  ;;  %v544_v33 = vand.u32 %v1283_v24, %v1438_v5  ;;  %v1365_v5 = vld [vmem:[%s2205_s0 + $0x13c] sm:$0xf] }
  0x36   :  { %v1219_v40 = vor.u32 %v1380_v32, %v1216_v35  ;;  %v1163_v43 = vor.u32 %v1365_v5, %v1160_v41  ;;  %910 = vperm.xlu0 %1408, %v904_v11   ;;  %920 = vperm.xlu1 %1409, %v906_v15  }
  0x37   :  { %709 = vmatpush.bf16.msra.mxu0 %v1135_v46  ;;  %728 = vmatpush.bf16.msra.mxu1 %v1139_v49  ;;  %v1364_v46 = vld [vmem:[%s2205_s0 + $0x134] sm:$0xf]  ;;  %v1094_v49 = vld [vmem:[%s2205_s0 + $0xb8] sm:$0xf] }
  0x38   :  { %v1155_v51 = vor.u32 %v1364_v46, %v1152_v48  ;;  %v1095_v52 = vor.u32 %v1357_v50, %v1094_v49 }
  0x39   :  { %747 = vmatpush.bf16.msra.mxu2 %v1143_v44  ;;  %766 = vmatpush.bf16.msra.mxu3 %v1147_v45  ;;  %v1150_v44 = vld [vmem:[%s2205_s0 + $0x130] sm:$0xf] }
  0x3a   :  { %1300 = vmatmul.msk.bf16.vlgmr.msrb.gmra.mxu0 %vm493_vm2, %v1587_v18  ;;  %1302 = vmatmul.msk.bf16.vlgmr.msrb.gmra.mxu1 %vm493_vm2, %v1587_v18  ;;  %v1372_v45 = vld [vmem:[%s2205_s0 + $0x16c] sm:$0xf0] }
  0x3b   :  { %710 = vmatpush.bf16.msra.mxu0 %v1071_v60  ;;  %729 = vmatpush.bf16.msra.mxu1 %v1075_v63  ;;  %v1151_v47 = vor.u32 %v1372_v45, %v1150_v44  ;;  %v1341_v63 = vld [vmem:[%s2205_s0 + $0x74] sm:$0xf0] }
  0x3c   :  { %1304 = vmatmul.msk.bf16.vlgmr.msrb.gmra.mxu2 %vm493_vm2, %v1587_v18  ;;  %1306 = vmatmul.msk.bf16.vlgmr.msrb.gmra.mxu3 %vm493_vm2, %v1587_v18  ;;  %v1031_v1 = vor.u32 %v1341_v63, %v1030_v62 }
  0x3d   :  { %748 = vmatpush.bf16.msra.mxu2 %v1079_v54  ;;  %767 = vmatpush.bf16.msra.mxu3 %v1083_v57  ;;  %v1096_v54 = vld [vmem:[%s2205_s0 + $0xf8] sm:$0xf0]  ;;  %v1356_v57 = vld [vmem:[%s2205_s0 + $0xec] sm:$0xf0] }
  0x3e   :  { %v1099_v56 = vor.u32 %v1349_v53, %v1096_v54  ;;  %v1087_v60 = vor.u32 %v1356_v57, %v1086_v55  ;;  %915 = vperm.xlu0 %1408, %v905_v14   ;;  %925 = vperm.xlu1 %1409, %v907_v16  }
  0x3f   :  { %711 = vmatpush.bf16.msra.mxu0 %v1007_v7  ;;  %730 = vmatpush.bf16.msra.mxu1 %v1011_v8  ;;  %v1332_v7 = vld [vmem:[%s2205_s0 + $0x34] sm:$0xf] }
  0x40   :  { %v1024_v8 = vld [vmem:[%s2205_s0 + $0x70] sm:$0xf0] }
  0x41   :  { %749 = vmatpush.bf16.msra.mxu2 %v1015_v2  ;;  %768 = vmatpush.bf16.msra.mxu3 %v1019_v6  ;;  %v1032_v2 = vld [vmem:[%s2205_s0 + $0x78] sm:$0xf0]  ;;  %v1027_v10 = vor.u32 %v1332_v7, %v1024_v8 }
  0x42   :  { %v1035_v6 = vor.u32 %v1333_v0, %v1032_v2 }
  0x43   :  { %783 = vmatpush.bf16.msrb.mxu0 %v541_v29  ;;  %802 = vmatpush.bf16.msrb.mxu1 %v544_v33 }
  0x45   :  { %821 = vmatpush.bf16.msrb.mxu2 %v547_v23  ;;  %840 = vmatpush.bf16.msrb.mxu3 %v550_v28 }
  0x47   :  { %784 = vmatpush.bf16.msrb.mxu0 %v1215_v37  ;;  %803 = vmatpush.bf16.msrb.mxu1 %v1219_v40 }
  0x49   :  { %822 = vmatpush.bf16.msrb.mxu2 %v1223_v34  ;;  %841 = vmatpush.bf16.msrb.mxu3 %v1227_v36 }
  0x4a   :  { %1301 = vmatmul.msk.bf16.gmra.mxu0 %vm493_vm2, %v1722_v12  ;;  %1303 = vmatmul.msk.bf16.gmra.mxu1 %vm493_vm2, %v1722_v12 }
  0x4b   :  { %785 = vmatpush.bf16.msrb.mxu0 %v1151_v47  ;;  %804 = vmatpush.bf16.msrb.mxu1 %v1155_v51 }
  0x4c   :  { %1305 = vmatmul.msk.bf16.gmra.mxu2 %vm493_vm2, %v1722_v12  ;;  %1307 = vmatmul.msk.bf16.gmra.mxu3 %vm493_vm2, %v1722_v12 }
  0x4d   :  { %823 = vmatpush.bf16.msrb.mxu2 %v1159_v42  ;;  %842 = vmatpush.bf16.msrb.mxu3 %v1163_v43 }
  0x4f   :  { %786 = vmatpush.bf16.msrb.mxu0 %v1087_v60  ;;  %805 = vmatpush.bf16.msrb.mxu1 %v1091_v61 }
  0x51   :  { %824 = vmatpush.bf16.msrb.mxu2 %v1095_v52  ;;  %843 = vmatpush.bf16.msrb.mxu3 %v1099_v56 }
  0x53   :  { %787 = vmatpush.bf16.msrb.mxu0 %v1023_v9  ;;  %806 = vmatpush.bf16.msrb.mxu1 %v1027_v10 }
  0x55   :  { %825 = vmatpush.bf16.msrb.mxu2 %v1031_v1  ;;  %844 = vmatpush.bf16.msrb.mxu3 %v1035_v6 }
  0x5a   :  { %1308 = vmatmul.msk.bf16.vlgmr.msra.gmra.mxu0 %vm493_vm2, %v1587_v18  ;;  %1310 = vmatmul.msk.bf16.vlgmr.msra.gmra.mxu1 %vm493_vm2, %v1587_v18 }
  0x5c   :  { %1312 = vmatmul.msk.bf16.vlgmr.msra.gmra.mxu2 %vm493_vm2, %v1587_v18  ;;  %1314 = vmatmul.msk.bf16.vlgmr.msra.gmra.mxu3 %vm493_vm2, %v1587_v18 }
  0x6a   :  { %1309 = vmatmul.msk.bf16.gmra.mxu0 %vm493_vm2, %v1722_v12  ;;  %1311 = vmatmul.msk.bf16.gmra.mxu1 %vm493_vm2, %v1722_v12 }
  0x6c   :  { %1313 = vmatmul.msk.bf16.gmra.mxu2 %vm493_vm2, %v1722_v12  ;;  %1315 = vmatmul.msk.bf16.gmra.mxu3 %vm493_vm2, %v1722_v12 }
  0x7a   :  { %1316 = vmatmul.msk.bf16.vlgmr.msrb.gmra.mxu0 %vm493_vm2, %v1587_v18  ;;  %1318 = vmatmul.msk.bf16.vlgmr.msrb.gmra.mxu1 %vm493_vm2, %v1587_v18 }
  0x7c   :  { %1320 = vmatmul.msk.bf16.vlgmr.msrb.gmra.mxu2 %vm493_vm2, %v1587_v18  ;;  %1322 = vmatmul.msk.bf16.vlgmr.msrb.gmra.mxu3 %vm493_vm2, %v1587_v18 }
  0x8a   :  { %1317 = vmatmul.msk.bf16.gmra.mxu0 %vm493_vm2, %v1722_v12  ;;  %1319 = vmatmul.msk.bf16.gmra.mxu1 %vm493_vm2, %v1722_v12 }
  0x8c   :  { %1321 = vmatmul.msk.bf16.gmra.mxu2 %vm493_vm2, %v1722_v12  ;;  %1323 = vmatmul.msk.bf16.gmra.mxu3 %vm493_vm2, %v1722_v12 }
  0x97   :  { %v2016_v17 = vpop.f32.mrf.mxu0  ;;  %v2018_v18 = vpop.f32.mrf.mxu1 }
  0x9f   :  { %v2020_v19 = vpop.f32.mrf.mxu2  ;;  %v2022_v20 = vpop.f32.mrf.mxu0 }
  0xa0   :  { %v2024_v21 = vpop.f32.mrf.mxu3  ;;  %v2026_v22 = vpop.f32.mrf.mxu1 }
  0xa7   :  { %v2028_v23 = vpop.f32.mrf.mxu2  ;;  %v2030_v24 = vpop.f32.mrf.mxu0 }
  0xa8   :  { %v2032_v25 = vpop.f32.mrf.mxu3  ;;  %v2034_v26 = vpop.f32.mrf.mxu1 }
  0xa9   :  { %v911_v15 = vpop.permute.xlu0 %910 }
  0xaf   :  { %v2036_v12 = vpop.f32.mrf.mxu2  ;;  %v2038_v27 = vpop.f32.mrf.mxu0 }
  0xb0   :  { %v2040_v28 = vpop.f32.mrf.mxu3  ;;  %v2042_v29 = vpop.f32.mrf.mxu1 }
  0xb7   :  { %v2044_v30 = vpop.f32.mrf.mxu2  ;;  %v637_v31 = vpop.f32.mrf.mxu0 }
  0xb8   :  { %v2046_v32 = vpop.f32.mrf.mxu3  ;;  %v856_v33 = vmax.f32 %v2016_v17, %v637_v31  ;;  %v656_v34 = vpop.f32.mrf.mxu1 }
  0xb9   :  { %v857_v35 = vmax.f32 %v2018_v18, %v656_v34 }
  0xbf   :  { %v2050_v36 = vpop.f32.mrf.mxu2  ;;  %v2052_v37 = vpop.f32.mrf.mxu0 }
  0xc0   :  { %v858_v38 = vmax.f32 %v2020_v19, %v2050_v36  ;;  %v2056_v39 = vpop.f32.mrf.mxu3  ;;  %v860_v40 = vmax.f32 %v2022_v20, %v2052_v37  ;;  %v2060_v5 = vpop.f32.mrf.mxu1 }
  0xc1   :  { %v859_v41 = vmax.f32 %v2024_v21, %v2056_v39  ;;  %v861_v42 = vmax.f32 %v2026_v22, %v2060_v5 }
  0xc7   :  { %v2066_v43 = vpop.f32.mrf.mxu2  ;;  %v2068_v44 = vpop.f32.mrf.mxu0 }
  0xc8   :  { %v862_v45 = vmax.f32 %v2028_v23, %v2066_v43  ;;  %v2072_v46 = vpop.f32.mrf.mxu3  ;;  %v864_v47 = vmax.f32 %v2030_v24, %v2068_v44  ;;  %v2076_v48 = vpop.f32.mrf.mxu1 }
  0xc9   :  { %v863_v49 = vmax.f32 %v2032_v25, %v2072_v46  ;;  %v865_v50 = vmax.f32 %v2034_v26, %v2076_v48 }
  0xcf   :  { %v2082_v51 = vpop.f32.mrf.mxu2  ;;  %v2084_v52 = vpop.f32.mrf.mxu0 }
  0xd0   :  { %v866_v53 = vmax.f32 %v2036_v12, %v2082_v51  ;;  %v2088_v54 = vpop.f32.mrf.mxu3  ;;  %v868_v55 = vmax.f32 %v2038_v27, %v2084_v52  ;;  %v2092_v56 = vpop.f32.mrf.mxu1 }
  0xd7   :  { %v2098_v59 = vpop.f32.mrf.mxu2  ;;  %v713_v60 = vpop.f32.mrf.mxu0 }
  0xd8   :  { %v2102_v62 = vpop.f32.mrf.mxu3  ;;  %v732_v63 = vpop.f32.mrf.mxu1  ;;  %v2211_v51 = vmax.f32 %v2044_v30, %v2098_v59 }
  0xdf   :  { %v751_v1 = vpop.f32.mrf.mxu2  ;;  %v715_v2 = vpop.f32.mrf.mxu0 }
  0xe0   :  { %v770_v3 = vpop.f32.mrf.mxu3  ;;  %v734_v4 = vpop.f32.mrf.mxu1 }
  0xe7   :  { %v753_v6 = vpop.f32.mrf.mxu2  ;;  %v718_v7 = vpop.f32.mrf.mxu0 }
  0xe8   :  { %v772_v8 = vpop.f32.mrf.mxu3  ;;  %v737_v9 = vpop.f32.mrf.mxu1 }
  0xef   :  { %v2106_v10 = vpop.f32.mrf.mxu2  ;;  %v2108_v11 = vpop.f32.mrf.mxu0 }
  0xf0   :  { %v2110_v13 = vpop.f32.mrf.mxu3  ;;  %v2112_v14 = vpop.f32.mrf.mxu1 }
  0xf7   :  { %v2114_v16 = vpop.f32.mrf.mxu2  ;;  %v789_v17 = vpop.f32.mrf.mxu0 }
  0xf8   :  { %v2116_v18 = vpop.f32.mrf.mxu3  ;;  %v872_v20 = vmax.f32 %v713_v60, %v789_v17  ;;  %v808_v21 = vpop.f32.mrf.mxu1 }
  0xf9   :  { %v873_v22 = vmax.f32 %v732_v63, %v808_v21 }
  0xfa   :  { %v888_v31 = vmax.f32 %v856_v33, %v872_v20  ;;  %v916_v33 = vpop.permute.xlu0 %915 }
  0xfb   :  { %v889_v34 = vmax.f32 %v857_v35, %v873_v22 }
  0xfc   :  { %v928_v37 = vadd.f32 %v911_v15, %v888_v31 }
  0xfd   :  { %v929_v39 = vadd.f32 %v911_v15, %v889_v34 }
  0xfe   :  { %944 = vst [vmem:[%s2208_s3] sm:$0xff] %v928_v37 }
  0xff   :  { %945 = vst [vmem:[%s2208_s3 + $0x8] sm:$0xff] %v929_v39  ;;  %v827_v5 = vpop.f32.mrf.mxu2  ;;  %v791_v0 = vpop.f32.mrf.mxu0 }
 0x100   :  { %v874_v61 = vmax.f32 %v751_v1, %v827_v5  ;;  %v846_v58 = vpop.f32.mrf.mxu3  ;;  %v876_v57 = vmax.f32 %v715_v2, %v791_v0  ;;  %v810_v60 = vpop.f32.mrf.mxu1 }
 0x101   :  { %v875_v17 = vmax.f32 %v770_v3, %v846_v58  ;;  %v877_v63 = vmax.f32 %v734_v4, %v810_v60 }
 0x102   :  { %v890_v35 = vmax.f32 %v858_v38, %v874_v61  ;;  %v892_v20 = vmax.f32 %v860_v40, %v876_v57  ;;  %v921_v57 = vpop.permute.xlu1 %920 }
 0x103   :  { %v891_v21 = vmax.f32 %v859_v41, %v875_v17  ;;  %v893_v22 = vmax.f32 %v861_v42, %v877_v63 }
 0x104   :  { %v930_v31 = vadd.f32 %v911_v15, %v890_v35  ;;  %v932_v34 = vadd.f32 %v916_v33, %v892_v20 }
 0x105   :  { %v931_v37 = vadd.f32 %v911_v15, %v891_v21  ;;  %v933_v39 = vadd.f32 %v916_v33, %v893_v22 }
 0x106   :  { %946 = vst [vmem:[%s2208_s3 + $0x10] sm:$0xff] %v930_v31 }
 0x107   :  { %947 = vst [vmem:[%s2208_s3 + $0x18] sm:$0xff] %v931_v37  ;;  %v829_v58 = vpop.f32.mrf.mxu2  ;;  %v794_v0 = vpop.f32.mrf.mxu0 }
 0x108   :  { %948 = vst [vmem:[%s2208_s3 + $0x20] sm:$0xff] %v932_v34  ;;  %v878_v19 = vmax.f32 %v753_v6, %v829_v58  ;;  %v848_v36 = vpop.f32.mrf.mxu3  ;;  %v880_v38 = vmax.f32 %v718_v7, %v794_v0  ;;  %v813_v40 = vpop.f32.mrf.mxu1 }
 0x109   :  { %949 = vst [vmem:[%s2208_s3 + $0x28] sm:$0xff] %v933_v39  ;;  %v879_v41 = vmax.f32 %v772_v8, %v848_v36  ;;  %v881_v42 = vmax.f32 %v737_v9, %v813_v40  ;;  %v2210_v9 = vmax.f32 %v2042_v29, %v2092_v56 }
 0x10a   :  { %v894_v61 = vmax.f32 %v862_v45, %v878_v19  ;;  %v896_v1 = vmax.f32 %v864_v47, %v880_v38 }
 0x10b   :  { %v895_v2 = vmax.f32 %v863_v49, %v879_v41  ;;  %v897_v3 = vmax.f32 %v865_v50, %v881_v42  ;;  %v2209_v49 = vmax.f32 %v2040_v28, %v2088_v54 }
 0x10c   :  { %v934_v4 = vadd.f32 %v916_v33, %v894_v61  ;;  %v936_v6 = vadd.f32 %v921_v57, %v896_v1 }
 0x10d   :  { %v935_v7 = vadd.f32 %v916_v33, %v895_v2  ;;  %v937_v8 = vadd.f32 %v921_v57, %v897_v3 }
 0x10e   :  { %950 = vst [vmem:[%s2208_s3 + $0x30] sm:$0xff] %v934_v4 }
 0x10f   :  { %951 = vst [vmem:[%s2208_s3 + $0x38] sm:$0xff] %v935_v7  ;;  %v832_v23 = vpop.f32.mrf.mxu2  ;;  %v796_v24 = vpop.f32.mrf.mxu0 }
 0x110   :  { %952 = vst [vmem:[%s2208_s3 + $0x40] sm:$0xff] %v936_v6  ;;  %v882_v25 = vmax.f32 %v2106_v10, %v832_v23  ;;  %v851_v26 = vpop.f32.mrf.mxu3  ;;  %v884_v43 = vmax.f32 %v2108_v11, %v796_v24  ;;  %v815_v44 = vpop.f32.mrf.mxu1 }
 0x111   :  { %953 = vst [vmem:[%s2208_s3 + $0x48] sm:$0xff] %v937_v8  ;;  %v883_v45 = vmax.f32 %v2110_v13, %v851_v26  ;;  %v885_v46 = vmax.f32 %v2112_v14, %v815_v44  ;;  %v926_v11 = vpop.permute.xlu1 %925 }
 0x112   :  { %v898_v47 = vmax.f32 %v866_v53, %v882_v25  ;;  %v900_v48 = vmax.f32 %v868_v55, %v884_v43  ;;  %v2212_v53 = vmax.f32 %v2046_v32, %v2102_v62 }
 0x113   :  { %v899_v50 = vmax.f32 %v2209_v49, %v883_v45  ;;  %v901_v10 = vmax.f32 %v2210_v9, %v885_v46 }
 0x114   :  { %v938_v13 = vadd.f32 %v921_v57, %v898_v47  ;;  %v940_v15 = vadd.f32 %v926_v11, %v900_v48 }
 0x115   :  { %v939_v14 = vadd.f32 %v921_v57, %v899_v50  ;;  %v941_v5 = vadd.f32 %v926_v11, %v901_v10 }
 0x116   :  { %954 = vst [vmem:[%s2208_s3 + $0x50] sm:$0xff] %v938_v13 }
 0x117   :  { %955 = vst [vmem:[%s2208_s3 + $0x58] sm:$0xff] %v939_v14  ;;  %v834_v12 = vpop.f32.mrf.mxu2 }
 0x118   :  { %956 = vst [vmem:[%s2208_s3 + $0x60] sm:$0xff] %v940_v15  ;;  %v886_v27 = vmax.f32 %v2114_v16, %v834_v12  ;;  %v853_v28 = vpop.f32.mrf.mxu3 }
 0x119   :  { %957 = vst [vmem:[%s2208_s3 + $0x68] sm:$0xff] %v941_v5  ;;  %v887_v29 = vmax.f32 %v2116_v18, %v853_v28 }
 0x11a   :  { %v902_v52 = vmax.f32 %v2211_v51, %v886_v27 }
 0x11b   :  { %v903_v54 = vmax.f32 %v2212_v53, %v887_v29 }
 0x11c   :  { %v942_v55 = vadd.f32 %v926_v11, %v902_v52 }
 0x11d   :  { %v943_v56 = vadd.f32 %v926_v11, %v903_v54 }
 0x11e   :  { %958 = vst [vmem:[%s2208_s3 + $0x70] sm:$0xff] %v942_v55 }
 0x11f   :  { %959 = vst [vmem:[%s2208_s3 + $0x78] sm:$0xff] %v943_v56 }

// kernel: squrntial_forward.5
= control target key start
LH: loop header
LB: loop body
LE: loop exit
PB: predicated region body
PF: predicated region fallthrough
CT: control target
= control target key end

     0   :  { %vm1301_vm0 = vcmask 261120   ;;  %s4465_s0 = inlined_call_operand.vmem [shape: bf16[800,512], index: 0, kind: input, shape index: {}]   ;;  %s4466_s1 = inlined_call_operand.vmem [shape: bf16[32,800], index: 1, kind: input, shape index: {}]   ;;  %s4467_s2 = inlined_call_operand.vmem [shape: f32[32,1], index: 2, kind: input, shape index: {}]   ;;  %s4468_s3 = inlined_call_operand.vmem [shape: f32[32,128], index: 3, kind: output, shape index: {}]  }
   0x1   :  { %v2058_v0 = vld [vmem:[%s4465_s0 + $0xe0] sm:$0xf]  ;;  %v2796_v1 = vld [vmem:[%s4465_s0 + $0xec] sm:$0xf0] }
   0x2   :  { %v2186_v2 = vld [vmem:[%s4465_s0 + $0x1e0] sm:$0xf]  ;;  %v2059_v3 = vor.u32 %v2796_v1, %v2058_v0  ;;  %v2828_v4 = vld [vmem:[%s4465_s0 + $0x1ec] sm:$0xf0] }
   0x3   :  { %v2314_v5 = vld [vmem:[%s4465_s0 + $0x2e0] sm:$0xf]  ;;  %v2860_v6 = vld [vmem:[%s4465_s0 + $0x2ec] sm:$0xf0]  ;;  %v2187_v7 = vor.u32 %v2828_v4, %v2186_v2 }
   0x4   :  { %v2315_v8 = vor.u32 %v2860_v6, %v2314_v5  ;;  %v2442_v9 = vld [vmem:[%s4465_s0 + $0x3e0] sm:$0xf]  ;;  %v2892_v10 = vld [vmem:[%s4465_s0 + $0x3ec] sm:$0xf0]  ;;  %1308 = vmatpush.bf16.msra.mxu0 %v2059_v3 }
   0x5   :  { %v2042_v11 = vld [vmem:[%s4465_s0 + $0xc0] sm:$0xf]  ;;  %v2443_v12 = vor.u32 %v2892_v10, %v2442_v9  ;;  %v2792_v13 = vld [vmem:[%s4465_s0 + $0xcc] sm:$0xf0]  ;;  %1327 = vmatpush.bf16.msra.mxu1 %v2187_v7 }
   0x6   :  { %v2170_v14 = vld [vmem:[%s4465_s0 + $0x1c0] sm:$0xf]  ;;  %v2824_v15 = vld [vmem:[%s4465_s0 + $0x1cc] sm:$0xf0]  ;;  %1346 = vmatpush.bf16.msra.mxu2 %v2315_v8  ;;  %v2043_v16 = vor.u32 %v2792_v13, %v2042_v11 }
   0x7   :  { %v2171_v17 = vor.u32 %v2824_v15, %v2170_v14  ;;  %v2298_v18 = vld [vmem:[%s4465_s0 + $0x2c0] sm:$0xf]  ;;  %v2856_v19 = vld [vmem:[%s4465_s0 + $0x2cc] sm:$0xf0]  ;;  %1365 = vmatpush.bf16.msra.mxu3 %v2443_v12 }
   0x8   :  { %v2426_v20 = vld [vmem:[%s4465_s0 + $0x3c0] sm:$0xf]  ;;  %v2299_v21 = vor.u32 %v2856_v19, %v2298_v18  ;;  %v2888_v22 = vld [vmem:[%s4465_s0 + $0x3cc] sm:$0xf0]  ;;  %1309 = vmatpush.bf16.msra.mxu0 %v2043_v16 }
   0x9   :  { %v2026_v23 = vld [vmem:[%s4465_s0 + $0xa0] sm:$0xf]  ;;  %v2788_v24 = vld [vmem:[%s4465_s0 + $0xac] sm:$0xf0]  ;;  %v2427_v25 = vor.u32 %v2888_v22, %v2426_v20  ;;  %1328 = vmatpush.bf16.msra.mxu1 %v2171_v17 }
   0xa   :  { %v2154_v26 = vld [vmem:[%s4465_s0 + $0x1a0] sm:$0xf]  ;;  %v2820_v27 = vld [vmem:[%s4465_s0 + $0x1ac] sm:$0xf0]  ;;  %v2027_v29 = vor.u32 %v2788_v24, %v2026_v23  ;;  %1347 = vmatpush.bf16.msra.mxu2 %v2299_v21 }
   0xb   :  { %v2282_v28 = vld [vmem:[%s4465_s0 + $0x2a0] sm:$0xf]  ;;  %v2852_v30 = vld [vmem:[%s4465_s0 + $0x2ac] sm:$0xf0]  ;;  %v2155_v33 = vor.u32 %v2820_v27, %v2154_v26  ;;  %1366 = vmatpush.bf16.msra.mxu3 %v2427_v25 }
   0xc   :  { %v2410_v31 = vld [vmem:[%s4465_s0 + $0x3a0] sm:$0xf]  ;;  %v2884_v32 = vld [vmem:[%s4465_s0 + $0x3ac] sm:$0xf0]  ;;  %v2283_v34 = vor.u32 %v2852_v30, %v2282_v28  ;;  %1310 = vmatpush.bf16.msra.mxu0 %v2027_v29  ;;  %v2755_v29 = vld [vmem:[%s4466_s1 + $0x18] sm:$0xf0] }
   0xd   :  { %v2010_v35 = vld [vmem:[%s4465_s0 + $0x80] sm:$0xf]  ;;  %v2784_v36 = vld [vmem:[%s4465_s0 + $0x8c] sm:$0xf0]  ;;  %v2411_v38 = vor.u32 %v2884_v32, %v2410_v31  ;;  %1329 = vmatpush.bf16.msra.mxu1 %v2155_v33  ;;  %v2752_v30 = vld [vmem:[%s4466_s1 + $0x4] sm:$0xf] }
   0xe   :  { %v2138_v37 = vld [vmem:[%s4465_s0 + $0x180] sm:$0xf]  ;;  %v2816_v39 = vld [vmem:[%s4465_s0 + $0x18c] sm:$0xf0]  ;;  %v2011_v44 = vor.u32 %v2784_v36, %v2010_v35  ;;  %1348 = vmatpush.bf16.msra.mxu2 %v2283_v34 }
   0xf   :  { %v2266_v40 = vld [vmem:[%s4465_s0 + $0x280] sm:$0xf]  ;;  %v2848_v41 = vld [vmem:[%s4465_s0 + $0x28c] sm:$0xf0]  ;;  %v2139_v45 = vor.u32 %v2816_v39, %v2138_v37  ;;  %1367 = vmatpush.bf16.msra.mxu3 %v2411_v38  ;;  %v1898_v39 = vld [vmem:[%s4466_s1 + $0x8] sm:$0xf] }
  0x10   :  { %v2394_v42 = vld [vmem:[%s4465_s0 + $0x380] sm:$0xf]  ;;  %v2880_v43 = vld [vmem:[%s4465_s0 + $0x38c] sm:$0xf0]  ;;  %v2267_v46 = vor.u32 %v2848_v41, %v2266_v40  ;;  %1311 = vmatpush.bf16.msra.mxu0 %v2011_v44  ;;  %v2756_v40 = vld [vmem:[%s4466_s1 + $0x20] sm:$0xf0] }
  0x11   :  { %v1994_v47 = vld [vmem:[%s4465_s0 + $0x60] sm:$0xf]  ;;  %v2780_v48 = vld [vmem:[%s4465_s0 + $0x6c] sm:$0xf0]  ;;  %v2395_v50 = vor.u32 %v2880_v43, %v2394_v42  ;;  %1330 = vmatpush.bf16.msra.mxu1 %v2139_v45  ;;  %v2753_v41 = vld [vmem:[%s4466_s1 + $0xc] sm:$0xf] }
  0x12   :  { %v2122_v49 = vld [vmem:[%s4465_s0 + $0x160] sm:$0xf]  ;;  %v2812_v51 = vld [vmem:[%s4465_s0 + $0x16c] sm:$0xf0]  ;;  %v1995_v56 = vor.u32 %v2780_v48, %v1994_v47  ;;  %1349 = vmatpush.bf16.msra.mxu2 %v2267_v46  ;;  %v1900_v43 = vld [vmem:[%s4466_s1 + $0x24] sm:$0xf0] }
  0x13   :  { %v2250_v52 = vld [vmem:[%s4465_s0 + $0x260] sm:$0xf]  ;;  %v2844_v53 = vld [vmem:[%s4465_s0 + $0x26c] sm:$0xf0]  ;;  %v2123_v57 = vor.u32 %v2812_v51, %v2122_v49  ;;  %1368 = vmatpush.bf16.msra.mxu3 %v2395_v50  ;;  %v2794_v49 = vld [vmem:[%s4465_s0 + $0xe4] sm:$0xf] }
  0x14   :  { %v2378_v54 = vld [vmem:[%s4465_s0 + $0x360] sm:$0xf]  ;;  %v2876_v55 = vld [vmem:[%s4465_s0 + $0x36c] sm:$0xf0]  ;;  %v2251_v58 = vor.u32 %v2844_v53, %v2250_v52  ;;  %1312 = vmatpush.bf16.msra.mxu0 %v1995_v56  ;;  %v2060_v50 = vld [vmem:[%s4465_s0 + $0xf0] sm:$0xf0]  ;;  %v3234_v52 = vor.u32 %v2756_v40, %v1898_v39 }
  0x15   :  { %v1978_v59 = vld [vmem:[%s4465_s0 + $0x40] sm:$0xf]  ;;  %v2776_v60 = vld [vmem:[%s4465_s0 + $0x4c] sm:$0xf0]  ;;  %v2379_v62 = vor.u32 %v2876_v55, %v2378_v54  ;;  %1331 = vmatpush.bf16.msra.mxu1 %v2123_v57  ;;  %v3242_v55 = vor.u32 %v2753_v41, %v1900_v43  ;;  %v2063_v57 = vor.u32 %v2794_v49, %v2060_v50  ;;  %v2444_v39 = vld [vmem:[%s4465_s0 + $0x3f0] sm:$0xf0] }
  0x16   :  { %v2106_v61 = vld [vmem:[%s4465_s0 + $0x140] sm:$0xf]  ;;  %v2808_v63 = vld [vmem:[%s4465_s0 + $0x14c] sm:$0xf0]  ;;  %v1979_v4 = vor.u32 %v2776_v60, %v1978_v59  ;;  %1350 = vmatpush.bf16.msra.mxu2 %v2251_v58 }
  0x17   :  { %v2234_v0 = vld [vmem:[%s4465_s0 + $0x240] sm:$0xf]  ;;  %v2840_v1 = vld [vmem:[%s4465_s0 + $0x24c] sm:$0xf0]  ;;  %v2107_v5 = vor.u32 %v2808_v63, %v2106_v61  ;;  %1369 = vmatpush.bf16.msra.mxu3 %v2379_v62  ;;  %v2790_v61 = vld [vmem:[%s4465_s0 + $0xc4] sm:$0xf] }
  0x18   :  { %v2362_v2 = vld [vmem:[%s4465_s0 + $0x340] sm:$0xf]  ;;  %v2872_v3 = vld [vmem:[%s4465_s0 + $0x34c] sm:$0xf0]  ;;  %v2235_v6 = vor.u32 %v2840_v1, %v2234_v0  ;;  %1313 = vmatpush.bf16.msra.mxu0 %v1979_v4  ;;  %v2044_v62 = vld [vmem:[%s4465_s0 + $0xd0] sm:$0xf0] }
  0x19   :  { %v1962_v7 = vld [vmem:[%s4465_s0 + $0x20] sm:$0xf]  ;;  %v2772_v8 = vld [vmem:[%s4465_s0 + $0x2c] sm:$0xf0]  ;;  %v2363_v10 = vor.u32 %v2872_v3, %v2362_v2  ;;  %1332 = vmatpush.bf16.msra.mxu1 %v2107_v5  ;;  %v2047_v5 = vor.u32 %v2790_v61, %v2044_v62  ;;  %v2882_v62 = vld [vmem:[%s4465_s0 + $0x3a4] sm:$0xf] }
  0x1a   :  { %v2090_v9 = vld [vmem:[%s4465_s0 + $0x120] sm:$0xf]  ;;  %v2804_v11 = vld [vmem:[%s4465_s0 + $0x12c] sm:$0xf0]  ;;  %v1963_v17 = vor.u32 %v2772_v8, %v1962_v7  ;;  %1351 = vmatpush.bf16.msra.mxu2 %v2235_v6 }
  0x1b   :  { %v2218_v12 = vld [vmem:[%s4465_s0 + $0x220] sm:$0xf]  ;;  %v2836_v13 = vld [vmem:[%s4465_s0 + $0x22c] sm:$0xf0]  ;;  %v2091_v21 = vor.u32 %v2804_v11, %v2090_v9  ;;  %1370 = vmatpush.bf16.msra.mxu3 %v2363_v10  ;;  %v2786_v9 = vld [vmem:[%s4465_s0 + $0xa4] sm:$0xf] }
  0x1c   :  { %v2346_v14 = vld [vmem:[%s4465_s0 + $0x320] sm:$0xf]  ;;  %v2868_v15 = vld [vmem:[%s4465_s0 + $0x32c] sm:$0xf0]  ;;  %v2219_v22 = vor.u32 %v2836_v13, %v2218_v12  ;;  %1314 = vmatpush.bf16.msra.mxu0 %v1963_v17  ;;  %v2028_v10 = vld [vmem:[%s4465_s0 + $0xb0] sm:$0xf0] }
  0x1d   :  { %v1946_v16 = vld [vmem:[%s4465_s0] sm:$0xf]  ;;  %v2768_v18 = vld [vmem:[%s4465_s0 + $0xc] sm:$0xf0]  ;;  %v2347_v26 = vor.u32 %v2868_v15, %v2346_v14  ;;  %1333 = vmatpush.bf16.msra.mxu1 %v2091_v21  ;;  %v2782_v17 = vld [vmem:[%s4465_s0 + $0x84] sm:$0xf] }
  0x1e   :  { %v2074_v19 = vld [vmem:[%s4465_s0 + $0x100] sm:$0xf]  ;;  %v2800_v20 = vld [vmem:[%s4465_s0 + $0x10c] sm:$0xf0]  ;;  %v1947_v33 = vor.u32 %v2768_v18, %v1946_v16  ;;  %1352 = vmatpush.bf16.msra.mxu2 %v2219_v22  ;;  %v2031_v16 = vor.u32 %v2786_v9, %v2028_v10  ;;  %v2012_v18 = vld [vmem:[%s4465_s0 + $0x90] sm:$0xf0] }
  0x1f   :  { %v2202_v23 = vld [vmem:[%s4465_s0 + $0x200] sm:$0xf]  ;;  %v2832_v24 = vld [vmem:[%s4465_s0 + $0x20c] sm:$0xf0]  ;;  %v2075_v37 = vor.u32 %v2800_v20, %v2074_v19  ;;  %1371 = vmatpush.bf16.msra.mxu3 %v2347_v26  ;;  %v1918_v19 = vld [vmem:[%s4466_s1 + $0x38] sm:$0xf] }
  0x20   :  { %v2330_v25 = vld [vmem:[%s4465_s0 + $0x300] sm:$0xf]  ;;  %v2864_v27 = vld [vmem:[%s4465_s0 + $0x30c] sm:$0xf0]  ;;  %v2203_v38 = vor.u32 %v2832_v24, %v2202_v23  ;;  %1315 = vmatpush.bf16.msra.mxu0 %v1947_v33  ;;  %v2762_v21 = vld [vmem:[%s4466_s1 + $0x50] sm:$0xf0] }
  0x21   :  { %v1890_v28 = vld [vmem:[%s4466_s1] sm:$0xf]  ;;  %v2964_v32 = vld [vmem:[%s4465_s0 + $0x62c] sm:$0xf0]  ;;  %v2331_v42 = vor.u32 %v2864_v27, %v2330_v25  ;;  %1334 = vmatpush.bf16.msra.mxu1 %v2075_v37  ;;  %v2759_v22 = vld [vmem:[%s4466_s1 + $0x3c] sm:$0xf] }
  0x22   :  { %v2730_v31 = vld [vmem:[%s4465_s0 + $0x620] sm:$0xf]  ;;  %v2956_v36 = vld [vmem:[%s4465_s0 + $0x5ec] sm:$0xf0]  ;;  %v3224_v47 = vor.u32 %v2755_v29, %v1890_v28  ;;  %1353 = vmatpush.bf16.msra.mxu2 %v2203_v38  ;;  %v1920_v23 = vld [vmem:[%s4466_s1 + $0x54] sm:$0xf0] }
  0x23   :  { %v1892_v34 = vld [vmem:[%s4466_s1 + $0x1c] sm:$0xf0]  ;;  %v2731_v44 = vor.u32 %v2964_v32, %v2730_v31  ;;  %v2924_v46 = vld [vmem:[%s4465_s0 + $0x4ec] sm:$0xf0]  ;;  %1372 = vmatpush.bf16.msra.mxu3 %v2331_v42  ;;  %v2763_v28 = vld [vmem:[%s4466_s1 + $0x58] sm:$0xf0]  ;;  %v2015_v31 = vor.u32 %v2782_v17, %v2012_v18  ;;  %v3352_v40 = vor.u32 %v2759_v22, %v1920_v23 }
  0x24   :  { %v2698_v35 = vld [vmem:[%s4465_s0 + $0x5e0] sm:$0xf]  ;;  %v3232_v51 = vor.u32 %v2752_v30, %v1892_v34  ;;  %v2952_v54 = vld [vmem:[%s4465_s0 + $0x5cc] sm:$0xf0]  ;;  %1316 = vmatmul.bf16.vlgmr.msra.gmra.mxu0 %v3224_v47  ;;  %v2760_v29 = vld [vmem:[%s4466_s1 + $0x44] sm:$0xf] }
  0x25   :  { %v2570_v45 = vld [vmem:[%s4465_s0 + $0x4e0] sm:$0xf]  ;;  %v2699_v48 = vor.u32 %v2956_v36, %v2698_v35  ;;  %v2920_v59 = vld [vmem:[%s4465_s0 + $0x4cc] sm:$0xf0]  ;;  %1354 = vmatmul.bf16.vlgmr.msra.gmra.mxu2 %v3234_v52  ;;  %v2778_v34 = vld [vmem:[%s4465_s0 + $0x64] sm:$0xf]  ;;  %v3341_v35 = vor.u32 %v2762_v21, %v1918_v19 }
  0x26   :  { %v2682_v53 = vld [vmem:[%s4465_s0 + $0x5c0] sm:$0xf]  ;;  %v2571_v56 = vor.u32 %v2924_v46, %v2570_v45  ;;  %1428 = vmatpush.bf16.msrb.mxu2 %v2731_v44  ;;  %1335 = vmatmul.bf16.vlgmr.msra.gmra.mxu1 %v3232_v51  ;;  %v2948_v0 = vld [vmem:[%s4465_s0 + $0x5ac] sm:$0xf0]  ;;  %v1996_v37 = vld [vmem:[%s4465_s0 + $0x70] sm:$0xf0] }
  0x27   :  { %v2554_v58 = vld [vmem:[%s4465_s0 + $0x4c0] sm:$0xf]  ;;  %1403 = vmatpush.bf16.msrb.mxu1 %v2699_v48  ;;  %v2683_v60 = vor.u32 %v2952_v54, %v2682_v53  ;;  %v2960_v2 = vld [vmem:[%s4465_s0 + $0x60c] sm:$0xf0]  ;;  %1373 = vmatmul.bf16.vlgmr.msra.gmra.mxu3 %v3242_v55  ;;  %v2890_v38 = vld [vmem:[%s4465_s0 + $0x3e4] sm:$0xf]  ;;  %v1999_v49 = vor.u32 %v2778_v34, %v1996_v37 }
  0x28   :  { %v2666_v63 = vld [vmem:[%s4465_s0 + $0x5a0] sm:$0xf]  ;;  %1384 = vmatpush.bf16.msrb.mxu0 %v2571_v56  ;;  %v2555_v3 = vor.u32 %v2920_v59, %v2554_v58  ;;  %1441 = vmatpush.bf16.msrb.mxu3 %v2063_v57  ;;  %v2916_v7 = vld [vmem:[%s4465_s0 + $0x4ac] sm:$0xf0]  ;;  %v2447_v44 = vor.u32 %v2890_v38, %v2444_v39  ;;  %v2886_v53 = vld [vmem:[%s4465_s0 + $0x3c4] sm:$0xf] }
  0x29   :  { %v2714_v1 = vld [vmem:[%s4465_s0 + $0x600] sm:$0xf]  ;;  %v2667_v8 = vor.u32 %v2948_v0, %v2666_v63  ;;  %v2944_v12 = vld [vmem:[%s4465_s0 + $0x58c] sm:$0xf0]  ;;  %v2428_v54 = vld [vmem:[%s4465_s0 + $0x3d0] sm:$0xf0] }
  0x2a   :  { %v2715_v4 = vor.u32 %v2960_v2, %v2714_v1  ;;  %v2538_v6 = vld [vmem:[%s4465_s0 + $0x4a0] sm:$0xf]  ;;  %v2912_v15 = vld [vmem:[%s4465_s0 + $0x48c] sm:$0xf0]  ;;  %v2774_v57 = vld [vmem:[%s4465_s0 + $0x44] sm:$0xf]  ;;  %v2431_v59 = vor.u32 %v2886_v53, %v2428_v54 }
  0x2b   :  { %1404 = vmatpush.bf16.msrb.mxu1 %v2683_v60  ;;  %v2650_v11 = vld [vmem:[%s4465_s0 + $0x580] sm:$0xf]  ;;  %v2539_v13 = vor.u32 %v2916_v7, %v2538_v6  ;;  %v2940_v26 = vld [vmem:[%s4465_s0 + $0x56c] sm:$0xf0]  ;;  %v1980_v58 = vld [vmem:[%s4465_s0 + $0x50] sm:$0xf0] }
  0x2c   :  { %1429 = vmatpush.bf16.msrb.mxu2 %v2715_v4  ;;  %1385 = vmatpush.bf16.msrb.mxu0 %v2555_v3  ;;  %v2522_v14 = vld [vmem:[%s4465_s0 + $0x480] sm:$0xf]  ;;  %v2651_v20 = vor.u32 %v2944_v12, %v2650_v11  ;;  %v2908_v33 = vld [vmem:[%s4465_s0 + $0x46c] sm:$0xf0]  ;;  %v2412_v0 = vld [vmem:[%s4465_s0 + $0x3b0] sm:$0xf0]  ;;  %v1983_v1 = vor.u32 %v2774_v57, %v1980_v58 }
  0x2d   :  { %1442 = vmatpush.bf16.msrb.mxu3 %v2047_v5  ;;  %v1926_v24 = vld [vmem:[%s4466_s1 + $0x40] sm:$0xf]  ;;  %v2523_v27 = vor.u32 %v2912_v15, %v2522_v14  ;;  %v2936_v43 = vld [vmem:[%s4465_s0 + $0x54c] sm:$0xf0]  ;;  %v2770_v4 = vld [vmem:[%s4465_s0 + $0x24] sm:$0xf]  ;;  %v2415_v5 = vor.u32 %v2882_v62, %v2412_v0 }
  0x2e   :  { %v2634_v25 = vld [vmem:[%s4465_s0 + $0x560] sm:$0xf]  ;;  %v3354_v41 = vor.u32 %v2763_v28, %v1926_v24  ;;  %v2904_v50 = vld [vmem:[%s4465_s0 + $0x44c] sm:$0xf0]  ;;  %v1964_v7 = vld [vmem:[%s4465_s0 + $0x30] sm:$0xf0] }
  0x2f   :  { %1405 = vmatpush.bf16.msrb.mxu1 %v2667_v8  ;;  %v1928_v30 = vld [vmem:[%s4466_s1 + $0x5c] sm:$0xf0]  ;;  %v2635_v36 = vor.u32 %v2940_v26, %v2634_v25  ;;  %v2932_v61 = vld [vmem:[%s4465_s0 + $0x52c] sm:$0xf0]  ;;  %v2878_v8 = vld [vmem:[%s4465_s0 + $0x384] sm:$0xf] }
  0x30   :  { %1386 = vmatpush.bf16.msrb.mxu0 %v2539_v13  ;;  %v2506_v32 = vld [vmem:[%s4465_s0 + $0x460] sm:$0xf]  ;;  %v3362_v45 = vor.u32 %v2760_v29, %v1928_v30  ;;  %1498 = vmatpush.bf16.msra.mxu2 %v2447_v44  ;;  %v2900_v3 = vld [vmem:[%s4465_s0 + $0x42c] sm:$0xf0]  ;;  %v2396_v9 = vld [vmem:[%s4465_s0 + $0x390] sm:$0xf0] }
  0x31   :  { %1443 = vmatpush.bf16.msrb.mxu3 %v2031_v16  ;;  %v2618_v42 = vld [vmem:[%s4465_s0 + $0x540] sm:$0xf]  ;;  %v2507_v46 = vor.u32 %v2908_v33, %v2506_v32  ;;  %v2928_v11 = vld [vmem:[%s4465_s0 + $0x50c] sm:$0xf0]  ;;  %v2858_v14 = vld [vmem:[%s4465_s0 + $0x2e4] sm:$0xf]  ;;  %v1967_v16 = vor.u32 %v2770_v4, %v1964_v7 }
  0x32   :  { %v2490_v48 = vld [vmem:[%s4465_s0 + $0x440] sm:$0xf]  ;;  %v2619_v56 = vor.u32 %v2936_v43, %v2618_v42  ;;  %v2316_v15 = vld [vmem:[%s4465_s0 + $0x2f0] sm:$0xf0]  ;;  %v2896_v17 = vld [vmem:[%s4465_s0 + $0x40c] sm:$0xf0] }
  0x33   :  { %1406 = vmatpush.bf16.msrb.mxu1 %v2651_v20  ;;  %v2602_v60 = vld [vmem:[%s4465_s0 + $0x520] sm:$0xf]  ;;  %v2491_v63 = vor.u32 %v2904_v50, %v2490_v48  ;;  %v2766_v18 = vld [vmem:[%s4465_s0 + $0x4] sm:$0xf]  ;;  %v1948_v19 = vld [vmem:[%s4465_s0 + $0x10] sm:$0xf0]  ;;  %v2399_v20 = vor.u32 %v2878_v8, %v2396_v9 }
  0x34   :  { %1387 = vmatpush.bf16.msrb.mxu0 %v2523_v27  ;;  %v2474_v2 = vld [vmem:[%s4465_s0 + $0x420] sm:$0xf]  ;;  %1499 = vmatpush.bf16.msra.mxu2 %v2431_v59  ;;  %v2603_v6 = vor.u32 %v2932_v61, %v2602_v60  ;;  %v1906_v22 = vld [vmem:[%s4466_s1 + $0x10] sm:$0xf]  ;;  %v2757_v23 = vld [vmem:[%s4466_s1 + $0x28] sm:$0xf0]  ;;  %v2319_v27 = vor.u32 %v2858_v14, %v2316_v15 }
  0x35   :  { %1444 = vmatpush.bf16.msrb.mxu3 %v2015_v31  ;;  %1321 = vmatmul.bf16.gmra.mxu0 %v3341_v35  ;;  %v2586_v10 = vld [vmem:[%s4465_s0 + $0x500] sm:$0xf]  ;;  %v2475_v12 = vor.u32 %v2900_v3, %v2474_v2  ;;  %v2826_v24 = vld [vmem:[%s4465_s0 + $0x1e4] sm:$0xf]  ;;  %v2188_v25 = vld [vmem:[%s4465_s0 + $0x1f0] sm:$0xf0]  ;;  %v3491_v50 = vor.u32 %v2757_v23, %v1906_v22 }
  0x36   :  { %1340 = vmatmul.bf16.gmra.mxu1 %v3352_v40  ;;  %1359 = vmatmul.bf16.gmra.mxu2 %v3354_v41  ;;  %v2458_v13 = vld [vmem:[%s4465_s0 + $0x400] sm:$0xf]  ;;  %v2587_v21 = vor.u32 %v2928_v11, %v2586_v10  ;;  %v2922_v26 = vld [vmem:[%s4465_s0 + $0x4e4] sm:$0xf]  ;;  %v2572_v28 = vld [vmem:[%s4465_s0 + $0x4f0] sm:$0xf0]  ;;  %v2191_v38 = vor.u32 %v2826_v24, %v2188_v25 }
  0x37   :  { %1407 = vmatpush.bf16.msrb.mxu1 %v2635_v36  ;;  %1378 = vmatmul.bf16.gmra.mxu3 %v3362_v45  ;;  %v2874_v29 = vld [vmem:[%s4465_s0 + $0x364] sm:$0xf]  ;;  %v2380_v30 = vld [vmem:[%s4465_s0 + $0x370] sm:$0xf0]  ;;  %v2459_v31 = vor.u32 %v2896_v17, %v2458_v13  ;;  %v1908_v33 = vld [vmem:[%s4466_s1 + $0x2c] sm:$0xf0]  ;;  %v1951_v36 = vor.u32 %v2766_v18, %v1948_v19  ;;  %v2575_v43 = vor.u32 %v2922_v26, %v2572_v28 }
  0x38   :  { %1388 = vmatpush.bf16.msrb.mxu0 %v2507_v46  ;;  %1500 = vmatpush.bf16.msra.mxu2 %v2415_v5  ;;  %v2754_v32 = vld [vmem:[%s4466_s1 + $0x14] sm:$0xf]  ;;  %v1914_v34 = vld [vmem:[%s4466_s1 + $0x18] sm:$0xf]  ;;  %v2822_v39 = vld [vmem:[%s4465_s0 + $0x1c4] sm:$0xf] }
  0x39   :  { %1445 = vmatpush.bf16.msrb.mxu3 %v1999_v49  ;;  %v2758_v37 = vld [vmem:[%s4466_s1 + $0x30] sm:$0xf0]  ;;  %v2854_v44 = vld [vmem:[%s4465_s0 + $0x2c4] sm:$0xf]  ;;  %v2383_v49 = vor.u32 %v2874_v29, %v2380_v30  ;;  %v3493_v53 = vor.u32 %v2754_v32, %v1908_v33  ;;  %v2066_v19 = vld [vmem:[%s4465_s0 + $0xe8] sm:$0xf] }
  0x3a   :  { %v2172_v42 = vld [vmem:[%s4465_s0 + $0x1d0] sm:$0xf0]  ;;  %v2918_v48 = vld [vmem:[%s4465_s0 + $0x4c4] sm:$0xf]  ;;  %v3504_v58 = vor.u32 %v2758_v37, %v1914_v34  ;;  %v1934_v25 = vld [vmem:[%s4466_s1 + $0x48] sm:$0xf] }
  0x3b   :  { %1408 = vmatpush.bf16.msrb.mxu1 %v2619_v56  ;;  %v2300_v46 = vld [vmem:[%s4465_s0 + $0x2d0] sm:$0xf0]  ;;  %v2870_v56 = vld [vmem:[%s4465_s0 + $0x344] sm:$0xf]  ;;  %v2175_v59 = vor.u32 %v2822_v39, %v2172_v42  ;;  %v2761_v34 = vld [vmem:[%s4466_s1 + $0x4c] sm:$0xf] }
  0x3c   :  { %1389 = vmatpush.bf16.msrb.mxu0 %v2491_v63  ;;  %1501 = vmatpush.bf16.msra.mxu2 %v2399_v20  ;;  %v2556_v54 = vld [vmem:[%s4465_s0 + $0x4d0] sm:$0xf0]  ;;  %v2303_v60 = vor.u32 %v2854_v44, %v2300_v46  ;;  %v2818_v61 = vld [vmem:[%s4465_s0 + $0x1a4] sm:$0xf]  ;;  %v2797_v20 = vld [vmem:[%s4465_s0 + $0xf4] sm:$0xf0] }
  0x3d   :  { %1446 = vmatpush.bf16.msrb.mxu3 %v1983_v1  ;;  %v2364_v57 = vld [vmem:[%s4465_s0 + $0x350] sm:$0xf0]  ;;  %v2559_v63 = vor.u32 %v2918_v48, %v2556_v54  ;;  %v2850_v0 = vld [vmem:[%s4465_s0 + $0x2a4] sm:$0xf]  ;;  %v2067_v33 = vor.u32 %v2797_v20, %v2066_v19  ;;  %v1942_v37 = vld [vmem:[%s4466_s1 + $0x50] sm:$0xf] }
  0x3e   :  { %v2156_v62 = vld [vmem:[%s4465_s0 + $0x1b0] sm:$0xf0]  ;;  %v2914_v2 = vld [vmem:[%s4465_s0 + $0x4a4] sm:$0xf]  ;;  %v2367_v3 = vor.u32 %v2870_v56, %v2364_v57 }
  0x3f   :  { %1409 = vmatpush.bf16.msrb.mxu1 %v2603_v6  ;;  %v2284_v1 = vld [vmem:[%s4465_s0 + $0x2b0] sm:$0xf0]  ;;  %v2866_v5 = vld [vmem:[%s4465_s0 + $0x324] sm:$0xf]  ;;  %v2159_v7 = vor.u32 %v2818_v61, %v2156_v62  ;;  %v2793_v61 = vld [vmem:[%s4465_s0 + $0xd4] sm:$0xf0] }
  0x40   :  { %1390 = vmatpush.bf16.msrb.mxu0 %v2475_v12  ;;  %1502 = vmatpush.bf16.msra.mxu2 %v2383_v49  ;;  %v2540_v4 = vld [vmem:[%s4465_s0 + $0x4b0] sm:$0xf0]  ;;  %v2287_v8 = vor.u32 %v2850_v0, %v2284_v1  ;;  %v2814_v9 = vld [vmem:[%s4465_s0 + $0x184] sm:$0xf] }
  0x41   :  { %1447 = vmatpush.bf16.msrb.mxu3 %v1967_v16  ;;  %v2348_v6 = vld [vmem:[%s4465_s0 + $0x330] sm:$0xf0]  ;;  %v2543_v11 = vor.u32 %v2914_v2, %v2540_v4  ;;  %v2846_v12 = vld [vmem:[%s4465_s0 + $0x284] sm:$0xf] }
  0x42   :  { %v2140_v10 = vld [vmem:[%s4465_s0 + $0x190] sm:$0xf0]  ;;  %v2910_v14 = vld [vmem:[%s4465_s0 + $0x484] sm:$0xf]  ;;  %v2351_v15 = vor.u32 %v2866_v5, %v2348_v6 }
  0x43   :  { %1410 = vmatpush.bf16.msrb.mxu1 %v2587_v21  ;;  %v2268_v13 = vld [vmem:[%s4465_s0 + $0x290] sm:$0xf0]  ;;  %v2862_v17 = vld [vmem:[%s4465_s0 + $0x304] sm:$0xf]  ;;  %v2143_v21 = vor.u32 %v2814_v9, %v2140_v10  ;;  %v2034_v9 = vld [vmem:[%s4465_s0 + $0xa8] sm:$0xf] }
  0x44   :  { %1391 = vmatpush.bf16.msrb.mxu0 %v2459_v31  ;;  %1503 = vmatpush.bf16.msra.mxu2 %v2367_v3  ;;  %v2524_v16 = vld [vmem:[%s4465_s0 + $0x490] sm:$0xf0]  ;;  %v2271_v22 = vor.u32 %v2846_v12, %v2268_v13  ;;  %v2810_v23 = vld [vmem:[%s4465_s0 + $0x164] sm:$0xf]  ;;  %v2789_v10 = vld [vmem:[%s4465_s0 + $0xb4] sm:$0xf0] }
  0x45   :  { %1448 = vmatpush.bf16.msrb.mxu3 %v1951_v36  ;;  %v2332_v18 = vld [vmem:[%s4465_s0 + $0x310] sm:$0xf0]  ;;  %v2527_v24 = vor.u32 %v2910_v14, %v2524_v16  ;;  %v2764_v30 = vld [vmem:[%s4466_s1 + $0x60] sm:$0xf0]  ;;  %v1936_v36 = vld [vmem:[%s4466_s1 + $0x64] sm:$0xf0]  ;;  %v2035_v20 = vor.u32 %v2789_v10, %v2034_v9 }
  0x46   :  { %1411 = vmatmul.bf16.vlgmr.msrb.gmra.mxu1 %v3493_v53  ;;  %2744 = vmatmul.msk.bf16.vlgmr.msrb.gmra.mxu2 %vm1301_vm0, %v3504_v58  ;;  %v2124_v26 = vld [vmem:[%s4465_s0 + $0x170] sm:$0xf0]  ;;  %v2335_v29 = vor.u32 %v2862_v17, %v2332_v18  ;;  %v2906_v31 = vld [vmem:[%s4465_s0 + $0x464] sm:$0xf]  ;;  %v3616_v56 = vor.u32 %v2764_v30, %v1934_v25  ;;  %v3618_v57 = vor.u32 %v2761_v34, %v1936_v36  ;;  %v2785_v30 = vld [vmem:[%s4465_s0 + $0x94] sm:$0xf0] }
  0x47   :  { %1479 = vmatpush.bf16.msra.mxu1 %v2319_v27  ;;  %1392 = vmatmul.bf16.vlgmr.msrb.gmra.mxu0 %v3491_v50  ;;  %v2842_v27 = vld [vmem:[%s4465_s0 + $0x264] sm:$0xf]  ;;  %v2252_v28 = vld [vmem:[%s4465_s0 + $0x270] sm:$0xf0]  ;;  %v2127_v39 = vor.u32 %v2810_v23, %v2124_v26  ;;  %v2194_v23 = vld [vmem:[%s4465_s0 + $0x1e8] sm:$0xf] }
  0x48   :  { %1460 = vmatpush.bf16.msra.mxu0 %v2191_v38  ;;  %1449 = vmatmul.bf16.vlgmr.msrb.gmra.mxu3 %v3224_v47  ;;  %v2508_v32 = vld [vmem:[%s4465_s0 + $0x470] sm:$0xf0]  ;;  %v2765_v38 = vld [vmem:[%s4466_s1 + $0x68] sm:$0xf0]  ;;  %v2255_v42 = vor.u32 %v2842_v27, %v2252_v28  ;;  %v2838_v48 = vld [vmem:[%s4465_s0 + $0x244] sm:$0xf] }
  0x49   :  { %1517 = vmatpush.bf16.msra.mxu3 %v2575_v43  ;;  %1504 = vmatpush.bf16.msra.mxu2 %v2351_v15  ;;  %v2806_v43 = vld [vmem:[%s4465_s0 + $0x144] sm:$0xf]  ;;  %v2108_v44 = vld [vmem:[%s4465_s0 + $0x150] sm:$0xf0]  ;;  %v2511_v46 = vor.u32 %v2906_v31, %v2508_v32  ;;  %v3629_v62 = vor.u32 %v2765_v38, %v1942_v37 }
  0x4a   :  { %v2236_v49 = vld [vmem:[%s4465_s0 + $0x250] sm:$0xf0]  ;;  %v2902_v54 = vld [vmem:[%s4465_s0 + $0x444] sm:$0xf] }
  0x4b   :  { %1480 = vmatpush.bf16.msra.mxu1 %v2303_v60  ;;  %v2050_v60 = vld [vmem:[%s4465_s0 + $0xc8] sm:$0xf]  ;;  %v2239_v0 = vor.u32 %v2838_v48, %v2236_v49  ;;  %v2802_v1 = vld [vmem:[%s4465_s0 + $0x124] sm:$0xf]  ;;  %v2092_v2 = vld [vmem:[%s4465_s0 + $0x130] sm:$0xf0] }
  0x4c   :  { %1461 = vmatpush.bf16.msra.mxu0 %v2175_v59  ;;  %v2492_v59 = vld [vmem:[%s4465_s0 + $0x450] sm:$0xf0]  ;;  %v2834_v4 = vld [vmem:[%s4465_s0 + $0x224] sm:$0xf]  ;;  %v2781_v48 = vld [vmem:[%s4465_s0 + $0x74] sm:$0xf0] }
  0x4d   :  { %1518 = vmatpush.bf16.msra.mxu3 %v2559_v63  ;;  %1505 = vmatpush.bf16.msra.mxu2 %v2335_v29  ;;  %v2111_v63 = vor.u32 %v2806_v43, %v2108_v44  ;;  %v2495_v3 = vor.u32 %v2902_v54, %v2492_v59  ;;  %v2220_v5 = vld [vmem:[%s4465_s0 + $0x230] sm:$0xf0]  ;;  %v2898_v6 = vld [vmem:[%s4465_s0 + $0x424] sm:$0xf]  ;;  %v2018_v29 = vld [vmem:[%s4465_s0 + $0x88] sm:$0xf] }
  0x4e   :  { %v2223_v12 = vor.u32 %v2834_v4, %v2220_v5  ;;  %v2798_v13 = vld [vmem:[%s4465_s0 + $0x104] sm:$0xf]  ;;  %v2076_v14 = vld [vmem:[%s4465_s0 + $0x110] sm:$0xf0]  ;;  %v2019_v38 = vor.u32 %v2785_v30, %v2018_v29  ;;  %v1986_v4 = vld [vmem:[%s4465_s0 + $0x48] sm:$0xf] }
  0x4f   :  { %1481 = vmatpush.bf16.msra.mxu1 %v2287_v8  ;;  %v2476_v8 = vld [vmem:[%s4465_s0 + $0x430] sm:$0xf0]  ;;  %v2830_v15 = vld [vmem:[%s4465_s0 + $0x204] sm:$0xf]  ;;  %v2079_v27 = vor.u32 %v2798_v13, %v2076_v14  ;;  %v2777_v5 = vld [vmem:[%s4465_s0 + $0x54] sm:$0xf0] }
  0x50   :  { %1462 = vmatpush.bf16.msra.mxu0 %v2159_v7  ;;  %v2051_v7 = vor.u32 %v2793_v61, %v2050_v60  ;;  %v2479_v16 = vor.u32 %v2898_v6, %v2476_v8  ;;  %v2204_v17 = vld [vmem:[%s4465_s0 + $0x210] sm:$0xf0]  ;;  %v2894_v18 = vld [vmem:[%s4465_s0 + $0x404] sm:$0xf]  ;;  %v2162_v61 = vld [vmem:[%s4465_s0 + $0x1a8] sm:$0xf]  ;;  %v1987_v13 = vor.u32 %v2777_v5, %v1986_v4 }
  0x51   :  { %1519 = vmatpush.bf16.msra.mxu3 %v2543_v11  ;;  %1574 = vmatpush.bf16.msrb.mxu2 %v2067_v33  ;;  %v2095_v11 = vor.u32 %v2802_v1, %v2092_v2  ;;  %v2460_v19 = vld [vmem:[%s4465_s0 + $0x410] sm:$0xf0]  ;;  %v2962_v25 = vld [vmem:[%s4465_s0 + $0x624] sm:$0xf]  ;;  %v2207_v28 = vor.u32 %v2830_v15, %v2204_v17  ;;  %v2893_v8 = vld [vmem:[%s4465_s0 + $0x3f4] sm:$0xf0] }
  0x52   :  { %v2732_v26 = vld [vmem:[%s4465_s0 + $0x630] sm:$0xf0]  ;;  %v2463_v31 = vor.u32 %v2894_v18, %v2460_v19  ;;  %v2950_v36 = vld [vmem:[%s4465_s0 + $0x5c4] sm:$0xf]  ;;  %v1970_v14 = vld [vmem:[%s4465_s0 + $0x28] sm:$0xf] }
  0x53   :  { %1482 = vmatpush.bf16.msra.mxu1 %v2271_v22  ;;  %v2700_v22 = vld [vmem:[%s4465_s0 + $0x5f0] sm:$0xf0]  ;;  %v2735_v34 = vor.u32 %v2962_v25, %v2732_v26  ;;  %v2946_v44 = vld [vmem:[%s4465_s0 + $0x5a4] sm:$0xf]  ;;  %v2434_v17 = vld [vmem:[%s4465_s0 + $0x3c8] sm:$0xf] }
  0x54   :  { %1463 = vmatpush.bf16.msra.mxu0 %v2143_v21  ;;  %v2954_v21 = vld [vmem:[%s4465_s0 + $0x5e4] sm:$0xf]  ;;  %v2684_v37 = vld [vmem:[%s4465_s0 + $0x5d0] sm:$0xf0]  ;;  %v2889_v18 = vld [vmem:[%s4465_s0 + $0x3d4] sm:$0xf0] }
  0x55   :  { %1520 = vmatpush.bf16.msra.mxu3 %v2527_v24  ;;  %1575 = vmatpush.bf16.msrb.mxu2 %v2051_v7  ;;  %v2829_v24 = vld [vmem:[%s4465_s0 + $0x1f4] sm:$0xf0]  ;;  %v2703_v32 = vor.u32 %v2954_v21, %v2700_v22  ;;  %v2687_v43 = vor.u32 %v2950_v36, %v2684_v37  ;;  %v2668_v49 = vld [vmem:[%s4465_s0 + $0x5b0] sm:$0xf0]  ;;  %v2958_v54 = vld [vmem:[%s4465_s0 + $0x604] sm:$0xf]  ;;  %v2435_v21 = vor.u32 %v2889_v18, %v2434_v17 }
  0x56   :  { %1416 = vmatmul.bf16.gmra.mxu1 %v3618_v57  ;;  %2745 = vmatmul.msk.bf16.gmra.mxu2 %vm1301_vm0, %v3629_v62  ;;  %v2195_v33 = vor.u32 %v2829_v24, %v2194_v23  ;;  %v2716_v59 = vld [vmem:[%s4465_s0 + $0x610] sm:$0xf0]  ;;  %v2671_v1 = vor.u32 %v2946_v44, %v2668_v49  ;;  %v2942_v2 = vld [vmem:[%s4465_s0 + $0x584] sm:$0xf]  ;;  %v2450_v7 = vld [vmem:[%s4465_s0 + $0x3e8] sm:$0xf] }
  0x57   :  { %1483 = vmatpush.bf16.msra.mxu1 %v2255_v42  ;;  %1397 = vmatmul.bf16.gmra.mxu0 %v3616_v56  ;;  %v2825_v42 = vld [vmem:[%s4465_s0 + $0x1d4] sm:$0xf0]  ;;  %v2652_v6 = vld [vmem:[%s4465_s0 + $0x590] sm:$0xf0]  ;;  %v2451_v9 = vor.u32 %v2893_v8, %v2450_v7  ;;  %v2938_v19 = vld [vmem:[%s4465_s0 + $0x564] sm:$0xf] }
  0x58   :  { %1464 = vmatpush.bf16.msra.mxu0 %v2127_v39  ;;  %1454 = vmatmul.bf16.gmra.mxu3 %v3341_v35  ;;  %v2178_v39 = vld [vmem:[%s4465_s0 + $0x1c8] sm:$0xf]  ;;  %v2655_v15 = vor.u32 %v2942_v2, %v2652_v6  ;;  %v2813_v25 = vld [vmem:[%s4465_s0 + $0x174] sm:$0xf0]  ;;  %v2934_v29 = vld [vmem:[%s4465_s0 + $0x544] sm:$0xf] }
  0x59   :  { %1521 = vmatpush.bf16.msra.mxu3 %v2511_v46  ;;  %1576 = vmatpush.bf16.msrb.mxu2 %v2035_v20  ;;  %v2002_v46 = vld [vmem:[%s4465_s0 + $0x68] sm:$0xf]  ;;  %v2179_v60 = vor.u32 %v2825_v42, %v2178_v39  ;;  %v2636_v20 = vld [vmem:[%s4465_s0 + $0x570] sm:$0xf0]  ;;  %v2809_v39 = vld [vmem:[%s4465_s0 + $0x154] sm:$0xf0] }
  0x5a   :  { %v2418_v22 = vld [vmem:[%s4465_s0 + $0x3a8] sm:$0xf]  ;;  %v2930_v44 = vld [vmem:[%s4465_s0 + $0x524] sm:$0xf]  ;;  %v2881_v49 = vld [vmem:[%s4465_s0 + $0x394] sm:$0xf0] }
  0x5b   :  { %1484 = vmatpush.bf16.msra.mxu1 %v2239_v0  ;;  %v2003_v0 = vor.u32 %v2781_v48, %v2002_v46  ;;  %v2130_v24 = vld [vmem:[%s4465_s0 + $0x168] sm:$0xf]  ;;  %v2588_v4 = vld [vmem:[%s4465_s0 + $0x510] sm:$0xf0]  ;;  %v2917_v7 = vld [vmem:[%s4465_s0 + $0x4b4] sm:$0xf0] }
  0x5c   :  { %1465 = vmatpush.bf16.msra.mxu0 %v2111_v63  ;;  %v2821_v63 = vld [vmem:[%s4465_s0 + $0x1b4] sm:$0xf0]  ;;  %v1954_v30 = vld [vmem:[%s4465_s0 + $0x8] sm:$0xf]  ;;  %v2131_v37 = vor.u32 %v2813_v25, %v2130_v24 }
  0x5d   :  { %1522 = vmatpush.bf16.msra.mxu3 %v2495_v3  ;;  %1577 = vmatpush.bf16.msrb.mxu2 %v2019_v38  ;;  %v2719_v3 = vor.u32 %v2958_v54, %v2716_v59  ;;  %v2163_v10 = vor.u32 %v2821_v63, %v2162_v61  ;;  %v2114_v38 = vld [vmem:[%s4465_s0 + $0x148] sm:$0xf]  ;;  %v2604_v54 = vld [vmem:[%s4465_s0 + $0x530] sm:$0xf0]  ;;  %v2913_v24 = vld [vmem:[%s4465_s0 + $0x494] sm:$0xf0] }
  0x5e   :  { %v2402_v48 = vld [vmem:[%s4465_s0 + $0x388] sm:$0xf]  ;;  %v2115_v61 = vor.u32 %v2809_v39, %v2114_v38  ;;  %v2607_v2 = vor.u32 %v2930_v44, %v2604_v54  ;;  %v2909_v38 = vld [vmem:[%s4465_s0 + $0x474] sm:$0xf0] }
  0x5f   :  { %1485 = vmatpush.bf16.msra.mxu1 %v2223_v12  ;;  %v2817_v12 = vld [vmem:[%s4465_s0 + $0x194] sm:$0xf0]  ;;  %v2562_v59 = vld [vmem:[%s4465_s0 + $0x4c8] sm:$0xf] }
  0x60   :  { %1466 = vmatpush.bf16.msra.mxu0 %v2095_v11  ;;  %v2146_v11 = vld [vmem:[%s4465_s0 + $0x188] sm:$0xf] }
  0x61   :  { %1523 = vmatpush.bf16.msra.mxu3 %v2479_v16  ;;  %1578 = vmatpush.bf16.msrb.mxu2 %v2003_v0  ;;  %v2773_v16 = vld [vmem:[%s4465_s0 + $0x34] sm:$0xf0]  ;;  %v2147_v23 = vor.u32 %v2817_v12, %v2146_v11  ;;  %v2098_v63 = vld [vmem:[%s4465_s0 + $0x128] sm:$0xf] }
  0x62   :  { %v1971_v26 = vor.u32 %v2773_v16, %v1970_v14  ;;  %v2805_v0 = vld [vmem:[%s4465_s0 + $0x134] sm:$0xf0]  ;;  %v2546_v6 = vld [vmem:[%s4465_s0 + $0x4a8] sm:$0xf] }
  0x63   :  { %1486 = vmatpush.bf16.msra.mxu1 %v2207_v28  ;;  %v2639_v28 = vor.u32 %v2938_v19, %v2636_v20  ;;  %v2386_v8 = vld [vmem:[%s4465_s0 + $0x368] sm:$0xf]  ;;  %v2861_v11 = vld [vmem:[%s4465_s0 + $0x2f4] sm:$0xf0]  ;;  %v2099_v12 = vor.u32 %v2805_v0, %v2098_v63  ;;  %v2547_v18 = vor.u32 %v2917_v7, %v2546_v6  ;;  %v2795_v7 = vld [vmem:[%s4465_s0 + $0xec] sm:$0xf] }
  0x64   :  { %1467 = vmatpush.bf16.msra.mxu0 %v2079_v27  ;;  %v2885_v27 = vld [vmem:[%s4465_s0 + $0x3b4] sm:$0xf0]  ;;  %v2706_v17 = vld [vmem:[%s4465_s0 + $0x5e8] sm:$0xf] }
  0x65   :  { %1524 = vmatpush.bf16.msra.mxu3 %v2463_v31  ;;  %1579 = vmatpush.bf16.msrb.mxu2 %v1987_v13  ;;  %v2769_v31 = vld [vmem:[%s4465_s0 + $0x14] sm:$0xf0]  ;;  %v2419_v36 = vor.u32 %v2885_v27, %v2418_v22  ;;  %v2082_v13 = vld [vmem:[%s4465_s0 + $0x108] sm:$0xf] }
  0x66   :  { %1487 = vmatmul.bf16.vlgmr.msra.gmra.mxu1 %v3234_v52  ;;  %1506 = vmatmul.bf16.vlgmr.msra.gmra.mxu2 %v3242_v55  ;;  %v1955_v42 = vor.u32 %v2769_v31, %v1954_v30  ;;  %v2801_v14 = vld [vmem:[%s4465_s0 + $0x114] sm:$0xf0]  ;;  %v2370_v19 = vld [vmem:[%s4465_s0 + $0x348] sm:$0xf] }
  0x67   :  { %1561 = vmatpush.bf16.msrb.mxu1 %v2735_v34  ;;  %1468 = vmatmul.bf16.vlgmr.msra.gmra.mxu0 %v3232_v51  ;;  %v2925_v34 = vld [vmem:[%s4465_s0 + $0x4f4] sm:$0xf0]  ;;  %v2306_v25 = vld [vmem:[%s4465_s0 + $0x2c8] sm:$0xf]  ;;  %v2083_v27 = vor.u32 %v2801_v14, %v2082_v13 }
  0x68   :  { %1536 = vmatpush.bf16.msrb.mxu0 %v2703_v32  ;;  %1525 = vmatmul.bf16.vlgmr.msra.gmra.mxu3 %v3491_v50  ;;  %v2620_v32 = vld [vmem:[%s4465_s0 + $0x550] sm:$0xf0]  ;;  %v2873_v20 = vld [vmem:[%s4465_s0 + $0x354] sm:$0xf0]  ;;  %v2690_v30 = vld [vmem:[%s4465_s0 + $0x5c8] sm:$0xf] }
  0x69   :  { %1593 = vmatpush.bf16.msrb.mxu3 %v2195_v33  ;;  %v2578_v33 = vld [vmem:[%s4465_s0 + $0x4e8] sm:$0xf]  ;;  %1580 = vmatpush.bf16.msrb.mxu2 %v1971_v26  ;;  %v2957_v22 = vld [vmem:[%s4465_s0 + $0x5f4] sm:$0xf0] }
  0x6a   :  { %v2579_v46 = vor.u32 %v2925_v34, %v2578_v33  ;;  %v2857_v26 = vld [vmem:[%s4465_s0 + $0x2d4] sm:$0xf0]  ;;  %v2290_v39 = vld [vmem:[%s4465_s0 + $0x2a8] sm:$0xf] }
  0x6b   :  { %1562 = vmatpush.bf16.msrb.mxu1 %v2719_v3  ;;  %v2926_v3 = vld [vmem:[%s4465_s0 + $0x504] sm:$0xf]  ;;  %v2869_v33 = vld [vmem:[%s4465_s0 + $0x334] sm:$0xf0]  ;;  %v2307_v34 = vor.u32 %v2857_v26, %v2306_v25  ;;  %v2338_v54 = vld [vmem:[%s4465_s0 + $0x308] sm:$0xf] }
  0x6c   :  { %1537 = vmatpush.bf16.msrb.mxu0 %v2687_v43  ;;  %v2623_v43 = vor.u32 %v2934_v29, %v2620_v32  ;;  %v2591_v16 = vor.u32 %v2926_v3, %v2588_v4  ;;  %v2707_v29 = vor.u32 %v2957_v22, %v2706_v17  ;;  %v2354_v32 = vld [vmem:[%s4465_s0 + $0x328] sm:$0xf]  ;;  %v2845_v14 = vld [vmem:[%s4465_s0 + $0x274] sm:$0xf0]  ;;  %v2052_v22 = vld [vmem:[%s4465_s0 + $0xd8] sm:$0xf0] }
  0x6d   :  { %1594 = vmatpush.bf16.msrb.mxu3 %v2179_v60  ;;  %v2921_v60 = vld [vmem:[%s4465_s0 + $0x4d4] sm:$0xf0]  ;;  %1581 = vmatpush.bf16.msrb.mxu2 %v1955_v42  ;;  %v2274_v0 = vld [vmem:[%s4465_s0 + $0x288] sm:$0xf] }
  0x6e   :  { %v2563_v5 = vor.u32 %v2921_v60, %v2562_v59  ;;  %v2853_v42 = vld [vmem:[%s4465_s0 + $0x2b4] sm:$0xf0]  ;;  %v2498_v59 = vld [vmem:[%s4465_s0 + $0x448] sm:$0xf] }
  0x6f   :  { %1631 = vmatpush.bf16.msra.mxu1 %v2451_v9  ;;  %v2877_v9 = vld [vmem:[%s4465_s0 + $0x374] sm:$0xf0]  ;;  %v2291_v63 = vor.u32 %v2853_v42, %v2290_v39  ;;  %v2658_v4 = vld [vmem:[%s4465_s0 + $0x588] sm:$0xf] }
  0x70   :  { %1538 = vmatpush.bf16.msrb.mxu0 %v2671_v1  ;;  %v2403_v1 = vor.u32 %v2881_v49, %v2402_v48  ;;  %v2949_v48 = vld [vmem:[%s4465_s0 + $0x5b4] sm:$0xf0]  ;;  %v2258_v13 = vld [vmem:[%s4465_s0 + $0x268] sm:$0xf] }
  0x71   :  { %1595 = vmatpush.bf16.msrb.mxu3 %v2163_v10  ;;  %1650 = vmatpush.bf16.msra.mxu2 %v2579_v46  ;;  %v2322_v10 = vld [vmem:[%s4465_s0 + $0x2e8] sm:$0xf]  ;;  %v2905_v60 = vld [vmem:[%s4465_s0 + $0x454] sm:$0xf0]  ;;  %v2259_v26 = vor.u32 %v2845_v14, %v2258_v13 }
  0x72   :  { %v2674_v46 = vld [vmem:[%s4465_s0 + $0x5a8] sm:$0xf]  ;;  %v2499_v6 = vor.u32 %v2905_v60, %v2498_v59  ;;  %v2941_v17 = vld [vmem:[%s4465_s0 + $0x574] sm:$0xf0]  ;;  %v2020_v59 = vld [vmem:[%s4465_s0 + $0x98] sm:$0xf0] }
  0x73   :  { %1632 = vmatpush.bf16.msra.mxu1 %v2435_v21  ;;  %v2323_v21 = vor.u32 %v2861_v11, %v2322_v10  ;;  %v2675_v3 = vor.u32 %v2949_v48, %v2674_v46  ;;  %v2068_v10 = vld [vmem:[%s4465_s0 + $0xf8] sm:$0xf0]  ;;  %v2226_v39 = vld [vmem:[%s4465_s0 + $0x228] sm:$0xf]  ;;  %v2837_v42 = vld [vmem:[%s4465_s0 + $0x234] sm:$0xf0] }
  0x74   :  { %1539 = vmatpush.bf16.msrb.mxu0 %v2655_v15  ;;  %v2387_v15 = vor.u32 %v2877_v9, %v2386_v8  ;;  %v2482_v8 = vld [vmem:[%s4465_s0 + $0x428] sm:$0xf]  ;;  %v2901_v9 = vld [vmem:[%s4465_s0 + $0x434] sm:$0xf0]  ;;  %v2071_v11 = vor.u32 %v2795_v7, %v2068_v10  ;;  %v2823_v46 = vld [vmem:[%s4465_s0 + $0x1cc] sm:$0xf]  ;;  %v2227_v60 = vor.u32 %v2837_v42, %v2226_v39 }
  0x75   :  { %1596 = vmatpush.bf16.msrb.mxu3 %v2147_v23  ;;  %1651 = vmatpush.bf16.msra.mxu2 %v2563_v5  ;;  %v2530_v23 = vld [vmem:[%s4465_s0 + $0x488] sm:$0xf]  ;;  %v2945_v5 = vld [vmem:[%s4465_s0 + $0x594] sm:$0xf0]  ;;  %v2180_v48 = vld [vmem:[%s4465_s0 + $0x1d8] sm:$0xf0] }
  0x76   :  { %1492 = vmatmul.bf16.gmra.mxu1 %v3354_v41  ;;  %1511 = vmatmul.bf16.gmra.mxu2 %v3362_v45  ;;  %v2531_v31 = vor.u32 %v2913_v24, %v2530_v23  ;;  %v2827_v23 = vld [vmem:[%s4465_s0 + $0x1ec] sm:$0xf]  ;;  %v2196_v24 = vld [vmem:[%s4465_s0 + $0x1f8] sm:$0xf0] }
  0x77   :  { %1633 = vmatpush.bf16.msra.mxu1 %v2419_v36  ;;  %1473 = vmatmul.bf16.gmra.mxu0 %v3352_v40  ;;  %v2953_v36 = vld [vmem:[%s4465_s0 + $0x5d4] sm:$0xf0]  ;;  %v2859_v7 = vld [vmem:[%s4465_s0 + $0x2ec] sm:$0xf]  ;;  %v2324_v10 = vld [vmem:[%s4465_s0 + $0x2f8] sm:$0xf0] }
  0x78   :  { %1540 = vmatpush.bf16.msrb.mxu0 %v2639_v28  ;;  %1530 = vmatmul.bf16.gmra.mxu3 %v3616_v56  ;;  %v2371_v28 = vor.u32 %v2873_v20, %v2370_v19  ;;  %v2691_v44 = vor.u32 %v2953_v36, %v2690_v30  ;;  %v2791_v19 = vld [vmem:[%s4465_s0 + $0xcc] sm:$0xf]  ;;  %v2466_v20 = vld [vmem:[%s4465_s0 + $0x408] sm:$0xf]  ;;  %v2841_v30 = vld [vmem:[%s4465_s0 + $0x254] sm:$0xf0]  ;;  %v2199_v36 = vor.u32 %v2827_v23, %v2196_v24 }
  0x79   :  { %1597 = vmatpush.bf16.msrb.mxu3 %v2131_v37  ;;  %1652 = vmatpush.bf16.msra.mxu2 %v2547_v18  ;;  %v2514_v37 = vld [vmem:[%s4465_s0 + $0x468] sm:$0xf]  ;;  %v2483_v18 = vor.u32 %v2901_v9, %v2482_v8  ;;  %v2055_v25 = vor.u32 %v2791_v19, %v2052_v22  ;;  %v2965_v9 = vld [vmem:[%s4465_s0 + $0x634] sm:$0xf0]  ;;  %v2327_v19 = vor.u32 %v2859_v7, %v2324_v10  ;;  %v2308_v24 = vld [vmem:[%s4465_s0 + $0x2d8] sm:$0xf0] }
  0x7a   :  { %v2515_v49 = vor.u32 %v2909_v38, %v2514_v37  ;;  %v2738_v8 = vld [vmem:[%s4465_s0 + $0x628] sm:$0xf]  ;;  %v2961_v23 = vld [vmem:[%s4465_s0 + $0x614] sm:$0xf0]  ;;  %v2771_v42 = vld [vmem:[%s4465_s0 + $0x2c] sm:$0xf] }
  0x7b   :  { %1634 = vmatpush.bf16.msra.mxu1 %v2403_v1  ;;  %v2849_v1 = vld [vmem:[%s4465_s0 + $0x294] sm:$0xf0]  ;;  %v2722_v22 = vld [vmem:[%s4465_s0 + $0x608] sm:$0xf] }
  0x7c   :  { %1541 = vmatpush.bf16.msrb.mxu0 %v2623_v43  ;;  %v2355_v43 = vor.u32 %v2869_v33, %v2354_v32  ;;  %v2036_v32 = vld [vmem:[%s4465_s0 + $0xb8] sm:$0xf0]  ;;  %v2626_v33 = vld [vmem:[%s4465_s0 + $0x548] sm:$0xf] }
  0x7d   :  { %1598 = vmatpush.bf16.msrb.mxu3 %v2115_v61  ;;  %1653 = vmatpush.bf16.msra.mxu2 %v2531_v31  ;;  %v2865_v61 = vld [vmem:[%s4465_s0 + $0x314] sm:$0xf0] }
  0x7f   :  { %1635 = vmatpush.bf16.msra.mxu1 %v2387_v15  ;;  %v2659_v15 = vor.u32 %v2945_v5, %v2658_v4  ;;  %v2819_v4 = vld [vmem:[%s4465_s0 + $0x1ac] sm:$0xf]  ;;  %v2164_v5 = vld [vmem:[%s4465_s0 + $0x1b8] sm:$0xf0] }
  0x80   :  { %1542 = vmatpush.bf16.msrb.mxu0 %v2607_v2  ;;  %v2339_v2 = vor.u32 %v2865_v61, %v2338_v54  ;;  %v2783_v54 = vld [vmem:[%s4465_s0 + $0x8c] sm:$0xf]  ;;  %v2210_v61 = vld [vmem:[%s4465_s0 + $0x208] sm:$0xf]  ;;  %v2167_v14 = vor.u32 %v2819_v4, %v2164_v5 }
  0x81   :  { %1599 = vmatpush.bf16.msrb.mxu3 %v2099_v12  ;;  %1654 = vmatpush.bf16.msra.mxu2 %v2515_v49  ;;  %v2275_v12 = vor.u32 %v2849_v1, %v2274_v0  ;;  %v2933_v49 = vld [vmem:[%s4465_s0 + $0x534] sm:$0xf0]  ;;  %v2594_v0 = vld [vmem:[%s4465_s0 + $0x508] sm:$0xf]  ;;  %v2183_v1 = vor.u32 %v2823_v46, %v2180_v48  ;;  %v2923_v5 = vld [vmem:[%s4465_s0 + $0x4ec] sm:$0xf] }
  0x83   :  { %1636 = vmatpush.bf16.msra.mxu1 %v2371_v28 }
  0x84   :  { %1543 = vmatpush.bf16.msrb.mxu0 %v2591_v16  ;;  %v2642_v16 = vld [vmem:[%s4465_s0 + $0x568] sm:$0xf] }
  0x85   :  { %1600 = vmatpush.bf16.msrb.mxu3 %v2083_v27  ;;  %1655 = vmatpush.bf16.msra.mxu2 %v2499_v6  ;;  %v2787_v27 = vld [vmem:[%s4465_s0 + $0xac] sm:$0xf]  ;;  %v2643_v28 = vor.u32 %v2941_v17, %v2642_v16  ;;  %v2023_v6 = vor.u32 %v2783_v54, %v2020_v59  ;;  %v2739_v16 = vor.u32 %v2965_v9, %v2738_v8  ;;  %v2276_v54 = vld [vmem:[%s4465_s0 + $0x298] sm:$0xf0] }
  0x86   :  { %2746 = vmatmul.msk.bf16.vlgmr.msrb.gmra.mxu1 %vm1301_vm0, %v3504_v58  ;;  %1582 = vmatmul.bf16.vlgmr.msrb.gmra.mxu2 %v3224_v47  ;;  %v2039_v37 = vor.u32 %v2787_v27, %v2036_v32  ;;  %v2815_v17 = vld [vmem:[%s4465_s0 + $0x18c] sm:$0xf]  ;;  %v2260_v9 = vld [vmem:[%s4465_s0 + $0x278] sm:$0xf0] }
  0x87   :  { %1637 = vmatpush.bf16.msra.mxu1 %v2355_v43  ;;  %1544 = vmatmul.bf16.vlgmr.msrb.gmra.mxu0 %v3493_v53  ;;  %v2843_v8 = vld [vmem:[%s4465_s0 + $0x26c] sm:$0xf] }
  0x88   :  { %1612 = vmatpush.bf16.msra.mxu0 %v2323_v21  ;;  %1601 = vmatmul.bf16.vlgmr.msrb.gmra.mxu3 %v3232_v51  ;;  %v2897_v21 = vld [vmem:[%s4465_s0 + $0x414] sm:$0xf0] }
  0x89   :  { %1669 = vmatpush.bf16.msra.mxu3 %v2707_v29  ;;  %v2242_v29 = vld [vmem:[%s4465_s0 + $0x248] sm:$0xf]  ;;  %1656 = vmatpush.bf16.msra.mxu2 %v2483_v18  ;;  %v2467_v31 = vor.u32 %v2897_v21, %v2466_v20  ;;  %v2148_v18 = vld [vmem:[%s4465_s0 + $0x198] sm:$0xf0]  ;;  %v2855_v20 = vld [vmem:[%s4465_s0 + $0x2cc] sm:$0xf] }
  0x8a   :  { %v2243_v38 = vor.u32 %v2841_v30, %v2242_v29  ;;  %v2151_v27 = vor.u32 %v2815_v17, %v2148_v18  ;;  %v2132_v29 = vld [vmem:[%s4465_s0 + $0x178] sm:$0xf0]  ;;  %v2723_v30 = vor.u32 %v2961_v23, %v2722_v22 }
  0x8b   :  { %1638 = vmatpush.bf16.msra.mxu1 %v2339_v2  ;;  %v2436_v22 = vld [vmem:[%s4465_s0 + $0x3d8] sm:$0xf0] }
  0x8c   :  { %1613 = vmatpush.bf16.msra.mxu0 %v2307_v34  ;;  %v2937_v34 = vld [vmem:[%s4465_s0 + $0x554] sm:$0xf0] }
  0x8d   :  { %1670 = vmatpush.bf16.msra.mxu3 %v2691_v44  ;;  %v2627_v43 = vor.u32 %v2937_v34, %v2626_v33  ;;  %v2610_v44 = vld [vmem:[%s4465_s0 + $0x528] sm:$0xf]  ;;  %1657 = vmatpush.bf16.msra.mxu2 %v2467_v31  ;;  %v2311_v31 = vor.u32 %v2855_v20, %v2308_v24  ;;  %v2851_v33 = vld [vmem:[%s4465_s0 + $0x2ac] sm:$0xf]  ;;  %v2708_v20 = vld [vmem:[%s4465_s0 + $0x5f8] sm:$0xf0]  ;;  %v2263_v24 = vor.u32 %v2843_v8, %v2260_v9 }
  0x8e   :  { %v2611_v2 = vor.u32 %v2933_v49, %v2610_v44  ;;  %v2847_v49 = vld [vmem:[%s4465_s0 + $0x28c] sm:$0xf] }
  0x8f   :  { %1707 = vmatpush.bf16.msrb.mxu1 %v2071_v11  ;;  %v2779_v11 = vld [vmem:[%s4465_s0 + $0x6c] sm:$0xf]  ;;  %v2279_v7 = vor.u32 %v2847_v49, %v2276_v54 }
  0x90   :  { %1614 = vmatpush.bf16.msra.mxu0 %v2291_v63  ;;  %v2833_v63 = vld [vmem:[%s4465_s0 + $0x214] sm:$0xf0]  ;;  %v2915_v54 = vld [vmem:[%s4465_s0 + $0x4ac] sm:$0xf] }
  0x91   :  { %1671 = vmatpush.bf16.msra.mxu3 %v2675_v3  ;;  %1726 = vmatpush.bf16.msrb.mxu2 %v2199_v36  ;;  %v2929_v3 = vld [vmem:[%s4465_s0 + $0x514] sm:$0xf0]  ;;  %v2211_v13 = vor.u32 %v2833_v63, %v2210_v61  ;;  %v2292_v36 = vld [vmem:[%s4465_s0 + $0x2b8] sm:$0xf0] }
  0x92   :  { %v2295_v48 = vor.u32 %v2851_v33, %v2292_v36  ;;  %v2100_v61 = vld [vmem:[%s4465_s0 + $0x138] sm:$0xf0]  ;;  %v2951_v36 = vld [vmem:[%s4465_s0 + $0x5cc] sm:$0xf] }
  0x93   :  { %1708 = vmatpush.bf16.msrb.mxu1 %v2055_v25  ;;  %v2775_v25 = vld [vmem:[%s4465_s0 + $0x4c] sm:$0xf] }
  0x94   :  { %1615 = vmatpush.bf16.msra.mxu0 %v2275_v12  ;;  %v2004_v12 = vld [vmem:[%s4465_s0 + $0x78] sm:$0xf0] }
  0x95   :  { %1672 = vmatpush.bf16.msra.mxu3 %v2659_v15  ;;  %1727 = vmatpush.bf16.msrb.mxu2 %v2183_v1  ;;  %v2595_v15 = vor.u32 %v2929_v3, %v2594_v0  ;;  %v2007_v21 = vor.u32 %v2779_v11, %v2004_v12  ;;  %v2891_v0 = vld [vmem:[%s4465_s0 + $0x3ec] sm:$0xf]  ;;  %v2452_v3 = vld [vmem:[%s4465_s0 + $0x3f8] sm:$0xf0] }
  0x96   :  { %2747 = vmatmul.msk.bf16.gmra.mxu1 %vm1301_vm0, %v3629_v62  ;;  %1587 = vmatmul.bf16.gmra.mxu2 %v3341_v35  ;;  %v2767_v1 = vld [vmem:[%s4465_s0 + $0xc] sm:$0xf]  ;;  %v2455_v4 = vor.u32 %v2891_v0, %v2452_v3  ;;  %v2404_v3 = vld [vmem:[%s4465_s0 + $0x398] sm:$0xf0] }
  0x97   :  { %1709 = vmatpush.bf16.msrb.mxu1 %v2039_v37  ;;  %1549 = vmatmul.bf16.gmra.mxu0 %v3618_v57  ;;  %v2807_v37 = vld [vmem:[%s4465_s0 + $0x14c] sm:$0xf] }
  0x98   :  { %1616 = vmatpush.bf16.msra.mxu0 %v2259_v26  ;;  %1606 = vmatmul.bf16.gmra.mxu3 %v3352_v40  ;;  %v1988_v26 = vld [vmem:[%s4465_s0 + $0x58] sm:$0xf0]  ;;  %v2799_v12 = vld [vmem:[%s4465_s0 + $0x10c] sm:$0xf] }
  0x99   :  { %1673 = vmatpush.bf16.msra.mxu3 %v2643_v28  ;;  %1728 = vmatpush.bf16.msrb.mxu2 %v2167_v14  ;;  %v2811_v28 = vld [vmem:[%s4465_s0 + $0x16c] sm:$0xf]  ;;  %v1991_v32 = vor.u32 %v2775_v25, %v1988_v26 }
  0x9a   :  { %v2135_v34 = vor.u32 %v2811_v28, %v2132_v29  ;;  %v2919_v26 = vld [vmem:[%s4465_s0 + $0x4cc] sm:$0xf] }
  0x9b   :  { %1710 = vmatpush.bf16.msrb.mxu1 %v2023_v6  ;;  %v2580_v6 = vld [vmem:[%s4465_s0 + $0x4f8] sm:$0xf0] }
  0x9c   :  { %1617 = vmatpush.bf16.msra.mxu0 %v2243_v38  ;;  %v2116_v38 = vld [vmem:[%s4465_s0 + $0x158] sm:$0xf0] }
  0x9d   :  { %1674 = vmatpush.bf16.msra.mxu3 %v2627_v43  ;;  %1729 = vmatpush.bf16.msrb.mxu2 %v2151_v27  ;;  %v1972_v43 = vld [vmem:[%s4465_s0 + $0x38] sm:$0xf0]  ;;  %v2119_v59 = vor.u32 %v2807_v37, %v2116_v38 }
  0x9e   :  { %v1975_v63 = vor.u32 %v2771_v42, %v1972_v43  ;;  %v2564_v27 = vld [vmem:[%s4465_s0 + $0x4d8] sm:$0xf0] }
  0x9f   :  { %1711 = vmatpush.bf16.msrb.mxu1 %v2007_v21  ;;  %v2583_v21 = vor.u32 %v2923_v5, %v2580_v6  ;;  %v2692_v37 = vld [vmem:[%s4465_s0 + $0x5d8] sm:$0xf0]  ;;  %v2567_v38 = vor.u32 %v2919_v26, %v2564_v27  ;;  %v2831_v5 = vld [vmem:[%s4465_s0 + $0x20c] sm:$0xf] }
  0xa0   :  { %1618 = vmatpush.bf16.msra.mxu0 %v2227_v60  ;;  %v2803_v60 = vld [vmem:[%s4465_s0 + $0x12c] sm:$0xf]  ;;  %v2695_v49 = vor.u32 %v2951_v36, %v2692_v37 }
  0xa1   :  { %1675 = vmatpush.bf16.msra.mxu3 %v2611_v2  ;;  %v1317_v39 = vpop.f32.mrf.mxu0  ;;  %1730 = vmatpush.bf16.msrb.mxu2 %v2135_v34  ;;  %v1956_v2 = vld [vmem:[%s4465_s0 + $0x18] sm:$0xf0]  ;;  %v2103_v10 = vor.u32 %v2803_v60, %v2100_v61  ;;  %v2883_v34 = vld [vmem:[%s4465_s0 + $0x3ac] sm:$0xf] }
  0xa2   :  { %v1959_v14 = vor.u32 %v2767_v1, %v1956_v2  ;;  %v2879_v60 = vld [vmem:[%s4465_s0 + $0x38c] sm:$0xf]  ;;  %v2676_v2 = vld [vmem:[%s4465_s0 + $0x5b8] sm:$0xf0] }
  0xa3   :  { %1712 = vmatpush.bf16.msrb.mxu1 %v1991_v32  ;;  %v1336_v44 = vpop.f32.mrf.mxu1  ;;  %v2244_v32 = vld [vmem:[%s4465_s0 + $0x258] sm:$0xf0]  ;;  %v2947_v1 = vld [vmem:[%s4465_s0 + $0x5ac] sm:$0xf]  ;;  %v2407_v6 = vor.u32 %v2879_v60, %v2404_v3 }
  0xa4   :  { %1619 = vmatpush.bf16.msra.mxu0 %v2211_v13  ;;  %v1337_v46 = vadd.f32 %v1336_v44, %v1317_v39  ;;  %v2084_v13 = vld [vmem:[%s4465_s0 + $0x118] sm:$0xf0]  ;;  %v2835_v44 = vld [vmem:[%s4465_s0 + $0x22c] sm:$0xf] }
  0xa5   :  { %1676 = vmatpush.bf16.msra.mxu3 %v2595_v15  ;;  %1731 = vmatpush.bf16.msrb.mxu2 %v2119_v59  ;;  %v2887_v15 = vld [vmem:[%s4465_s0 + $0x3cc] sm:$0xf]  ;;  %v2420_v39 = vld [vmem:[%s4465_s0 + $0x3b8] sm:$0xf0] }
  0xa6   :  { %1639 = vmatmul.bf16.vlgmr.msra.gmra.mxu1 %v3242_v55  ;;  %1658 = vmatmul.bf16.vlgmr.msra.gmra.mxu2 %v3491_v50  ;;  %v2439_v25 = vor.u32 %v2887_v15, %v2436_v22  ;;  %v2423_v42 = vor.u32 %v2883_v34, %v2420_v39  ;;  %v2548_v59 = vld [vmem:[%s4465_s0 + $0x4b8] sm:$0xf0]  ;;  %v2911_v15 = vld [vmem:[%s4465_s0 + $0x48c] sm:$0xf] }
  0xa7   :  { %1620 = vmatmul.bf16.vlgmr.msra.gmra.mxu0 %v3234_v52  ;;  %1713 = vmatpush.bf16.msrb.mxu1 %v1975_v63  ;;  %v2959_v37 = vld [vmem:[%s4465_s0 + $0x60c] sm:$0xf]  ;;  %v2372_v39 = vld [vmem:[%s4465_s0 + $0x358] sm:$0xf0] }
  0xa8   :  { %1694 = vmatpush.bf16.msrb.mxu0 %v2739_v16  ;;  %1677 = vmatmul.bf16.vlgmr.msra.gmra.mxu3 %v3493_v53  ;;  %v1355_v11 = vpop.f32.mrf.mxu2  ;;  %v2500_v60 = vld [vmem:[%s4465_s0 + $0x458] sm:$0xf0] }
  0xa9   :  { %1745 = vmatpush.bf16.msrb.mxu3 %v2327_v19  ;;  %v1356_v16 = vadd.f32 %v1355_v11, %v1337_v46  ;;  %v1319_v18 = vpop.f32.mrf.mxu0  ;;  %v2955_v19 = vld [vmem:[%s4465_s0 + $0x5ec] sm:$0xf]  ;;  %1732 = vmatpush.bf16.msrb.mxu2 %v2103_v10  ;;  %v2228_v46 = vld [vmem:[%s4465_s0 + $0x238] sm:$0xf0] }
  0xaa   :  { %v1374_v17 = vpop.f32.mrf.mxu3  ;;  %v2711_v33 = vor.u32 %v2955_v19, %v2708_v20  ;;  %v2231_v9 = vor.u32 %v2835_v44, %v2228_v46  ;;  %v2212_v10 = vld [vmem:[%s4465_s0 + $0x218] sm:$0xf0]  ;;  %v2963_v11 = vld [vmem:[%s4465_s0 + $0x62c] sm:$0xf] }
  0xab   :  { %v1338_v23 = vpop.f32.mrf.mxu1  ;;  %v4198_v28 = vadd.f32 %v1374_v17, %v1356_v16  ;;  %1714 = vmatpush.bf16.msrb.mxu1 %v1959_v14  ;;  %v2679_v14 = vor.u32 %v2947_v1, %v2676_v2  ;;  %v2532_v16 = vld [vmem:[%s4465_s0 + $0x498] sm:$0xf0]  ;;  %v2875_v17 = vld [vmem:[%s4465_s0 + $0x36c] sm:$0xf]  ;;  %v2215_v22 = vor.u32 %v2831_v5, %v2212_v10 }
  0xac   :  { %1695 = vmatpush.bf16.msrb.mxu0 %v2723_v30  ;;  %v1339_v29 = vadd.f32 %v1338_v23, %v1319_v18  ;;  %v2087_v30 = vor.u32 %v2799_v12, %v2084_v13  ;;  %v2740_v12 = vld [vmem:[%s4465_s0 + $0x638] sm:$0xf0]  ;;  %v2551_v13 = vor.u32 %v2915_v54, %v2548_v59  ;;  %v2943_v18 = vld [vmem:[%s4465_s0 + $0x58c] sm:$0xf]  ;;  %v2535_v23 = vor.u32 %v2911_v15, %v2532_v16 }
  0xad   :  { %1746 = vmatpush.bf16.msrb.mxu3 %v2311_v31  ;;  %v2839_v31 = vld [vmem:[%s4465_s0 + $0x24c] sm:$0xf]  ;;  %v2660_v19 = vld [vmem:[%s4465_s0 + $0x598] sm:$0xf0]  ;;  %v2743_v27 = vor.u32 %v2963_v11, %v2740_v12 }
  0xae   :  { %v2247_v43 = vor.u32 %v2839_v31, %v2244_v32  ;;  %1733 = vmatpush.bf16.msrb.mxu2 %v2087_v30  ;;  %v2388_v20 = vld [vmem:[%s4465_s0 + $0x378] sm:$0xf0]  ;;  %v2907_v30 = vld [vmem:[%s4465_s0 + $0x46c] sm:$0xf] }
  0xaf   :  { %1783 = vmatpush.bf16.msra.mxu1 %v2583_v21  ;;  %v2391_v21 = vor.u32 %v2875_v17, %v2388_v20  ;;  %v2516_v31 = vld [vmem:[%s4465_s0 + $0x478] sm:$0xf0]  ;;  %v2871_v32 = vld [vmem:[%s4465_s0 + $0x34c] sm:$0xf] }
  0xb0   :  { %1764 = vmatpush.bf16.msra.mxu0 %v2455_v4  ;;  %v2903_v59 = vld [vmem:[%s4465_s0 + $0x44c] sm:$0xf]  ;;  %v2356_v1 = vld [vmem:[%s4465_s0 + $0x338] sm:$0xf0] }
  0xb1   :  { %1747 = vmatpush.bf16.msrb.mxu3 %v2295_v48  ;;  %v1357_v48 = vpop.f32.mrf.mxu2  ;;  %v2503_v3 = vor.u32 %v2903_v59, %v2500_v60  ;;  %v2931_v12 = vld [vmem:[%s4465_s0 + $0x52c] sm:$0xf]  ;;  %v2969_v60 = vmov 0  }
  0xb2   :  { %1802 = vmatpush.bf16.msra.mxu2 %v2711_v33  ;;  %v1358_v61 = vadd.f32 %v1357_v48, %v1339_v29  ;;  %v1376_v63 = vpop.f32.mrf.mxu3  ;;  %v1322_v0 = vpop.f32.mrf.mxu0  ;;  %v2663_v29 = vor.u32 %v2943_v18, %v2660_v19  ;;  %v2519_v48 = vor.u32 %v2907_v30, %v2516_v31  ;;  %2967 = vset.pattern.permute.xlu0 %v2969_v60 }
  0xb3   :  { %1784 = vmatpush.bf16.msra.mxu1 %v2567_v38  ;;  %v1341_v4 = vpop.f32.mrf.mxu1  ;;  %v2724_v38 = vld [vmem:[%s4465_s0 + $0x618] sm:$0xf0]  ;;  %2968 = vset.pattern.permute.xlu1 %v2969_v60 }
  0xb4   :  { %1765 = vmatpush.bf16.msra.mxu0 %v2439_v25  ;;  %v1342_v8 = vadd.f32 %v1341_v4, %v1322_v0  ;;  %v2644_v25 = vld [vmem:[%s4465_s0 + $0x578] sm:$0xf0]  ;;  %v2727_v54 = vor.u32 %v2959_v37, %v2724_v38 }
  0xb5   :  { %1748 = vmatpush.bf16.msrb.mxu3 %v2279_v7  ;;  %v4245_v7 = vadd.f32 %v1376_v63, %v1358_v61  ;;  %v2867_v61 = vld [vmem:[%s4465_s0 + $0x32c] sm:$0xf]  ;;  %v2628_v0 = vld [vmem:[%s4465_s0 + $0x558] sm:$0xf0] }
  0xb6   :  { %1803 = vmatpush.bf16.msra.mxu2 %v2695_v49  ;;  %1644 = vmatmul.bf16.gmra.mxu1 %v3362_v45  ;;  %v2935_v63 = vld [vmem:[%s4465_s0 + $0x54c] sm:$0xf]  ;;  %v2359_v2 = vor.u32 %v2867_v61, %v2356_v1 }
  0xb7   :  { %1625 = vmatmul.bf16.gmra.mxu0 %v3354_v41  ;;  %1663 = vmatmul.bf16.gmra.mxu2 %v3616_v56  ;;  %v2631_v5 = vor.u32 %v2935_v63, %v2628_v0 }
  0xb8   :  { %1766 = vmatpush.bf16.msra.mxu0 %v2423_v42  ;;  %1682 = vmatmul.bf16.gmra.mxu3 %v3618_v57 }
  0xb9   :  { %1749 = vmatpush.bf16.msrb.mxu3 %v2263_v24  ;;  %1785 = vmatpush.bf16.msra.mxu1 %v2551_v13  ;;  %v2939_v24 = vld [vmem:[%s4465_s0 + $0x56c] sm:$0xf]  ;;  %v1360_v26 = vpop.f32.mrf.mxu2  ;;  %v2612_v13 = vld [vmem:[%s4465_s0 + $0x538] sm:$0xf0] }
  0xba   :  { %1804 = vmatpush.bf16.msra.mxu2 %v2679_v14  ;;  %v1361_v33 = vadd.f32 %v1360_v26, %v1342_v8  ;;  %v1379_v34 = vpop.f32.mrf.mxu3  ;;  %v1324_v36 = vpop.f32.mrf.mxu0  ;;  %v2647_v49 = vor.u32 %v2939_v24, %v2644_v25  ;;  %v2484_v8 = vld [vmem:[%s4465_s0 + $0x438] sm:$0xf0] }
  0xbb   :  { %v1343_v42 = vpop.f32.mrf.mxu1  ;;  %v2340_v14 = vld [vmem:[%s4465_s0 + $0x318] sm:$0xf0] }
  0xbc   :  { %1767 = vmatpush.bf16.msra.mxu0 %v2407_v6  ;;  %v4302_v44 = vadd.f32 %v1379_v34, %v1361_v33  ;;  %v1344_v46 = vadd.f32 %v1343_v42, %v1324_v36  ;;  %v2899_v6 = vld [vmem:[%s4465_s0 + $0x42c] sm:$0xf]  ;;  %v2596_v25 = vld [vmem:[%s4465_s0 + $0x518] sm:$0xf0] }
  0xbd   :  { %1750 = vmatpush.bf16.msrb.mxu3 %v2247_v43  ;;  %v2375_v43 = vor.u32 %v2871_v32, %v2372_v39  ;;  %1786 = vmatpush.bf16.msra.mxu1 %v2535_v23  ;;  %v2487_v19 = vor.u32 %v2899_v6, %v2484_v8  ;;  %v2468_v23 = vld [vmem:[%s4465_s0 + $0x418] sm:$0xf0] }
  0xbe   :  { %1805 = vmatpush.bf16.msra.mxu2 %v2663_v29 }
  0xc0   :  { %1768 = vmatpush.bf16.msra.mxu0 %v2391_v21  ;;  %v2615_v21 = vor.u32 %v2931_v12, %v2612_v13 }
  0xc1   :  { %1751 = vmatpush.bf16.msrb.mxu3 %v2231_v9  ;;  %1787 = vmatpush.bf16.msra.mxu1 %v2519_v48  ;;  %v1362_v4 = vpop.f32.mrf.mxu2  ;;  %v2863_v9 = vld [vmem:[%s4465_s0 + $0x30c] sm:$0xf] }
  0xc2   :  { %1806 = vmatpush.bf16.msra.mxu2 %v2647_v49  ;;  %v1363_v10 = vadd.f32 %v1362_v4, %v1344_v46  ;;  %v1381_v11 = vpop.f32.mrf.mxu3  ;;  %v2343_v20 = vor.u32 %v2863_v9, %v2340_v14 }
  0xc3   :  { %v1412_v16 = vpop.f32.mrf.mxu1 }
  0xc4   :  { %1769 = vmatpush.bf16.msra.mxu0 %v2375_v43  ;;  %v1393_v15 = vpop.f32.mrf.mxu0  ;;  %v1382_v17 = vadd.f32 %v1381_v11, %v1363_v10 }
  0xc5   :  { %1752 = vmatpush.bf16.msrb.mxu3 %v2215_v22  ;;  %v1394_v18 = vadd.f32 %v1393_v15, %v4198_v28  ;;  %1788 = vmatpush.bf16.msra.mxu1 %v2503_v3  ;;  %v2895_v22 = vld [vmem:[%s4465_s0 + $0x40c] sm:$0xf] }
  0xc6   :  { %1807 = vmatpush.bf16.msra.mxu2 %v2631_v5  ;;  %1715 = vmatmul.bf16.vlgmr.msrb.gmra.mxu1 %v3224_v47  ;;  %v2927_v28 = vld [vmem:[%s4465_s0 + $0x50c] sm:$0xf]  ;;  %v2471_v26 = vor.u32 %v2895_v22, %v2468_v23 }
  0xc7   :  { %v1413_v24 = vadd.f32 %v1412_v16, %v1394_v18  ;;  %2748 = vmatmul.msk.bf16.vlgmr.msrb.gmra.mxu0 %vm1301_vm0, %v3504_v58  ;;  %1734 = vmatmul.bf16.vlgmr.msrb.gmra.mxu2 %v3232_v51  ;;  %v1853_v3 = vld [vmem:[%s4467_s2 + $0x8] sm:$0xff] }
  0xc8   :  { %1770 = vmatpush.bf16.msra.mxu0 %v2359_v2  ;;  %1753 = vmatmul.bf16.vlgmr.msrb.gmra.mxu3 %v3234_v52  ;;  %v1854_v2 = vld [vmem:[%s4467_s2 + $0x10] sm:$0xff] }
  0xc9   :  { %1827 = vmatpush.bf16.msra.mxu3 %v2743_v27  ;;  %1789 = vmatpush.bf16.msra.mxu1 %v2487_v19  ;;  %v2599_v27 = vor.u32 %v2927_v28, %v2596_v25  ;;  %v1431_v29 = vpop.f32.mrf.mxu2 }
  0xca   :  { %1808 = vmatpush.bf16.msra.mxu2 %v2615_v21  ;;  %v4358_v47 = vadd.f32 %v1431_v29, %v1413_v24  ;;  %1868 = vperm.xlu1 %2968, %v1854_v2  }
  0xcb   :  { %v1450_v30 = vpop.f32.mrf.mxu3  ;;  %v1414_v32 = vpop.f32.mrf.mxu1 }
  0xcc   :  { %1771 = vmatpush.bf16.msra.mxu0 %v2343_v20  ;;  %v1395_v31 = vpop.f32.mrf.mxu0 }
  0xcd   :  { %1828 = vmatpush.bf16.msra.mxu3 %v2727_v54  ;;  %v1396_v33 = vadd.f32 %v1395_v31, %v4245_v7  ;;  %1790 = vmatpush.bf16.msra.mxu1 %v2471_v26 }
  0xce   :  { %1809 = vmatpush.bf16.msra.mxu2 %v2599_v27 }
  0xcf   :  { %v1415_v34 = vadd.f32 %v1414_v32, %v1396_v33 }
  0xd1   :  { %v1433_v36 = vpop.f32.mrf.mxu2 }
  0xd2   :  { %v4361_v37 = vadd.f32 %v1433_v36, %v1415_v34 }
  0xd3   :  { %v1452_v51 = vpop.f32.mrf.mxu3  ;;  %v1417_v38 = vpop.f32.mrf.mxu1 }
  0xd4   :  { %v1398_v52 = vpop.f32.mrf.mxu0 }
  0xd5   :  { %v1399_v39 = vadd.f32 %v1398_v52, %v4302_v44  ;;  %v1852_v44 = vld [vmem:[%s4467_s2] sm:$0xff] }
  0xd6   :  { %1720 = vmatmul.bf16.gmra.mxu1 %v3341_v35  ;;  %1858 = vperm.xlu0 %2967, %v1852_v44  }
  0xd7   :  { %v1418_v42 = vadd.f32 %v1417_v38, %v1399_v39  ;;  %2749 = vmatmul.msk.bf16.gmra.mxu0 %vm1301_vm0, %v3629_v62  ;;  %1739 = vmatmul.bf16.gmra.mxu2 %v3352_v40 }
  0xd8   :  { %1758 = vmatmul.bf16.gmra.mxu3 %v3354_v41 }
  0xd9   :  { %v1436_v7 = vpop.f32.mrf.mxu2 }
  0xda   :  { %v4369_v46 = vadd.f32 %v1436_v7, %v1418_v42 }
  0xdb   :  { %v1455_v43 = vpop.f32.mrf.mxu3  ;;  %v1419_v49 = vpop.f32.mrf.mxu1 }
  0xdc   :  { %v1400_v48 = vpop.f32.mrf.mxu0 }
  0xdd   :  { %v1401_v54 = vadd.f32 %v1400_v48, %v1382_v17 }
  0xde   :  { %1863 = vperm.xlu0 %2967, %v1853_v3  }
  0xdf   :  { %v1420_v59 = vadd.f32 %v1419_v49, %v1401_v54 }
  0xe1   :  { %v1438_v35 = vpop.f32.mrf.mxu2 }
  0xe2   :  { %v4374_v61 = vadd.f32 %v1438_v35, %v1420_v59 }
  0xe3   :  { %v1457_v40 = vpop.f32.mrf.mxu3  ;;  %v1488_v63 = vpop.f32.mrf.mxu1 }
  0xe4   :  { %v1469_v41 = vpop.f32.mrf.mxu0 }
  0xe5   :  { %v1470_v0 = vadd.f32 %v1469_v41, %v1450_v30 }
  0xe6   :  { %1791 = vmatmul.bf16.vlgmr.msra.gmra.mxu1 %v3491_v50 }
  0xe7   :  { %v1489_v1 = vadd.f32 %v1488_v63, %v1470_v0  ;;  %1772 = vmatmul.bf16.vlgmr.msra.gmra.mxu0 %v3242_v55  ;;  %1810 = vmatmul.bf16.vlgmr.msra.gmra.mxu2 %v3493_v53 }
  0xe8   :  { %2750 = vmatmul.msk.bf16.vlgmr.msra.gmra.mxu3 %vm1301_vm0, %v3504_v58  ;;  %v1855_v58 = vld [vmem:[%s4467_s2 + $0x18] sm:$0xff] }
  0xe9   :  { %v1507_v4 = vpop.f32.mrf.mxu2  ;;  %1873 = vperm.xlu1 %2968, %v1855_v58  }
  0xea   :  { %v1508_v55 = vadd.f32 %v1507_v4, %v1489_v1 }
  0xeb   :  { %v1526_v5 = vpop.f32.mrf.mxu3  ;;  %v1490_v50 = vpop.f32.mrf.mxu1 }
  0xec   :  { %v1471_v6 = vpop.f32.mrf.mxu0  ;;  %v1527_v53 = vadd.f32 %v1526_v5, %v1508_v55 }
  0xed   :  { %v1472_v8 = vadd.f32 %v1471_v6, %v1452_v51 }
  0xef   :  { %v1491_v9 = vadd.f32 %v1490_v50, %v1472_v8 }
  0xf1   :  { %v1509_v10 = vpop.f32.mrf.mxu2 }
  0xf2   :  { %v1510_v12 = vadd.f32 %v1509_v10, %v1491_v9 }
  0xf3   :  { %v1528_v11 = vpop.f32.mrf.mxu3  ;;  %v1493_v14 = vpop.f32.mrf.mxu1 }
  0xf4   :  { %v1474_v13 = vpop.f32.mrf.mxu0  ;;  %v1529_v16 = vadd.f32 %v1528_v11, %v1510_v12 }
  0xf5   :  { %v1475_v15 = vadd.f32 %v1474_v13, %v1455_v43 }
  0xf6   :  { %1796 = vmatmul.bf16.gmra.mxu1 %v3616_v56 }
  0xf7   :  { %v1494_v17 = vadd.f32 %v1493_v14, %v1475_v15  ;;  %1777 = vmatmul.bf16.gmra.mxu0 %v3362_v45  ;;  %1815 = vmatmul.bf16.gmra.mxu2 %v3618_v57 }
  0xf8   :  { %2751 = vmatmul.msk.bf16.gmra.mxu3 %vm1301_vm0, %v3629_v62 }
  0xf9   :  { %v1512_v18 = vpop.f32.mrf.mxu2 }
  0xfa   :  { %v1513_v20 = vadd.f32 %v1512_v18, %v1494_v17 }
  0xfb   :  { %v1531_v19 = vpop.f32.mrf.mxu3  ;;  %v1495_v22 = vpop.f32.mrf.mxu1 }
  0xfc   :  { %v1476_v21 = vpop.f32.mrf.mxu0  ;;  %v1532_v24 = vadd.f32 %v1531_v19, %v1513_v20 }
  0xfd   :  { %v1477_v23 = vadd.f32 %v1476_v21, %v1457_v40 }
  0xff   :  { %v1496_v28 = vadd.f32 %v1495_v22, %v1477_v23 }
 0x101   :  { %v1514_v25 = vpop.f32.mrf.mxu2 }
 0x102   :  { %v1515_v27 = vadd.f32 %v1514_v25, %v1496_v28 }
 0x103   :  { %v1533_v26 = vpop.f32.mrf.mxu3  ;;  %v1564_v45 = vpop.f32.mrf.mxu1 }
 0x104   :  { %v1545_v29 = vpop.f32.mrf.mxu0  ;;  %v1534_v56 = vadd.f32 %v1533_v26, %v1515_v27 }
 0x105   :  { %v1546_v30 = vadd.f32 %v1545_v29, %v1527_v53 }
 0x107   :  { %v4395_v31 = vadd.f32 %v1564_v45, %v1546_v30 }
 0x109   :  { %v1840_v57 = vmax.f32 %v4358_v47, %v4395_v31  ;;  %v1583_v62 = vpop.f32.mrf.mxu2 }
 0x10b   :  { %v1602_v32 = vpop.f32.mrf.mxu3  ;;  %v1566_v36 = vpop.f32.mrf.mxu1 }
 0x10c   :  { %v1603_v33 = vadd.f32 %v1602_v32, %v1583_v62  ;;  %v1547_v34 = vpop.f32.mrf.mxu0 }
 0x10d   :  { %v1548_v51 = vadd.f32 %v1547_v34, %v1529_v16 }
 0x10f   :  { %v4399_v52 = vadd.f32 %v1566_v36, %v1548_v51 }
 0x111   :  { %v1585_v39 = vpop.f32.mrf.mxu2 }
 0x113   :  { %v1604_v42 = vpop.f32.mrf.mxu3  ;;  %v1569_v48 = vpop.f32.mrf.mxu1 }
 0x114   :  { %v1605_v7 = vadd.f32 %v1604_v42, %v1585_v39  ;;  %v1550_v43 = vpop.f32.mrf.mxu0 }
 0x115   :  { %v1551_v49 = vadd.f32 %v1550_v43, %v1532_v24 }
 0x117   :  { %v4403_v54 = vadd.f32 %v1569_v48, %v1551_v49 }
 0x119   :  { %v1588_v44 = vpop.f32.mrf.mxu2 }
 0x11b   :  { %v1607_v60 = vpop.f32.mrf.mxu3  ;;  %v1571_v41 = vpop.f32.mrf.mxu1 }
 0x11c   :  { %v4407_v35 = vadd.f32 %v1607_v60, %v1588_v44  ;;  %v1552_v40 = vpop.f32.mrf.mxu0 }
 0x11d   :  { %v1553_v63 = vadd.f32 %v1552_v40, %v1534_v56 }
 0x11f   :  { %v4409_v0 = vadd.f32 %v1571_v41, %v1553_v63 }
 0x121   :  { %v1590_v2 = vpop.f32.mrf.mxu2 }
 0x123   :  { %v1609_v3 = vpop.f32.mrf.mxu3  ;;  %v1640_v55 = vpop.f32.mrf.mxu1 }
 0x124   :  { %v4413_v4 = vadd.f32 %v1609_v3, %v1590_v2  ;;  %v1621_v5 = vpop.f32.mrf.mxu0 }
 0x125   :  { %v1622_v62 = vadd.f32 %v1621_v5, %v1603_v33 }
 0x127   :  { %v1641_v42 = vadd.f32 %v1640_v55, %v1622_v62 }
 0x129   :  { %v1659_v6 = vpop.f32.mrf.mxu2 }
 0x12a   :  { %v1660_v48 = vadd.f32 %v1659_v6, %v1641_v42 }
 0x12b   :  { %v1678_v50 = vpop.f32.mrf.mxu3  ;;  %v1642_v53 = vpop.f32.mrf.mxu1 }
 0x12c   :  { %v1623_v8 = vpop.f32.mrf.mxu0  ;;  %v1679_v63 = vadd.f32 %v1678_v50, %v1660_v48 }
 0x12d   :  { %v1624_v44 = vadd.f32 %v1623_v8, %v1605_v7 }
 0x131   :  { %v1661_v9 = vpop.f32.mrf.mxu2 }
 0x133   :  { %v1680_v58 = vpop.f32.mrf.mxu3  ;;  %v1645_v11 = vpop.f32.mrf.mxu1 }
 0x134   :  { %v1626_v10 = vpop.f32.mrf.mxu0 }
 0x135   :  { %v1627_v6 = vadd.f32 %v1626_v10, %v4407_v35 }
 0x13a   :  { %v4415_v12 = vpop.f32.mrf.mxu2 }
 0x13b   :  { %v4417_v13 = vpop.f32.mrf.mxu3  ;;  %v4421_v15 = vpop.f32.mrf.mxu1 }
 0x13c   :  { %v4419_v14 = vpop.f32.mrf.mxu0 }
 0x142   :  { %v4423_v16 = vpop.f32.mrf.mxu2 }
 0x143   :  { %v4425_v17 = vpop.f32.mrf.mxu3  ;;  %v1716_v19 = vpop.f32.mrf.mxu1 }
 0x144   :  { %v1697_v18 = vpop.f32.mrf.mxu0 }
 0x145   :  { %v1698_v33 = vadd.f32 %v1697_v18, %v1679_v63 }
 0x14a   :  { %v1735_v20 = vpop.f32.mrf.mxu2 }
 0x14b   :  { %v1754_v21 = vpop.f32.mrf.mxu3  ;;  %v1718_v23 = vpop.f32.mrf.mxu1  ;;  %v1736_v56 = vadd.f32 %v1735_v20, %v1716_v19  ;;  %v1643_v19 = vadd.f32 %v1642_v53, %v1624_v44 }
 0x14c   :  { %v1699_v22 = vpop.f32.mrf.mxu0 }
 0x14d   :  { %v1755_v36 = vadd.f32 %v1754_v21, %v1736_v56  ;;  %v1859_v21 = vpop.permute.xlu0 %1858  ;;  %v1662_v56 = vadd.f32 %v1661_v9, %v1643_v19 }
 0x152   :  { %v1737_v24 = vpop.f32.mrf.mxu2 }
 0x153   :  { %v1756_v28 = vpop.f32.mrf.mxu3  ;;  %v1721_v26 = vpop.f32.mrf.mxu1  ;;  %v1738_v49 = vadd.f32 %v1737_v24, %v1718_v23  ;;  %v1681_v24 = vadd.f32 %v1680_v58, %v1662_v56 }
 0x154   :  { %v4427_v25 = vpop.f32.mrf.mxu0 }
 0x155   :  { %v1757_v2 = vadd.f32 %v1756_v28, %v1738_v49 }
 0x15a   :  { %v1740_v27 = vpop.f32.mrf.mxu2 }
 0x15b   :  { %v1759_v29 = vpop.f32.mrf.mxu3  ;;  %v1723_v30 = vpop.f32.mrf.mxu1  ;;  %v1741_v38 = vadd.f32 %v1740_v27, %v1721_v26 }
 0x15c   :  { %v4429_v45 = vpop.f32.mrf.mxu0 }
 0x15d   :  { %v1760_v28 = vadd.f32 %v1759_v29, %v1741_v38  ;;  %v1629_v38 = vadd.f32 %v4419_v14, %v4413_v4 }
 0x162   :  { %v1742_v32 = vpop.f32.mrf.mxu2 }
 0x163   :  { %v1761_v34 = vpop.f32.mrf.mxu3  ;;  %v1792_v39 = vpop.f32.mrf.mxu1  ;;  %v1743_v47 = vadd.f32 %v1742_v32, %v1723_v30 }
 0x164   :  { %v1773_v51 = vpop.f32.mrf.mxu0  ;;  %v1869_v32 = vpop.permute.xlu1 %1868 }
 0x165   :  { %v1774_v43 = vadd.f32 %v1773_v51, %v1755_v36  ;;  %v1646_v36 = vadd.f32 %v1645_v11, %v1627_v6  ;;  %v4469_v11 = vmax.f32 %v4361_v37, %v4399_v52  ;;  %v1762_v51 = vadd.f32 %v1761_v34, %v1743_v47 }
 0x167   :  { %v1793_v60 = vadd.f32 %v1792_v39, %v1774_v43  ;;  %v1665_v10 = vadd.f32 %v4415_v12, %v1646_v36  ;;  %v1648_v12 = vadd.f32 %v4421_v15, %v1629_v38 }
 0x169   :  { %v1684_v29 = vadd.f32 %v4417_v13, %v1665_v10  ;;  %v1667_v37 = vadd.f32 %v4423_v16, %v1648_v12  ;;  %v4470_v13 = vmax.f32 %v4369_v46, %v4403_v54 }
 0x16a   :  { %v1811_v40 = vpop.f32.mrf.mxu2 }
 0x16b   :  { %v1830_v41 = vpop.f32.mrf.mxu3  ;;  %v1812_v3 = vadd.f32 %v1811_v40, %v1793_v60  ;;  %v1794_v59 = vpop.f32.mrf.mxu1  ;;  %v1703_v30 = vadd.f32 %v4427_v25, %v1684_v29  ;;  %v1686_v15 = vadd.f32 %v4425_v17, %v1667_v37 }
 0x16c   :  { %v1775_v1 = vpop.f32.mrf.mxu0  ;;  %v1874_v54 = vpop.permute.xlu1 %1873 }
 0x16d   :  { %v1831_v5 = vadd.f32 %v1830_v41, %v1812_v3  ;;  %v1776_v20 = vadd.f32 %v1775_v1, %v1757_v2  ;;  %v1700_v1 = vadd.f32 %v1699_v22, %v1681_v24  ;;  %v1705_v41 = vadd.f32 %v4429_v45, %v1686_v15 }
 0x16e   :  { %v4471_v2 = vmax.f32 %v4374_v61, %v4409_v0 }
 0x16f   :  { %v1844_v55 = vmax.f32 %v1698_v33, %v1831_v5  ;;  %v1795_v23 = vadd.f32 %v1794_v59, %v1776_v20 }
 0x171   :  { %v1848_v7 = vmax.f32 %v1840_v57, %v1844_v55  ;;  %v1864_v57 = vpop.permute.xlu0 %1863 }
 0x172   :  { %v1813_v50 = vpop.f32.mrf.mxu2 }
 0x173   :  { %v1832_v8 = vpop.f32.mrf.mxu3  ;;  %v1876_v62 = vadd.f32 %v1859_v21, %v1848_v7  ;;  %v1814_v53 = vadd.f32 %v1813_v50, %v1795_v23  ;;  %v1797_v59 = vpop.f32.mrf.mxu1 }
 0x174   :  { %v1778_v18 = vpop.f32.mrf.mxu0 }
 0x175   :  { %1880 = vst [vmem:[%s4468_s3] sm:$0xff] %v1876_v62  ;;  %v1833_v9 = vadd.f32 %v1832_v8, %v1814_v53  ;;  %v1779_v35 = vadd.f32 %v1778_v18, %v1760_v28 }
 0x177   :  { %v1845_v31 = vmax.f32 %v1700_v1, %v1833_v9  ;;  %v1798_v58 = vadd.f32 %v1797_v59, %v1779_v35 }
 0x179   :  { %v1849_v22 = vmax.f32 %v4469_v11, %v1845_v31 }
 0x17a   :  { %v1816_v26 = vpop.f32.mrf.mxu2 }
 0x17b   :  { %v1835_v27 = vpop.f32.mrf.mxu3  ;;  %v1877_v39 = vadd.f32 %v1864_v57, %v1849_v22  ;;  %v1817_v42 = vadd.f32 %v1816_v26, %v1798_v58  ;;  %v1799_v48 = vpop.f32.mrf.mxu1 }
 0x17c   :  { %v1780_v43 = vpop.f32.mrf.mxu0 }
 0x17d   :  { %1881 = vst [vmem:[%s4468_s3 + $0x8] sm:$0xff] %v1877_v39  ;;  %v1836_v4 = vadd.f32 %v1835_v27, %v1817_v42  ;;  %v1781_v14 = vadd.f32 %v1780_v43, %v1762_v51 }
 0x17f   :  { %v1846_v52 = vmax.f32 %v1703_v30, %v1836_v4  ;;  %v1800_v49 = vadd.f32 %v1799_v48, %v1781_v14 }
 0x181   :  { %v1850_v34 = vmax.f32 %v4470_v13, %v1846_v52 }
 0x182   :  { %v1818_v44 = vpop.f32.mrf.mxu2 }
 0x183   :  { %v1878_v25 = vadd.f32 %v1869_v32, %v1850_v34  ;;  %v1819_v60 = vadd.f32 %v1818_v44, %v1800_v49  ;;  %v1837_v40 = vpop.f32.mrf.mxu3 }
 0x185   :  { %1882 = vst [vmem:[%s4468_s3 + $0x10] sm:$0xff] %v1878_v25  ;;  %v1838_v16 = vadd.f32 %v1837_v40, %v1819_v60 }
 0x187   :  { %v1847_v63 = vmax.f32 %v1705_v41, %v1838_v16 }
 0x189   :  { %v1851_v46 = vmax.f32 %v4471_v2, %v1847_v63 }
 0x18b   :  { %v1879_v3 = vadd.f32 %v1874_v54, %v1851_v46 }
 0x18d   :  { %1883 = vst [vmem:[%s4468_s3 + $0x18] sm:$0xff] %v1879_v3 }

// kernel: squrntial_forward.6
= control target key start
LH: loop header
LB: loop body
LE: loop exit
PB: predicated region body
PF: predicated region fallthrough
CT: control target
= control target key end

     0   :  { %vm587_vm0 = vcmask 261120   ;;  %s1371_s15 = smov 64   ;;  %s1831_s0 = inlined_call_operand.vmem [shape: bf16[800,128], index: 0, kind: input, shape index: {}]   ;;  %s1832_s1 = inlined_call_operand.vmem [shape: bf16[64,800], index: 1, kind: input, shape index: {}]   ;;  %s1833_s2 = inlined_call_operand.vmem [shape: f32[64,1], index: 2, kind: input, shape index: {}]   ;;  %s1834_s3 = inlined_call_operand.vmem [shape: f32[64,32], index: 3, kind: output, shape index: {}]  }
   0x1   :  { %v1302_v0 = vld [vmem:[%s1831_s0 + $0x38] sm:$0xff]  ;;  %v1301_v3 = vld [vmem:[%s1831_s0 + $0x30] sm:$0xff]  ;;  %v1300_v6 = vld [vmem:[%s1831_s0 + $0x28] sm:$0xff] }
   0x2   :  { %v1310_v1 = vld [vmem:[%s1831_s0 + $0x78] sm:$0xff]  ;;  %600 = vmatpush.bf16.msra.mxu0 %v1302_v0  ;;  %1345 = vmatpush.bf16.msra.mxu3 %v1302_v0  ;;  %v1309_v4 = vld [vmem:[%s1831_s0 + $0x70] sm:$0xff]  ;;  %v1308_v7 = vld [vmem:[%s1831_s0 + $0x68] sm:$0xff] }
   0x3   :  { %v1318_v2 = vld [vmem:[%s1831_s0 + $0xb8] sm:$0xff]  ;;  %629 = vmatpush.bf16.msra.mxu1 %v1310_v1  ;;  %v1317_v5 = vld [vmem:[%s1831_s0 + $0xb0] sm:$0xff]  ;;  %v1316_v8 = vld [vmem:[%s1831_s0 + $0xa8] sm:$0xff] }
   0x4   :  { %658 = vmatpush.bf16.msra.mxu2 %v1318_v2  ;;  %v1299_v9 = vld [vmem:[%s1831_s0 + $0x20] sm:$0xff]  ;;  %v1298_v12 = vld [vmem:[%s1831_s0 + $0x18] sm:$0xff]  ;;  %v1297_v15 = vld [vmem:[%s1831_s0 + $0x10] sm:$0xff] }
   0x5   :  { %v1307_v10 = vld [vmem:[%s1831_s0 + $0x60] sm:$0xff]  ;;  %v1306_v13 = vld [vmem:[%s1831_s0 + $0x58] sm:$0xff]  ;;  %v1305_v16 = vld [vmem:[%s1831_s0 + $0x50] sm:$0xff] }
   0x6   :  { %601 = vmatpush.bf16.msra.mxu0 %v1301_v3  ;;  %1346 = vmatpush.bf16.msra.mxu3 %v1301_v3  ;;  %v1315_v11 = vld [vmem:[%s1831_s0 + $0xa0] sm:$0xff]  ;;  %v1314_v14 = vld [vmem:[%s1831_s0 + $0x98] sm:$0xff]  ;;  %v1313_v17 = vld [vmem:[%s1831_s0 + $0x90] sm:$0xff] }
   0x7   :  { %630 = vmatpush.bf16.msra.mxu1 %v1309_v4  ;;  %v1296_v18 = vld [vmem:[%s1831_s0 + $0x8] sm:$0xff]  ;;  %v1295_v21 = vld [vmem:[%s1831_s0] sm:$0xff]  ;;  %v1270_v25 = vld [vmem:[%s1832_s1 + $0x18] sm:$0xf0] }
   0x8   :  { %659 = vmatpush.bf16.msra.mxu2 %v1317_v5  ;;  %v1304_v19 = vld [vmem:[%s1831_s0 + $0x48] sm:$0xff]  ;;  %v1303_v22 = vld [vmem:[%s1831_s0 + $0x40] sm:$0xff]  ;;  %v1009_v26 = vld [vmem:[%s1832_s1 + $0x70] sm:$0xf] }
   0x9   :  { %v1312_v20 = vld [vmem:[%s1831_s0 + $0x88] sm:$0xff]  ;;  %v1311_v23 = vld [vmem:[%s1831_s0 + $0x80] sm:$0xff]  ;;  %v1334_v32 = vld [vmem:[%s1831_s0 + $0x138] sm:$0xff] }
   0xa   :  { %602 = vmatpush.bf16.msra.mxu0 %v1300_v6  ;;  %1347 = vmatpush.bf16.msra.mxu3 %v1300_v6  ;;  %v953_v24 = vld [vmem:[%s1832_s1] sm:$0xf]  ;;  %v1284_v27 = vld [vmem:[%s1832_s1 + $0x88] sm:$0xf0]  ;;  %v1267_v28 = vld [vmem:[%s1832_s1 + $0x4] sm:$0xf] }
   0xb   :  { %631 = vmatpush.bf16.msra.mxu1 %v1308_v7  ;;  %v955_v29 = vld [vmem:[%s1832_s1 + $0x1c] sm:$0xf0]  ;;  %v961_v30 = vld [vmem:[%s1832_s1 + $0x8] sm:$0xf]  ;;  %v1271_v31 = vld [vmem:[%s1832_s1 + $0x20] sm:$0xf0]  ;;  %v954_v34 = vor.u32 %v1270_v25, %v953_v24  ;;  %v1010_v35 = vor.u32 %v1284_v27, %v1009_v26 }
   0xc   :  { %660 = vmatpush.bf16.msra.mxu2 %v1316_v8  ;;  %v1326_v33 = vld [vmem:[%s1831_s0 + $0xf8] sm:$0xff]  ;;  %v958_v36 = vor.u32 %v1267_v28, %v955_v29  ;;  %v962_v37 = vor.u32 %v1271_v31, %v961_v30  ;;  %v1502_v39 = vld [vmem:[%s1831_s0 + $0x188] sm:$0xff]  ;;  %v1333_v40 = vld [vmem:[%s1831_s0 + $0x130] sm:$0xff] }
   0xd   :  { %v1497_v38 = vld [vmem:[%s1831_s0 + $0x178] sm:$0xff]  ;;  %v1325_v41 = vld [vmem:[%s1831_s0 + $0xf0] sm:$0xff]  ;;  %v1520_v43 = vld [vmem:[%s1831_s0 + $0x180] sm:$0xff] }
   0xe   :  { %603 = vmatpush.bf16.msra.mxu0 %v1299_v9  ;;  %1348 = vmatpush.bf16.msra.mxu3 %v1299_v9  ;;  %v1515_v42 = vld [vmem:[%s1831_s0 + $0x170] sm:$0xff]  ;;  %v1332_v44 = vld [vmem:[%s1831_s0 + $0x128] sm:$0xff]  ;;  %v1331_v47 = vld [vmem:[%s1831_s0 + $0x120] sm:$0xff] }
   0xf   :  { %632 = vmatpush.bf16.msra.mxu1 %v1307_v10  ;;  %v1324_v45 = vld [vmem:[%s1831_s0 + $0xe8] sm:$0xff]  ;;  %v1323_v48 = vld [vmem:[%s1831_s0 + $0xe0] sm:$0xff]  ;;  %v981_v49 = vld [vmem:[%s1832_s1 + $0x38] sm:$0xf] }
  0x10   :  { %661 = vmatpush.bf16.msra.mxu2 %v1315_v11  ;;  %v1532_v46 = vld [vmem:[%s1831_s0 + $0x168] sm:$0xff]  ;;  %v1277_v50 = vld [vmem:[%s1832_s1 + $0x50] sm:$0xf0]  ;;  %v1291_v52 = vld [vmem:[%s1832_s1 + $0xc0] sm:$0xf0] }
  0x11   :  { %v1037_v51 = vld [vmem:[%s1832_s1 + $0xa8] sm:$0xf]  ;;  %v1274_v53 = vld [vmem:[%s1832_s1 + $0x3c] sm:$0xf]  ;;  %v983_v54 = vld [vmem:[%s1832_s1 + $0x54] sm:$0xf0]  ;;  %v982_v60 = vor.u32 %v1277_v50, %v981_v49 }
  0x12   :  { %604 = vmatpush.bf16.msra.mxu0 %v1298_v12  ;;  %1349 = vmatpush.bf16.msra.mxu3 %v1298_v12  ;;  %v989_v55 = vld [vmem:[%s1832_s1 + $0x40] sm:$0xf]  ;;  %v1278_v56 = vld [vmem:[%s1832_s1 + $0x58] sm:$0xf0]  ;;  %v1038_v61 = vor.u32 %v1291_v52, %v1037_v51  ;;  %v986_v62 = vor.u32 %v1274_v53, %v983_v54  ;;  %v1329_v1 = vld [vmem:[%s1831_s0 + $0x110] sm:$0xff] }
  0x13   :  { %633 = vmatpush.bf16.msra.mxu1 %v1306_v13  ;;  %v1569_v57 = vld [vmem:[%s1831_s0 + $0x160] sm:$0xff]  ;;  %v1330_v58 = vld [vmem:[%s1831_s0 + $0x118] sm:$0xff]  ;;  %v990_v63 = vor.u32 %v1278_v56, %v989_v55  ;;  %v1321_v2 = vld [vmem:[%s1831_s0 + $0xd0] sm:$0xff] }
  0x14   :  { %662 = vmatpush.bf16.msra.mxu2 %v1314_v14  ;;  %v1322_v59 = vld [vmem:[%s1831_s0 + $0xd8] sm:$0xff]  ;;  %v1337_v3 = vld [vmem:[%s1831_s0 + $0x150] sm:$0xff]  ;;  %v1328_v4 = vld [vmem:[%s1831_s0 + $0x108] sm:$0xff] }
  0x15   :  { %v1338_v0 = vld [vmem:[%s1831_s0 + $0x158] sm:$0xff]  ;;  %v1320_v5 = vld [vmem:[%s1831_s0 + $0xc8] sm:$0xff]  ;;  %v1327_v7 = vld [vmem:[%s1831_s0 + $0x100] sm:$0xff] }
  0x16   :  { %605 = vmatpush.bf16.msra.mxu0 %v1297_v15  ;;  %1350 = vmatpush.bf16.msra.mxu3 %v1297_v15  ;;  %v1336_v6 = vld [vmem:[%s1831_s0 + $0x148] sm:$0xff]  ;;  %v1319_v8 = vld [vmem:[%s1831_s0 + $0xc0] sm:$0xff]  ;;  %v1281_v9 = vld [vmem:[%s1832_s1 + $0x74] sm:$0xf] }
  0x17   :  { %634 = vmatpush.bf16.msra.mxu1 %v1305_v16  ;;  %v1011_v10 = vld [vmem:[%s1832_s1 + $0x8c] sm:$0xf0]  ;;  %v1268_v11 = vld [vmem:[%s1832_s1 + $0xc] sm:$0xf]  ;;  %v963_v12 = vld [vmem:[%s1832_s1 + $0x24] sm:$0xf0] }
  0x18   :  { %663 = vmatpush.bf16.msra.mxu2 %v1313_v17  ;;  %v969_v13 = vld [vmem:[%s1832_s1 + $0x10] sm:$0xf]  ;;  %v1272_v14 = vld [vmem:[%s1832_s1 + $0x28] sm:$0xf0]  ;;  %v1017_v15 = vld [vmem:[%s1832_s1 + $0x78] sm:$0xf] }
  0x19   :  { %v1285_v16 = vld [vmem:[%s1832_s1 + $0x90] sm:$0xf0]  ;;  %v1335_v17 = vld [vmem:[%s1831_s0 + $0x140] sm:$0xff]  ;;  %v997_v25 = vld [vmem:[%s1832_s1 + $0x48] sm:$0xf] }
  0x1a   :  { %606 = vmatpush.bf16.msra.mxu0 %v1296_v18  ;;  %1351 = vmatpush.bf16.msra.mxu3 %v1296_v18  ;;  %v966_v18 = vor.u32 %v1268_v11, %v963_v12  ;;  %v991_v24 = vld [vmem:[%s1832_s1 + $0x5c] sm:$0xf0]  ;;  %v1279_v26 = vld [vmem:[%s1832_s1 + $0x60] sm:$0xf0]  ;;  %v1039_v27 = vld [vmem:[%s1832_s1 + $0xc4] sm:$0xf0] }
  0x1b   :  { %635 = vmatpush.bf16.msra.mxu1 %v1304_v19  ;;  %v970_v19 = vor.u32 %v1272_v14, %v969_v13  ;;  %v1045_v28 = vld [vmem:[%s1832_s1 + $0xb0] sm:$0xf]  ;;  %v1292_v29 = vld [vmem:[%s1832_s1 + $0xc8] sm:$0xf0]  ;;  %v998_v31 = vor.u32 %v1279_v26, %v997_v25  ;;  %v1293_v49 = vld [vmem:[%s1832_s1 + $0xd0] sm:$0xf0] }
  0x1c   :  { %664 = vmatpush.bf16.msra.mxu2 %v1312_v20  ;;  %v1014_v20 = vor.u32 %v1281_v9, %v1011_v10  ;;  %v1283_v50 = vld [vmem:[%s1832_s1 + $0x84] sm:$0xf]  ;;  %v1027_v51 = vld [vmem:[%s1832_s1 + $0x9c] sm:$0xf0]  ;;  %v1005_v52 = vld [vmem:[%s1832_s1 + $0x50] sm:$0xf] }
  0x1d   :  { %v1280_v53 = vld [vmem:[%s1832_s1 + $0x68] sm:$0xf0]  ;;  %v1030_v56 = vor.u32 %v1283_v50, %v1027_v51 }
  0x1e   :  { %607 = vmatpush.bf16.msra.mxu0 %v1295_v21  ;;  %1352 = vmatpush.bf16.msra.mxu3 %v1295_v21  ;;  %v1018_v21 = vor.u32 %v1285_v16, %v1017_v15 }
  0x1f   :  { %636 = vmatpush.bf16.msra.mxu1 %v1303_v22  ;;  %v1288_v22 = vld [vmem:[%s1832_s1 + $0xac] sm:$0xf] }
  0x20   :  { %665 = vmatpush.bf16.msra.mxu2 %v1311_v23  ;;  %v1275_v23 = vld [vmem:[%s1832_s1 + $0x44] sm:$0xf] }
  0x21   :  { %608 = vmatmul.bf16.vlgmr.msra.gmra.mxu0 %v954_v34  ;;  %618 = vmatmul.bf16.vlgmr.msra.gmra.mxu3 %v1010_v35  ;;  %v994_v30 = vor.u32 %v1275_v23, %v991_v24  ;;  %v1282_v34 = vld [vmem:[%s1832_s1 + $0x7c] sm:$0xf]  ;;  %v1019_v35 = vld [vmem:[%s1832_s1 + $0x94] sm:$0xf0] }
  0x22   :  { %716 = vmatpush.bf16.msrb.mxu0 %v1334_v32  ;;  %687 = vmatpush.bf16.msrb.mxu3 %v1326_v33  ;;  %v1042_v32 = vor.u32 %v1288_v22, %v1039_v27  ;;  %v1046_v33 = vor.u32 %v1292_v29, %v1045_v28 }
  0x23   :  { %637 = vmatmul.bf16.vlgmr.msra.gmra.mxu1 %v958_v36  ;;  %666 = vmatmul.bf16.vlgmr.msra.gmra.mxu2 %v962_v37  ;;  %v1025_v36 = vld [vmem:[%s1832_s1 + $0x80] sm:$0xf]  ;;  %v1286_v37 = vld [vmem:[%s1832_s1 + $0x98] sm:$0xf0] }
  0x24   :  { %1353 = vmatpush.bf16.msrb.mxu1 %v1497_v38  ;;  %780 = vmatpush.bf16.msrb.mxu2 %v1502_v39 }
  0x26   :  { %717 = vmatpush.bf16.msrb.mxu0 %v1333_v40  ;;  %688 = vmatpush.bf16.msrb.mxu3 %v1325_v41  ;;  %v977_v40 = vld [vmem:[%s1832_s1 + $0x18] sm:$0xf]  ;;  %v1273_v41 = vld [vmem:[%s1832_s1 + $0x30] sm:$0xf0] }
  0x28   :  { %1354 = vmatpush.bf16.msrb.mxu1 %v1515_v42  ;;  %781 = vmatpush.bf16.msrb.mxu2 %v1520_v43 }
  0x2a   :  { %718 = vmatpush.bf16.msrb.mxu0 %v1332_v44  ;;  %689 = vmatpush.bf16.msrb.mxu3 %v1324_v45  ;;  %v978_v45 = vor.u32 %v1273_v41, %v977_v40 }
  0x2c   :  { %1355 = vmatpush.bf16.msrb.mxu1 %v1532_v46 }
  0x2e   :  { %719 = vmatpush.bf16.msrb.mxu0 %v1331_v47  ;;  %690 = vmatpush.bf16.msrb.mxu3 %v1323_v48  ;;  %v1047_v47 = vld [vmem:[%s1832_s1 + $0xcc] sm:$0xf0]  ;;  %v1053_v48 = vld [vmem:[%s1832_s1 + $0xb8] sm:$0xf] }
  0x2f   :  { %v1054_v55 = vor.u32 %v1293_v49, %v1053_v48 }
  0x30   :  { %1356 = vmatpush.bf16.msrb.mxu1 %v1569_v57 }
  0x31   :  { %613 = vmatmul.bf16.gmra.mxu0 %v982_v60  ;;  %623 = vmatmul.bf16.gmra.mxu3 %v1038_v61  ;;  %v1290_v60 = vld [vmem:[%s1832_s1 + $0xbc] sm:$0xf]  ;;  %v1061_v61 = vld [vmem:[%s1832_s1 + $0xc0] sm:$0xf] }
  0x32   :  { %720 = vmatpush.bf16.msrb.mxu0 %v1330_v58  ;;  %691 = vmatpush.bf16.msrb.mxu3 %v1322_v59  ;;  %v1269_v58 = vld [vmem:[%s1832_s1 + $0x14] sm:$0xf]  ;;  %v971_v59 = vld [vmem:[%s1832_s1 + $0x2c] sm:$0xf0] }
  0x33   :  { %642 = vmatmul.bf16.gmra.mxu1 %v986_v62  ;;  %671 = vmatmul.bf16.gmra.mxu2 %v990_v63  ;;  %v1294_v62 = vld [vmem:[%s1832_s1 + $0xd8] sm:$0xf0]  ;;  %v1055_v63 = vld [vmem:[%s1832_s1 + $0xd4] sm:$0xf0] }
  0x34   :  { %1357 = vmatpush.bf16.msrb.mxu1 %v1338_v0 }
  0x36   :  { %721 = vmatpush.bf16.msrb.mxu0 %v1329_v1  ;;  %692 = vmatpush.bf16.msrb.mxu3 %v1321_v2  ;;  %v1287_v1 = vld [vmem:[%s1832_s1 + $0xa0] sm:$0xf0]  ;;  %v974_v2 = vor.u32 %v1269_v58, %v971_v59 }
  0x38   :  { %1358 = vmatpush.bf16.msrb.mxu1 %v1337_v3 }
  0x3a   :  { %722 = vmatpush.bf16.msrb.mxu0 %v1328_v4  ;;  %693 = vmatpush.bf16.msrb.mxu3 %v1320_v5  ;;  %v1058_v4 = vor.u32 %v1290_v60, %v1055_v63  ;;  %v1369_v60 = vmov 0  }
  0x3b   :  { %1366 = vset.pattern.permute.xlu1 %v1369_v60  ;;  %1368 = vset.pattern.permute.xlu0 %v1369_v60 }
  0x3c   :  { %1359 = vmatpush.bf16.msrb.mxu1 %v1336_v6  ;;  %1367 = vset.pattern.permute.xlu2 %v1369_v60 }
  0x3e   :  { %723 = vmatpush.bf16.msrb.mxu0 %v1327_v7  ;;  %694 = vmatpush.bf16.msrb.mxu3 %v1319_v8 }
  0x40   :  { %1360 = vmatpush.bf16.msrb.mxu1 %v1335_v17 }
  0x41   :  { %695 = vmatmul.bf16.vlgmr.msrb.gmra.mxu3 %v966_v18  ;;  %724 = vmatmul.bf16.vlgmr.msrb.gmra.mxu0 %v970_v19 }
  0x42   :  { %745 = vmatpush.bf16.msra.mxu0 %v1497_v38  ;;  %1361 = vmatpush.bf16.msra.mxu3 %v1502_v39  ;;  %v1276_v38 = vld [vmem:[%s1832_s1 + $0x4c] sm:$0xf]  ;;  %v999_v39 = vld [vmem:[%s1832_s1 + $0x64] sm:$0xf0] }
  0x43   :  { %647 = vmatmul.bf16.gmra.mxu1 %v1014_v20  ;;  %676 = vmatmul.bf16.gmra.mxu2 %v1018_v21  ;;  %v1002_v44 = vor.u32 %v1276_v38, %v999_v39 }
  0x46   :  { %746 = vmatpush.bf16.msra.mxu0 %v1515_v42  ;;  %1362 = vmatpush.bf16.msra.mxu3 %v1520_v43  ;;  %v1022_v42 = vor.u32 %v1282_v34, %v1019_v35  ;;  %v1026_v43 = vor.u32 %v1286_v37, %v1025_v36 }
  0x4a   :  { %747 = vmatpush.bf16.msra.mxu0 %v1532_v46  ;;  %v1289_v46 = vld [vmem:[%s1832_s1 + $0xb4] sm:$0xf] }
  0x4b   :  { %v1050_v54 = vor.u32 %v1289_v46, %v1047_v47 }
  0x4e   :  { %748 = vmatpush.bf16.msra.mxu0 %v1569_v57  ;;  %v1006_v57 = vor.u32 %v1280_v53, %v1005_v52 }
  0x51   :  { %700 = vmatmul.bf16.gmra.mxu3 %v994_v30  ;;  %729 = vmatmul.bf16.gmra.mxu0 %v998_v31 }
  0x52   :  { %749 = vmatpush.bf16.msra.mxu0 %v1338_v0  ;;  %v1033_v0 = vld [vmem:[%s1832_s1 + $0x88] sm:$0xf]  ;;  %s1370_s1 = smov 96  }
  0x53   :  { %652 = vmatmul.bf16.gmra.mxu1 %v1042_v32  ;;  %681 = vmatmul.bf16.gmra.mxu2 %v1046_v33  ;;  %v1034_v5 = vor.u32 %v1287_v1, %v1033_v0 }
  0x56   :  { %750 = vmatpush.bf16.msra.mxu0 %v1337_v3  ;;  %v1062_v3 = vor.u32 %v1294_v62, %v1061_v61 }
  0x5a   :  { %751 = vmatpush.bf16.msra.mxu0 %v1336_v6 }
  0x5e   :  { %752 = vmatpush.bf16.msra.mxu0 %v1335_v17 }
  0x61   :  { %705 = vmatmul.bf16.gmra.mxu3 %v1022_v42  ;;  %734 = vmatmul.bf16.gmra.mxu0 %v1026_v43 }
  0x63   :  { %758 = vmatmul.bf16.vlgmr.msrb.gmra.mxu1 %v1002_v44  ;;  %1263 = vmatmul.msk.bf16.vlgmr.msrb.gmra.mxu2 %vm587_vm0, %v978_v45 }
  0x71   :  { %710 = vmatmul.bf16.gmra.mxu3 %v1050_v54  ;;  %739 = vmatmul.bf16.gmra.mxu0 %v1054_v55 }
  0x73   :  { %763 = vmatmul.bf16.gmra.mxu1 %v1030_v56  ;;  %1264 = vmatmul.msk.bf16.gmra.mxu2 %vm587_vm0, %v1006_v57 }
  0x81   :  { %753 = vmatmul.bf16.vlgmr.msra.gmra.mxu0 %v974_v2  ;;  %1266 = vmatmul.msk.bf16.vlgmr.msra.gmra.mxu3 %vm587_vm0, %v1062_v3 }
  0x83   :  { %768 = vmatmul.bf16.gmra.mxu1 %v1058_v4  ;;  %1265 = vmatmul.msk.bf16.gmra.mxu2 %vm587_vm0, %v1034_v5 }
  0x9e   :  { %v609_v6 = vpop.f32.mrf.mxu0 }
  0xa0   :  { %v638_v7 = vpop.f32.mrf.mxu1 }
  0xa1   :  { %v639_v8 = vadd.f32 %v638_v7, %v609_v6 }
  0xa4   :  { %v1738_v9 = vpop.f32.mrf.mxu3 }
  0xa6   :  { %v667_v10 = vpop.f32.mrf.mxu2  ;;  %v611_v12 = vpop.f32.mrf.mxu0 }
  0xa7   :  { %v668_v11 = vadd.f32 %v667_v10, %v639_v8 }
  0xa8   :  { %v640_v13 = vpop.f32.mrf.mxu1 }
  0xa9   :  { %v641_v14 = vadd.f32 %v640_v13, %v611_v12 }
  0xac   :  { %v1740_v15 = vpop.f32.mrf.mxu3 }
  0xae   :  { %v669_v16 = vpop.f32.mrf.mxu2  ;;  %v614_v18 = vpop.f32.mrf.mxu0 }
  0xaf   :  { %v1742_v17 = vadd.f32 %v669_v16, %v641_v14 }
  0xb0   :  { %v643_v19 = vpop.f32.mrf.mxu1 }
  0xb1   :  { %v644_v48 = vadd.f32 %v643_v19, %v614_v18 }
  0xb4   :  { %v1744_v20 = vpop.f32.mrf.mxu3 }
  0xb6   :  { %v672_v21 = vpop.f32.mrf.mxu2  ;;  %v616_v22 = vpop.f32.mrf.mxu0 }
  0xb7   :  { %v673_v49 = vadd.f32 %v672_v21, %v644_v48  ;;  %v885_v48 = vld [vmem:[%s1833_s2 + $0x10] sm:$0xff] }
  0xb8   :  { %v645_v23 = vpop.f32.mrf.mxu1 }
  0xb9   :  { %v646_v55 = vadd.f32 %v645_v23, %v616_v22 }
  0xbc   :  { %v626_v24 = vpop.f32.mrf.mxu3 }
  0xbe   :  { %v674_v25 = vpop.f32.mrf.mxu2  ;;  %v725_v26 = vpop.f32.mrf.mxu0 }
  0xbf   :  { %v675_v57 = vadd.f32 %v674_v25, %v646_v55 }
  0xc0   :  { %v648_v27 = vpop.f32.mrf.mxu1 }
  0xc1   :  { %v649_v3 = vadd.f32 %v648_v27, %v1738_v9 }
  0xc4   :  { %v696_v28 = vpop.f32.mrf.mxu3 }
  0xc5   :  { %v697_v2 = vadd.f32 %v696_v28, %v668_v11 }
  0xc6   :  { %v677_v29 = vpop.f32.mrf.mxu2  ;;  %v1746_v30 = vpop.f32.mrf.mxu0 }
  0xc7   :  { %v678_v5 = vadd.f32 %v677_v29, %v649_v3  ;;  %v726_v10 = vadd.f32 %v725_v26, %v697_v2 }
  0xc8   :  { %v650_v31 = vpop.f32.mrf.mxu1 }
  0xc9   :  { %v651_v9 = vadd.f32 %v650_v31, %v1740_v15 }
  0xcc   :  { %v698_v32 = vpop.f32.mrf.mxu3 }
  0xcd   :  { %v699_v19 = vadd.f32 %v698_v32, %v1742_v17 }
  0xce   :  { %v679_v33 = vpop.f32.mrf.mxu2  ;;  %v730_v34 = vpop.f32.mrf.mxu0 }
  0xcf   :  { %v680_v25 = vadd.f32 %v679_v33, %v651_v9 }
  0xd0   :  { %v653_v35 = vpop.f32.mrf.mxu1 }
  0xd1   :  { %v654_v28 = vadd.f32 %v653_v35, %v1744_v20 }
  0xd4   :  { %v701_v36 = vpop.f32.mrf.mxu3 }
  0xd5   :  { %v702_v52 = vadd.f32 %v701_v36, %v673_v49  ;;  %v728_v36 = vadd.f32 %v1746_v30, %v699_v19  ;;  %v886_v49 = vld [vmem:[%s1833_s2 + $0x18] sm:$0xff] }
  0xd6   :  { %v1748_v37 = vpop.f32.mrf.mxu2  ;;  %v732_v38 = vpop.f32.mrf.mxu0 }
  0xd7   :  { %v731_v56 = vadd.f32 %v730_v34, %v702_v52 }
  0xd8   :  { %v655_v39 = vpop.f32.mrf.mxu1 }
  0xd9   :  { %v656_v11 = vadd.f32 %v655_v39, %v626_v24  ;;  %v683_v24 = vadd.f32 %v1748_v37, %v654_v28 }
  0xdc   :  { %v703_v40 = vpop.f32.mrf.mxu3 }
  0xdd   :  { %v704_v62 = vadd.f32 %v703_v40, %v675_v57 }
  0xde   :  { %v684_v41 = vpop.f32.mrf.mxu2  ;;  %v735_v42 = vpop.f32.mrf.mxu0 }
  0xdf   :  { %v733_v4 = vadd.f32 %v732_v38, %v704_v62  ;;  %v685_v23 = vadd.f32 %v684_v41, %v656_v11 }
  0xe0   :  { %v759_v43 = vpop.f32.mrf.mxu1 }
  0xe1   :  { %v760_v58 = vadd.f32 %v759_v43, %v731_v56 }
  0xe4   :  { %v706_v44 = vpop.f32.mrf.mxu3 }
  0xe5   :  { %v707_v12 = vadd.f32 %v706_v44, %v678_v5  ;;  %v889_v5 = vld [vmem:[%s1833_s2 + $0x30] sm:$0xff] }
  0xe6   :  { %v783_v45 = vpop.f32.mrf.mxu2  ;;  %v1750_v46 = vpop.f32.mrf.mxu0 }
  0xe7   :  { %v736_v22 = vadd.f32 %v735_v42, %v707_v12 }
  0xe8   :  { %v761_v47 = vpop.f32.mrf.mxu1 }
  0xe9   :  { %v762_v6 = vadd.f32 %v761_v47, %v733_v4 }
  0xec   :  { %v708_v50 = vpop.f32.mrf.mxu3 }
  0xed   :  { %v709_v38 = vadd.f32 %v708_v50, %v680_v25  ;;  %v884_v50 = vld [vmem:[%s1833_s2 + $0x8] sm:$0xff] }
  0xee   :  { %v785_v51 = vpop.f32.mrf.mxu2  ;;  %v740_v53 = vpop.f32.mrf.mxu0 }
  0xef   :  { %v738_v41 = vadd.f32 %v1750_v46, %v709_v38  ;;  %v883_v46 = vld [vmem:[%s1833_s2] sm:$0xff] }
  0xf0   :  { %v764_v54 = vpop.f32.mrf.mxu1 }
  0xf1   :  { %v765_v26 = vadd.f32 %v764_v54, %v736_v22 }
  0xf4   :  { %v711_v59 = vpop.f32.mrf.mxu3 }
  0xf5   :  { %v712_v31 = vadd.f32 %v711_v59, %v683_v24 }
  0xf6   :  { %v788_v61 = vpop.f32.mrf.mxu2  ;;  %v742_v0 = vpop.f32.mrf.mxu0 }
  0xf7   :  { %v1752_v63 = vadd.f32 %v788_v61, %v760_v58  ;;  %v741_v30 = vadd.f32 %v740_v53, %v712_v31  ;;  %v888_v61 = vld [vmem:[%s1833_s2 + $0x28] sm:$0xff] }
  0xf8   :  { %v766_v1 = vpop.f32.mrf.mxu1 }
  0xf9   :  { %815 = vrot.lane.b32.xlu1 %v1752_v63, %s1370_s1  ;;  %v767_v20 = vadd.f32 %v766_v1, %v738_v41 }
  0xfc   :  { %v713_v7 = vpop.f32.mrf.mxu3 }
  0xfd   :  { %v714_v29 = vadd.f32 %v713_v7, %v685_v23 }
  0xfe   :  { %v790_v8 = vpop.f32.mrf.mxu2  ;;  %v754_v14 = vpop.f32.mrf.mxu0 }
  0xff   :  { %v1757_v13 = vadd.f32 %v790_v8, %v762_v6  ;;  %v755_v16 = vadd.f32 %v754_v14, %v726_v10  ;;  %v743_v33 = vadd.f32 %v742_v0, %v714_v29  ;;  %v890_v6 = vld [vmem:[%s1833_s2 + $0x38] sm:$0xff] }
 0x100   :  { %v769_v18 = vpop.f32.mrf.mxu1 }
 0x101   :  { %817 = vrot.lane.b32.xlu1 %v1757_v13, %s1370_s1  ;;  %v784_v21 = vadd.f32 %v783_v45, %v755_v16  ;;  %v770_v47 = vadd.f32 %v769_v18, %v741_v30 }
 0x103   :  { %811 = vrot.lane.b32.xlu0 %v784_v21, %s1370_s1 }
 0x104   :  { %v798_v27 = vpop.f32.mrf.mxu3 }
 0x105   :  { %v799_v37 = vadd.f32 %v798_v27, %v770_v47 }
 0x106   :  { %v793_v34 = vpop.f32.mrf.mxu2  ;;  %v756_v17 = vpop.f32.mrf.mxu0 }
 0x107   :  { %v794_v40 = vadd.f32 %v793_v34, %v765_v26  ;;  %v757_v32 = vadd.f32 %v756_v17, %v728_v36 }
 0x108   :  { %v771_v15 = vpop.f32.mrf.mxu1 }
 0x109   :  { %819 = vrot.lane.b32.xlu2 %v794_v40, %s1370_s1  ;;  %v786_v39 = vadd.f32 %v785_v51, %v757_v32  ;;  %v772_v42 = vadd.f32 %v771_v15, %v743_v33  ;;  %v887_v51 = vld [vmem:[%s1833_s2 + $0x20] sm:$0xff] }
 0x10b   :  { %813 = vrot.lane.b32.xlu0 %v786_v39, %s1370_s1 }
 0x10c   :  { %v800_v35 = vpop.f32.mrf.mxu3 }
 0x10d   :  { %v801_v44 = vadd.f32 %v800_v35, %v772_v42 }
 0x10e   :  { %v795_v43 = vpop.f32.mrf.mxu2 }
 0x10f   :  { %v796_v45 = vadd.f32 %v795_v43, %v767_v20  ;;  %825 = vrot.lane.b32.xlu1 %v801_v44, %s1370_s1 }
 0x111   :  { %821 = vrot.lane.b32.xlu2 %v796_v45, %s1370_s1 }
 0x113   :  { %823 = vrot.lane.b32.xlu0 %v799_v37, %s1370_s1 }
 0x117   :  { %893 = vperm.xlu1 %1366, %v883_v46  }
 0x119   :  { %898 = vperm.xlu2 %1367, %v884_v50  }
 0x11b   :  { %903 = vperm.xlu0 %1368, %v885_v48  }
 0x11f   :  { %908 = vperm.xlu1 %1366, %v886_v49  }
 0x121   :  { %913 = vperm.xlu2 %1367, %v887_v51  }
 0x163   :  { %v820_v52 = vpop.permute.xlu2 %819 }
 0x164   :  { %v839_v53 = vmax.f32 %v794_v40, %v820_v52 }
 0x166   :  { %859 = vrot.lane.b32.xlu0 %v839_v53, %s1371_s15 }
 0x16b   :  { %v816_v54 = vpop.permute.xlu1 %815  ;;  %v822_v56 = vpop.permute.xlu2 %821 }
 0x16c   :  { %v837_v55 = vmax.f32 %v1752_v63, %v816_v54  ;;  %v840_v58 = vmax.f32 %v796_v45, %v822_v56 }
 0x16e   :  { %855 = vrot.lane.b32.xlu1 %v837_v55, %s1371_s15 }
 0x173   :  { %v818_v57 = vpop.permute.xlu1 %817  ;;  %v899_v7 = vpop.permute.xlu2 %898 }
 0x174   :  { %v838_v59 = vmax.f32 %v1757_v13, %v818_v57 }
 0x175   :  { %v812_v60 = vpop.permute.xlu0 %811 }
 0x176   :  { %861 = vrot.lane.b32.xlu1 %v840_v58, %s1371_s15  ;;  %857 = vrot.lane.b32.xlu2 %v838_v59, %s1371_s15  ;;  %v835_v62 = vmax.f32 %v784_v21, %v812_v60 }
 0x17b   :  { %v914_v8 = vpop.permute.xlu2 %913 }
 0x17d   :  { %v814_v0 = vpop.permute.xlu0 %813 }
 0x17e   :  { %918 = vperm.xlu1 %1366, %v888_v61   ;;  %851 = vrot.lane.b32.xlu2 %v835_v62, %s1371_s15  ;;  %v836_v1 = vmax.f32 %v786_v39, %v814_v0 }
 0x180   :  { %853 = vrot.lane.b32.xlu0 %v836_v1, %s1371_s15 }
 0x181   :  { %v826_v63 = vpop.permute.xlu1 %825 }
 0x182   :  { %v842_v3 = vmax.f32 %v801_v44, %v826_v63 }
 0x185   :  { %v824_v2 = vpop.permute.xlu0 %823 }
 0x186   :  { %v841_v4 = vmax.f32 %v799_v37, %v824_v2 }
 0x188   :  { %863 = vrot.lane.b32.xlu2 %v841_v4, %s1371_s15  ;;  %865 = vrot.lane.b32.xlu0 %v842_v3, %s1371_s15 }
 0x189   :  { %v894_v10 = vpop.permute.xlu1 %893 }
 0x18d   :  { %v904_v12 = vpop.permute.xlu0 %903 }
 0x190   :  { %923 = vperm.xlu2 %1367, %v889_v5   ;;  %928 = vperm.xlu0 %1368, %v890_v6  }
 0x191   :  { %v909_v14 = vpop.permute.xlu1 %908 }
 0x1d0   :  { %v858_v13 = vpop.permute.xlu2 %857 }
 0x1d1   :  { %v878_v16 = vmax.f32 %v838_v59, %v858_v13 }
 0x1d3   :  { %v934_v18 = vadd.f32 %v909_v14, %v878_v16 }
 0x1d5   :  { %942 = vst.msk [vmem:[%s1834_s3 + $0x18] sm:$0xff] %vm587_vm0, %v934_v18 }
 0x1d8   :  { %v860_v19 = vpop.permute.xlu0 %859  ;;  %v852_v11 = vpop.permute.xlu2 %851 }
 0x1d9   :  { %v879_v21 = vmax.f32 %v839_v53, %v860_v19  ;;  %v875_v9 = vmax.f32 %v835_v62, %v852_v11 }
 0x1db   :  { %v935_v22 = vadd.f32 %v914_v8, %v879_v21  ;;  %v931_v23 = vadd.f32 %v894_v10, %v875_v9 }
 0x1dd   :  { %943 = vst.msk [vmem:[%s1834_s3 + $0x20] sm:$0xff] %vm587_vm0, %v935_v22 }
 0x1de   :  { %939 = vst.msk [vmem:[%s1834_s3] sm:$0xff] %vm587_vm0, %v931_v23 }
 0x1e0   :  { %v856_v25 = vpop.permute.xlu1 %855 }
 0x1e1   :  { %v877_v26 = vmax.f32 %v837_v55, %v856_v25 }
 0x1e2   :  { %v864_v28 = vpop.permute.xlu2 %863 }
 0x1e3   :  { %v933_v27 = vadd.f32 %v904_v12, %v877_v26  ;;  %v881_v34 = vmax.f32 %v841_v4, %v864_v28 }
 0x1e5   :  { %941 = vst.msk [vmem:[%s1834_s3 + $0x10] sm:$0xff] %vm587_vm0, %v933_v27 }
 0x1e8   :  { %v862_v29 = vpop.permute.xlu1 %861 }
 0x1e9   :  { %v880_v40 = vmax.f32 %v840_v58, %v862_v29 }
 0x1ea   :  { %v924_v36 = vpop.permute.xlu2 %923 }
 0x1eb   :  { %v937_v38 = vadd.f32 %v924_v36, %v881_v34 }
 0x1ed   :  { %945 = vst.msk [vmem:[%s1834_s3 + $0x30] sm:$0xff] %vm587_vm0, %v937_v38 }
 0x1f0   :  { %v919_v17 = vpop.permute.xlu1 %918 }
 0x1f1   :  { %v936_v24 = vadd.f32 %v919_v17, %v880_v40 }
 0x1f2   :  { %v854_v32 = vpop.permute.xlu0 %853 }
 0x1f3   :  { %944 = vst.msk [vmem:[%s1834_s3 + $0x28] sm:$0xff] %vm587_vm0, %v936_v24  ;;  %v876_v15 = vmax.f32 %v836_v1, %v854_v32 }
 0x1f5   :  { %v932_v31 = vadd.f32 %v899_v7, %v876_v15 }
 0x1f7   :  { %940 = vst.msk [vmem:[%s1834_s3 + $0x8] sm:$0xff] %vm587_vm0, %v932_v31 }
 0x1fa   :  { %v866_v39 = vpop.permute.xlu0 %865 }
 0x1fb   :  { %v882_v33 = vmax.f32 %v842_v3, %v866_v39 }
 0x202   :  { %v929_v41 = vpop.permute.xlu0 %928 }
 0x203   :  { %v938_v42 = vadd.f32 %v929_v41, %v882_v33 }
 0x205   :  { %946 = vst.msk [vmem:[%s1834_s3 + $0x38] sm:$0xff] %vm587_vm0, %v938_v42 }

// kernel: squrntial_forward.7
= control target key start
LH: loop header
LB: loop body
LE: loop exit
PB: predicated region body
PF: predicated region fallthrough
CT: control target
= control target key end

     0   :  { %s829_s0 = inlined_call_operand.vmem [shape: bf16[2,1024], index: 0, kind: input, shape index: {}]   ;;  %s830_s1 = inlined_call_operand.vmem [shape: bf16[64,1024], index: 1, kind: input, shape index: {}]   ;;  %s831_s2 = inlined_call_operand.vmem [shape: f32[1,64], index: 2, kind: input, shape index: {}]   ;;  %s832_s3 = inlined_call_operand.vmem [shape: bf16[10,64], index: 3, kind: input, shape index: {}]   ;;  %s833_s4 = inlined_call_operand.vmem [shape: f32[1,10], index: 4, kind: input, shape index: {}]   ;;  %s834_s5 = inlined_call_operand.hbm [shape: f32[2,10], index: 5, kind: output, shape index: {}]  }
   0x1   :  { %v489_v0 = vld [vmem:[%s830_s1 + $0xc0] sm:$0xf]  ;;  %v548_v2 = vld [vmem:[%s830_s1 + $0xc4] sm:$0xf]  ;;  %v497_v5 = vld [vmem:[%s830_s1 + $0xc8] sm:$0xf] }
   0x2   :  { %v552_v1 = vld [vmem:[%s830_s1 + $0xdc] sm:$0xf0]  ;;  %v491_v4 = vld [vmem:[%s830_s1 + $0xe0] sm:$0xf0]  ;;  %v553_v6 = vld [vmem:[%s830_s1 + $0xe4] sm:$0xf0] }
   0x3   :  { %v490_v3 = vor.u32 %v552_v1, %v489_v0  ;;  %v494_v7 = vor.u32 %v548_v2, %v491_v4  ;;  %v498_v8 = vor.u32 %v553_v6, %v497_v5  ;;  %v549_v9 = vld [vmem:[%s830_s1 + $0xcc] sm:$0xf]  ;;  %v457_v12 = vld [vmem:[%s830_s1 + $0x80] sm:$0xf]  ;;  %v540_v14 = vld [vmem:[%s830_s1 + $0x84] sm:$0xf] }
   0x4   :  { %v499_v10 = vld [vmem:[%s830_s1 + $0xe8] sm:$0xf0]  ;;  %v544_v13 = vld [vmem:[%s830_s1 + $0x9c] sm:$0xf0]  ;;  %v459_v15 = vld [vmem:[%s830_s1 + $0xa0] sm:$0xf0] }
   0x5   :  { %241 = vmatpush.bf16.xpose.msra.mxu0 %v490_v3  ;;  %v502_v11 = vor.u32 %v549_v9, %v499_v10  ;;  %254 = vmatpush.bf16.xpose.msra.mxu1 %v494_v7  ;;  %v465_v16 = vld [vmem:[%s830_s1 + $0x88] sm:$0xf]  ;;  %v541_v18 = vld [vmem:[%s830_s1 + $0x8c] sm:$0xf]  ;;  %v458_v20 = vor.u32 %v544_v13, %v457_v12  ;;  %v462_v21 = vor.u32 %v540_v14, %v459_v15  ;;  %v425_v24 = vld [vmem:[%s830_s1 + $0x40] sm:$0xf] }
   0x6   :  { %267 = vmatpush.bf16.xpose.msra.mxu2 %v498_v8  ;;  %v545_v17 = vld [vmem:[%s830_s1 + $0xa4] sm:$0xf0]  ;;  %v467_v19 = vld [vmem:[%s830_s1 + $0xa8] sm:$0xf0]  ;;  %v536_v25 = vld [vmem:[%s830_s1 + $0x5c] sm:$0xf0] }
   0x7   :  { %280 = vmatpush.bf16.xpose.msra.mxu3 %v502_v11  ;;  %v466_v22 = vor.u32 %v545_v17, %v465_v16  ;;  %v470_v23 = vor.u32 %v541_v18, %v467_v19  ;;  %v532_v26 = vld [vmem:[%s830_s1 + $0x44] sm:$0xf]  ;;  %v433_v28 = vld [vmem:[%s830_s1 + $0x48] sm:$0xf]  ;;  %v533_v31 = vld [vmem:[%s830_s1 + $0x4c] sm:$0xf]  ;;  %v426_v33 = vor.u32 %v536_v25, %v425_v24 }
   0x8   :  { %v427_v27 = vld [vmem:[%s830_s1 + $0x60] sm:$0xf0]  ;;  %v537_v29 = vld [vmem:[%s830_s1 + $0x64] sm:$0xf0]  ;;  %v435_v32 = vld [vmem:[%s830_s1 + $0x68] sm:$0xf0] }
   0x9   :  { %v22_v30 = vld [vmem:[%s829_s0] sm:$0xff]  ;;  %v430_v34 = vor.u32 %v532_v26, %v427_v27  ;;  %v434_v35 = vor.u32 %v537_v29, %v433_v28  ;;  %v438_v36 = vor.u32 %v533_v31, %v435_v32  ;;  %v401_v41 = vld [vmem:[%s830_s1 + $0x8] sm:$0xf]  ;;  %v525_v43 = vld [vmem:[%s830_s1 + $0xc] sm:$0xf] }
   0xa   :  { %60 = vst [vmem:[#allocation1] ss:$9 sm:$0xff] %v22_v30  ;;  %v393_v37 = vld [vmem:[%s830_s1] sm:$0xf]  ;;  %v524_v39 = vld [vmem:[%s830_s1 + $0x4] sm:$0xf] }
   0xb   :  { %v528_v38 = vld [vmem:[%s830_s1 + $0x1c] sm:$0xf0]  ;;  %v395_v40 = vld [vmem:[%s830_s1 + $0x20] sm:$0xf0]  ;;  %v529_v42 = vld [vmem:[%s830_s1 + $0x24] sm:$0xf0] }
   0xc   :  { %v403_v44 = vld [vmem:[%s830_s1 + $0x28] sm:$0xf0]  ;;  %v505_v45 = vld [vmem:[%s830_s1 + $0xd0] sm:$0xf]  ;;  %v550_v47 = vld [vmem:[%s830_s1 + $0xd4] sm:$0xf]  ;;  %v394_v50 = vor.u32 %v528_v38, %v393_v37  ;;  %v398_v53 = vor.u32 %v524_v39, %v395_v40  ;;  %v402_v54 = vor.u32 %v529_v42, %v401_v41 }
   0xd   :  { %242 = vmatpush.bf16.xpose.msra.mxu0 %v458_v20  ;;  %255 = vmatpush.bf16.xpose.msra.mxu1 %v462_v21  ;;  %v554_v46 = vld [vmem:[%s830_s1 + $0xec] sm:$0xf0]  ;;  %v507_v48 = vld [vmem:[%s830_s1 + $0xf0] sm:$0xf0]  ;;  %v513_v49 = vld [vmem:[%s830_s1 + $0xd8] sm:$0xf] }
   0xe   :  { %268 = vmatpush.bf16.xpose.msra.mxu2 %v466_v22  ;;  %v555_v51 = vld [vmem:[%s830_s1 + $0xf4] sm:$0xf0]  ;;  %v551_v52 = vld [vmem:[%s830_s1 + $0xdc] sm:$0xf] }
   0xf   :  { %281 = vmatpush.bf16.xpose.msra.mxu3 %v470_v23  ;;  %v515_v55 = vld [vmem:[%s830_s1 + $0xf8] sm:$0xf0] }
  0x15   :  { %243 = vmatpush.bf16.xpose.msra.mxu0 %v426_v33  ;;  %256 = vmatpush.bf16.xpose.msra.mxu1 %v430_v34 }
  0x16   :  { %269 = vmatpush.bf16.xpose.msra.mxu2 %v434_v35 }
  0x17   :  { %282 = vmatpush.bf16.xpose.msra.mxu3 %v438_v36 }
  0x18   :  { %10 = vsyncpa [#allocation3], 0  ;;  %v406_v56 = vor.u32 %v525_v43, %v403_v44  ;;  %v506_v57 = vor.u32 %v554_v46, %v505_v45  ;;  %v510_v58 = vor.u32 %v550_v47, %v507_v48  ;;  %v514_v59 = vor.u32 %v555_v51, %v513_v49  ;;  %v473_v61 = vld [vmem:[%s830_s1 + $0x90] sm:$0xf]  ;;  %v542_v63 = vld [vmem:[%s830_s1 + $0x94] sm:$0xf] }
  0x19   :  { %v518_v60 = vor.u32 %v551_v52, %v515_v55  ;;  %v546_v62 = vld [vmem:[%s830_s1 + $0xac] sm:$0xf0]  ;;  %v475_v0 = vld [vmem:[%s830_s1 + $0xb0] sm:$0xf0]  ;;  %v481_v1 = vld [vmem:[%s830_s1 + $0x98] sm:$0xf] }
  0x1a   :  { %v547_v2 = vld [vmem:[%s830_s1 + $0xb4] sm:$0xf0]  ;;  %v543_v3 = vld [vmem:[%s830_s1 + $0x9c] sm:$0xf]  ;;  %v61_v4 = vld [vmem:[#allocation1] sm:$0xff]  ;;  %v474_v8 = vor.u32 %v546_v62, %v473_v61  ;;  %v478_v10 = vor.u32 %v542_v63, %v475_v0  ;;  %vm353_vm0 = vcmask 523264  }
  0x1b   :  { %v63_v5 = vld [vmem:[#allocation1 + $0x12] sm:$0xff]  ;;  %v483_v6 = vld [vmem:[%s830_s1 + $0xb8] sm:$0xf0]  ;;  %v62_v7 = vld [vmem:[#allocation1 + $0x9] sm:$0xff]  ;;  %v482_v11 = vor.u32 %v547_v2, %v481_v1  ;;  %s586_s24 = smov [#allocation2]   ;;  %s382_s28 = sshll.u32 %s834_s5, 4  ;;  %s383_s28 = int_to_ptr.hbm [resolvable:$true] %s382_s28 }
  0x1c   :  { %v64_v9 = vld [vmem:[#allocation1 + $0x1b] sm:$0xff]  ;;  %v486_v12 = vor.u32 %v543_v3, %v483_v6  ;;  %v441_v13 = vld [vmem:[%s830_s1 + $0x50] sm:$0xf]  ;;  %v534_v15 = vld [vmem:[%s830_s1 + $0x54] sm:$0xf]  ;;  %s380_s25 = sshll.u32 %s586_s24, 4  ;;  %s381_s25 = int_to_ptr.vmem [resolvable:$true] %s380_s25 }
  0x1d   :  { %244 = vmatpush.bf16.xpose.msra.mxu0 %v394_v50  ;;  %257 = vmatpush.bf16.xpose.msra.mxu1 %v398_v53  ;;  %v538_v14 = vld [vmem:[%s830_s1 + $0x6c] sm:$0xf0]  ;;  %v443_v16 = vld [vmem:[%s830_s1 + $0x70] sm:$0xf0]  ;;  %v449_v17 = vld [vmem:[%s830_s1 + $0x58] sm:$0xf] }
  0x1e   :  { %270 = vmatpush.bf16.xpose.msra.mxu2 %v402_v54  ;;  %v539_v18 = vld [vmem:[%s830_s1 + $0x74] sm:$0xf0]  ;;  %v535_v19 = vld [vmem:[%s830_s1 + $0x5c] sm:$0xf]  ;;  %v442_v21 = vor.u32 %v538_v14, %v441_v13  ;;  %v446_v22 = vor.u32 %v534_v15, %v443_v16  ;;  %v409_v25 = vld [vmem:[%s830_s1 + $0x10] sm:$0xf] }
  0x1f   :  { %283 = vmatpush.bf16.xpose.msra.mxu3 %v406_v56  ;;  %v451_v20 = vld [vmem:[%s830_s1 + $0x78] sm:$0xf0]  ;;  %v450_v23 = vor.u32 %v539_v18, %v449_v17  ;;  %v530_v26 = vld [vmem:[%s830_s1 + $0x2c] sm:$0xf0]  ;;  %v526_v27 = vld [vmem:[%s830_s1 + $0x14] sm:$0xf] }
  0x20   :  { %v454_v24 = vor.u32 %v535_v19, %v451_v20  ;;  %v411_v28 = vld [vmem:[%s830_s1 + $0x30] sm:$0xf0]  ;;  %v417_v29 = vld [vmem:[%s830_s1 + $0x18] sm:$0xf]  ;;  %v527_v31 = vld [vmem:[%s830_s1 + $0x1c] sm:$0xf]  ;;  %v410_v33 = vor.u32 %v530_v26, %v409_v25 }
  0x21   :  { %v531_v30 = vld [vmem:[%s830_s1 + $0x34] sm:$0xf0]  ;;  %v419_v32 = vld [vmem:[%s830_s1 + $0x38] sm:$0xf0]  ;;  %v414_v34 = vor.u32 %v526_v27, %v411_v28  ;;  %v65_v37 = vld [vmem:[#allocation1 + $0x24] sm:$0xff]  ;;  %vm373_vm1 = vcmask 74752  }
  0x22   :  { %v418_v35 = vor.u32 %v531_v30, %v417_v29  ;;  %v422_v36 = vor.u32 %v527_v31, %v419_v32  ;;  %v66_v38 = vld [vmem:[#allocation1 + $0x2d] sm:$0xff]  ;;  %v67_v39 = vld [vmem:[#allocation1 + $0x36] sm:$0xff]  ;;  %v68_v40 = vld [vmem:[#allocation1 + $0x3f] sm:$0xff] }
  0x23   :  { %v521_v41 = vld [vmem:[%s832_s3] sm:$0xf]  ;;  %v556_v42 = vld [vmem:[%s832_s3] sm:$0x10] }
  0x24   :  { %245 = vmatmul.bf16.vlgmr.msra.gmra.mxu0 %v61_v4  ;;  %258 = vmatmul.bf16.vlgmr.msra.gmra.mxu1 %v62_v7  ;;  %v522_v43 = vor.u32 %v556_v42, %v521_v41  ;;  %v558_v51 = vld [vmem:[%s831_s2] ss:$0 sm:$0xff] }
  0x25   :  { %293 = vmatpush.bf16.xpose.msrb.mxu0 %v506_v57  ;;  %306 = vmatpush.bf16.xpose.msrb.mxu1 %v510_v58  ;;  %v559_v7 = vld [vmem:[%s833_s4] ss:$0 sm:$0xff] }
  0x26   :  { %319 = vmatpush.bf16.xpose.msrb.mxu2 %v514_v59  ;;  %284 = vmatmul.bf16.vlgmr.msra.gmra.mxu3 %v64_v9  ;;  %v358_v44 = vsel %vm353_vm0, %v522_v43, 0 }
  0x27   :  { %332 = vmatpush.bf16.xpose.msrb.mxu3 %v518_v60  ;;  %271 = vmatmul.bf16.vlgmr.msra.gmra.mxu2 %v63_v5 }
  0x2d   :  { %294 = vmatpush.bf16.xpose.msrb.mxu0 %v474_v8  ;;  %307 = vmatpush.bf16.xpose.msrb.mxu1 %v478_v10 }
  0x2e   :  { %320 = vmatpush.bf16.xpose.msrb.mxu2 %v482_v11 }
  0x2f   :  { %333 = vmatpush.bf16.xpose.msrb.mxu3 %v486_v12 }
  0x35   :  { %295 = vmatpush.bf16.xpose.msrb.mxu0 %v442_v21  ;;  %308 = vmatpush.bf16.xpose.msrb.mxu1 %v446_v22 }
  0x36   :  { %321 = vmatpush.bf16.xpose.msrb.mxu2 %v450_v23 }
  0x37   :  { %334 = vmatpush.bf16.xpose.msrb.mxu3 %v454_v24 }
  0x3d   :  { %296 = vmatpush.bf16.xpose.msrb.mxu0 %v410_v33  ;;  %309 = vmatpush.bf16.xpose.msrb.mxu1 %v414_v34 }
  0x3e   :  { %322 = vmatpush.bf16.xpose.msrb.mxu2 %v418_v35 }
  0x3f   :  { %335 = vmatpush.bf16.xpose.msrb.mxu3 %v422_v36 }
  0x44   :  { %297 = vmatmul.bf16.vlgmr.msrb.gmra.mxu0 %v65_v37  ;;  %310 = vmatmul.bf16.vlgmr.msrb.gmra.mxu1 %v66_v38 }
  0x45   :  { %323 = vmatmul.bf16.vlgmr.msrb.gmra.mxu2 %v67_v39  ;;  %367 = vmatpush.bf16.xpose.msra.mxu0 %v358_v44 }
  0x46   :  { %336 = vmatmul.bf16.vlgmr.msrb.gmra.mxu3 %v68_v40 }
  0xa1   :  { %v246_v45 = vpop.f32.mrf.mxu0  ;;  %v259_v46 = vpop.f32.mrf.mxu1 }
  0xa2   :  { %v247_v52 = vadd.f32 %v558_v51, %v246_v45 }
  0xa4   :  { %v260_v55 = vadd.f32 %v259_v46, %v247_v52 }
  0xa9   :  { %v285_v48 = vpop.f32.mrf.mxu3  ;;  %v248_v49 = vpop.f32.mrf.mxu0 }
  0xaa   :  { %v272_v47 = vpop.f32.mrf.mxu2  ;;  %v261_v50 = vpop.f32.mrf.mxu1 }
  0xab   :  { %v273_v56 = vadd.f32 %v272_v47, %v260_v55 }
  0xad   :  { %v286_v57 = vadd.f32 %v285_v48, %v273_v56 }
  0xb1   :  { %v287_v54 = vpop.f32.mrf.mxu3 }
  0xb2   :  { %v274_v53 = vpop.f32.mrf.mxu2 }
  0xc1   :  { %v298_v58 = vpop.f32.mrf.mxu0  ;;  %v311_v59 = vpop.f32.mrf.mxu1 }
  0xc2   :  { %v299_v60 = vadd.f32 %v298_v58, %v286_v57 }
  0xc4   :  { %v312_v61 = vadd.f32 %v311_v59, %v299_v60 }
  0xc8   :  { %v324_v62 = vpop.f32.mrf.mxu2 }
  0xc9   :  { %v325_v63 = vadd.f32 %v324_v62, %v312_v61  ;;  %v337_v0 = vpop.f32.mrf.mxu3  ;;  %v300_v1 = vpop.f32.mrf.mxu0 }
  0xca   :  { %v313_v2 = vpop.f32.mrf.mxu1 }
  0xcb   :  { %v338_v3 = vadd.f32 %v337_v0, %v325_v63 }
  0xcd   :  { %v341_v4 = vpack.c.bf16 %v338_v3, %v338_v3 }
  0xcf   :  { %523 = vmatmul.msk.bf16.vlgmr.msra.gmra.mxu0 %vm353_vm0, %v341_v4 }
  0xd0   :  { %v326_v5 = vpop.f32.mrf.mxu2 }
  0xd1   :  { %v339_v6 = vpop.f32.mrf.mxu3 }
 0x14c   :  { %v369_v8 = vpop.f32.mrf.mxu0 }
 0x14d   :  { %v370_v9 = vadd.f32 %v559_v7, %v369_v8 }
 0x14f   :  { %374 = vst.msk [vmem:[#allocation2] sm:$0x3] %vm373_vm1, %v370_v9 }
 0x150   :  { %385 = dma.vmem_to_hbm [thread:$0]  %s381_s25, 32, %s383_s28, [#allocation3]  }
 0x154   :  { %v371_v10 = vpop.f32.mrf.mxu0 }
 0x155   :  { %584 = dma.done.wait [#allocation3], 32  }
 0x156   :  { %585 = vsyncadd [#allocation3], 4294967264 }
 0x157   :  { %390 = vsyncpa [#allocation3], 1 }

</bundles_post_ra>
